<compile_context>
chip_gen: v7x
topology: tpu7x:2x2x1
jax: 0.10.0
libtpu: 0.0.40
codegen_flags: <defaults>
</compile_context>

<pallas_src>
import jax
import jax.numpy as jnp
from jax.experimental import pallas as pl
from jax.experimental.pallas import tpu as pltpu

# ------------------------------- static sizes (forced by the module) -------------
T_STEPS, BATCH = 3, 2
C_IN, H_IN, W_IN = 2, 34, 34          # 34x34 input forced by lg1_s = 12*15*15
KH = KW = 5
O1, O2 = 12, 32
OH1 = H_IN - KH + 1                   # 30
PH1 = OH1 // 2                        # 15
OH2 = PH1 - KH + 1                    # 11
PH2 = OH2 // 2                        # 5
LIN = W_IN * C_IN                     # 68   conv1 input row width (w-major, c-minor)
L1 = OH1 * O1                         # 360  conv1 output row width
LP1 = PH1 * O1                        # 180  pooled conv1 row width (= conv2 input width)
L2 = OH2 * O2                         # 352  conv2 output row width
LP2 = PH2 * O2                        # 160  pooled conv2 row width
NFC = 10


# ------------------------------- Pallas kernel 1 ----------------------------------
def _conv1_pool_norm_kernel(x_ref, w_ref, b_ref, o_ref):
    """One (t, b) sample: conv1 (banded matmuls) + bias + 2x2 maxpool + L2 normalize."""
    x = x_ref[0, 0]                                              # (34, 68)
    acc = jnp.zeros((OH1, L1), jnp.float32)
    for ki in range(KH):
        acc = acc + jnp.dot(x[ki:ki + OH1, :], w_ref[ki],
                            preferred_element_type=jnp.float32)  # (30, 360)
    c1 = acc + b_ref[...]                                        # + bias (1, 360)

    # 2x2 max pool: row pairs, then lane (ow) pairs of width O1.
    rows = jnp.concatenate(
        [jnp.maximum(c1[2 * p:2 * p + 1, :], c1[2 * p + 1:2 * p + 2, :])
         for p in range(PH1)], axis=0)                           # (15, 360)
    m1 = jnp.concatenate(
        [jnp.maximum(rows[:, 2 * O1 * p:2 * O1 * p + O1],
                     rows[:, 2 * O1 * p + O1:2 * O1 * p + 2 * O1])
         for p in range(PH1)], axis=1)                           # (15, 180)

    # F.normalize over all 2700 features of this sample (eps = 1e-12 on the norm).
    ss = jnp.sum(jnp.sum(m1 * m1, axis=1, keepdims=True), axis=0, keepdims=True)
    o_ref[0, 0] = m1 * jax.lax.rsqrt(jnp.maximum(ss, 1e-24))


def conv1_stage(x, m1w, b1row):
    T, B = x.shape[0], x.shape[1]
    return pl.pallas_call(
        _conv1_pool_norm_kernel,
        grid=(T, B),
        in_specs=[
            pl.BlockSpec((1, 1, H_IN, LIN), lambda t, b: (t, b, 0, 0)),
            pl.BlockSpec((KH, LIN, L1), lambda t, b: (0, 0, 0)),
            pl.BlockSpec((1, L1), lambda t, b: (0, 0)),
        ],
        out_specs=pl.BlockSpec((1, 1, PH1, LP1), lambda t, b: (t, b, 0, 0)),
        out_shape=jax.ShapeDtypeStruct((T, B, PH1, LP1), jnp.float32),
        compiler_params=pltpu.CompilerParams(
            dimension_semantics=("parallel", "parallel"),
            vmem_limit_bytes=32 * 1024 * 1024),
    )(x, m1w, b1row)


# ------------------------------- Pallas kernel 2 ----------------------------------
def _recurrent_kernel(m1n_ref, w2_ref, b2_ref,
                      t1_ref, d1_ref, t2_ref, d2_ref, t3_ref, d3_ref,
                      w1a_ref, ma_ref, ga_ref, w1b_ref, mb_ref, gb_ref, fcb_ref,
                      out_ref, pot1, pot2, pot3):
    t = pl.program_id(0)
    B = pot1.shape[0]

    @pl.when(t == 0)
    def _init():
        pot1[...] = jnp.zeros_like(pot1)
        pot2[...] = jnp.zeros_like(pot2)
        pot3[...] = jnp.zeros_like(pot3)
        out_ref[...] = jnp.zeros_like(out_ref)

    # ---------------- LinearGated 1 (input already L2-normalized) ----------------
    p1 = pot1[...] + m1n_ref[0]                                  # (B, 15, 180)
    gated1 = jnp.maximum(p1 - t1_ref[...], 0.0)
    # post_gated = NegativeReLUGradientFunction(gated) = gated * 0  -> contributes 0
    pot1[...] = jnp.maximum(jnp.where(gated1 == 0.0, p1, 0.0) * d1_ref[...], 0.0)

    # ---------------- conv2 (banded matmuls, NHWC rows) + 2x2 maxpool -------------
    m2_parts = []
    for b in range(B):
        g = gated1[b]                                            # (15, 180)
        acc = jnp.zeros((OH2, L2), jnp.float32)
        for ki in range(KH):
            acc = acc + jnp.dot(g[ki:ki + OH2, :], w2_ref[ki],
                                preferred_element_type=jnp.float32)
        c2 = acc + b2_ref[...]                                   # (11, 352)
        rows = jnp.concatenate(
            [jnp.maximum(c2[2 * p:2 * p + 1, :], c2[2 * p + 1:2 * p + 2, :])
             for p in range(PH2)], axis=0)                       # (5, 352), oh=10 dropped
        m2_parts.append(jnp.concatenate(
            [jnp.maximum(rows[:, 2 * O2 * p:2 * O2 * p + O2],
                         rows[:, 2 * O2 * p + O2:2 * O2 * p + 2 * O2])
             for p in range(PH2)], axis=1))                      # (5, 160), ow=10 dropped
    m2 = jnp.stack(m2_parts, axis=0)                             # (B, 5, 160)

    # ---------------- normalize + LinearGated 2 -----------------------------------
    ss2 = jnp.sum(jnp.sum(m2 * m2, axis=2, keepdims=True), axis=1, keepdims=True)
    m2n = m2 * jax.lax.rsqrt(jnp.maximum(ss2, 1e-24))
    p2 = pot2[...] + m2n
    gated2 = jnp.maximum(p2 - t2_ref[...], 0.0)
    pot2[...] = jnp.maximum(jnp.where(gated2 == 0.0, p2, 0.0) * d2_ref[...], 0.0)

    # ---------------- fc1 over cat(lg1, lg2): wide matmul + diag-block reduce -----
    fc_rows = []
    for b in range(B):
        ta = jnp.dot(gated1[b], w1a_ref[...], preferred_element_type=jnp.float32)  # (15, 150)
        sa = jnp.sum(ta * ma_ref[...], axis=0, keepdims=True)                      # (1, 150)
        tb = jnp.dot(gated2[b], w1b_ref[...], preferred_element_type=jnp.float32)  # (5, 50)
        sb = jnp.sum(tb * mb_ref[...], axis=0, keepdims=True)                      # (1, 50)
        fc_rows.append(jnp.dot(sa, ga_ref[...], preferred_element_type=jnp.float32)
                       + jnp.dot(sb, gb_ref[...], preferred_element_type=jnp.float32)
                       + fcb_ref[...])                                             # (1, 10)
    fc = jnp.concatenate(fc_rows, axis=0)                        # (B, 10)

    # ---------------- normalize + LinearGated 3 + time accumulation ---------------
    ss3 = jnp.sum(fc * fc, axis=1, keepdims=True)
    fcn = fc * jax.lax.rsqrt(jnp.maximum(ss3, 1e-24))
    p3 = pot3[...] + fcn
    gated3 = jnp.maximum(p3 - t3_ref[...], 0.0)
    pot3[...] = jnp.maximum(jnp.where(gated3 == 0.0, p3, 0.0) * d3_ref[...], 0.0)
    out_ref[...] = out_ref[...] + gated3                         # stack(...).sum(dim=0)


def recurrent_stage(m1n, prep):
    T, B = m1n.shape[0], m1n.shape[1]

    def const_spec(a):
        nd = a.ndim
        return pl.BlockSpec(a.shape, lambda t, _nd=nd: (0,) * _nd)

    order = ("m2w", "b2row", "t1", "d1", "t2", "d2", "t3", "d3",
             "w1a_wide", "mask1", "g1", "w1b_wide", "mask2", "g2", "fcb")
    in_specs = [pl.BlockSpec((1, B, PH1, LP1), lambda t: (t, 0, 0, 0))]
    in_specs += [const_spec(prep[k]) for k in order]

    return pl.pallas_call(
        _recurrent_kernel,
        grid=(T,),
        in_specs=in_specs,
        out_specs=pl.BlockSpec((B, NFC), lambda t: (0, 0)),
        out_shape=jax.ShapeDtypeStruct((B, NFC), jnp.float32),
        scratch_shapes=[pltpu.VMEM((B, PH1, LP1), jnp.float32),   # pot1
                        pltpu.VMEM((B, PH2, LP2), jnp.float32),   # pot2
                        pltpu.VMEM((B, NFC), jnp.float32)],       # pot3
        compiler_params=pltpu.CompilerParams(
            dimension_semantics=("arbitrary",),
            vmem_limit_bytes=32 * 1024 * 1024),
    )(m1n, *[prep[k] for k in order])


# ------------------------------- parameter construction ---------------------------
def conv_band(w, w_in):
    """w: (O, C, KH, KW) -> (KH, w_in*C, ow*O) banded matrices for NHWC-row conv."""
    O, C, kh, kw = w.shape
    ow_n = w_in - kw + 1
    j = jnp.arange(w_in * C)
    m = jnp.arange(ow_n * O)
    w_idx, c_idx = j // C, j % C
    ow_idx, o_idx = m // O, m % O
    kj = w_idx[:, None] - ow_idx[None, :]
    valid = (kj >= 0) & (kj < kw)
    kj_c = jnp.clip(kj, 0, kw - 1)
    bands = []
    for ki in range(kh):
        vals = w[o_idx[None, :], c_idx[:, None], ki, kj_c]       # (w_in*C, ow*O)
        bands.append(jnp.where(valid, vals, 0.0))
    return jnp.stack(bands, axis=0).astype(jnp.float32)


def init_params(key):
    ks = jax.random.split(key, 13)

    def uni(k, shape, scale):
        return (jax.random.uniform(k, shape, dtype=jnp.float32) * 2.0 - 1.0) * scale

    def lg(k1, k2, shape):
        tresh = jax.random.uniform(k1, shape, dtype=jnp.float32) * 0.04
        decay = jax.random.uniform(k2, shape, dtype=jnp.float32) * 0.5 + 0.4
        return tresh, decay

    c1_w = uni(ks[0], (O1, C_IN, KH, KW), 0.2)
    c1_b = uni(ks[1], (O1,), 0.2)
    c2_w = uni(ks[2], (O2, O1, KH, KW), 0.05)
    c2_b = uni(ks[3], (O2,), 0.05)
    w1a = uni(ks[4], (PH1, LP1, NFC), 0.017)     # fc1 weights, lg1 block, (h, w*c, out)
    w1b = uni(ks[5], (PH2, LP2, NFC), 0.017)     # fc1 weights, lg2 block
    fc_b = uni(ks[6], (NFC,), 0.017)
    t1, d1 = lg(ks[7], ks[8], (PH1, LP1))
    t2, d2 = lg(ks[9], ks[10], (PH2, LP2))
    t3, d3 = lg(ks[11], ks[12], (1, NFC))

    ja = jnp.arange(PH1 * NFC)
    jb = jnp.arange(PH2 * NFC)
    return {
        # convs as banded row-matmul weights + tiled per-row biases (built once)
        "m1w": conv_band(c1_w, W_IN),                       # (5, 68, 360)
        "b1row": jnp.tile(c1_b, OH1)[None, :],              # (1, 360)
        "m2w": conv_band(c2_w, PH1),                        # (5, 180, 352)
        "b2row": jnp.tile(c2_b, OH2)[None, :],              # (1, 352)
        # fc1 as wide matmul + diag-block reduction helpers (built once)
        "w1a_wide": jnp.transpose(w1a, (1, 0, 2)).reshape(LP1, PH1 * NFC),   # (180, 150)
        "mask1": (ja[None, :] // NFC == jnp.arange(PH1)[:, None]).astype(jnp.float32),
        "g1": (ja[:, None] % NFC == jnp.arange(NFC)[None, :]).astype(jnp.float32),
        "w1b_wide": jnp.transpose(w1b, (1, 0, 2)).reshape(LP2, PH2 * NFC),   # (160, 50)
        "mask2": (jb[None, :] // NFC == jnp.arange(PH2)[:, None]).astype(jnp.float32),
        "g2": (jb[:, None] % NFC == jnp.arange(NFC)[None, :]).astype(jnp.float32),
        "fcb": fc_b[None, :],                               # (1, 10)
        # LinearGated parameters
        "t1": t1, "d1": d1, "t2": t2, "d2": d2, "t3": t3, "d3": d3,
    }


# ------------------------------- forward -------------------------------------------
def net_forward(prep, data):
    """data: (T, B, 2, 34, 34) NCHW -> (B, 10), matching Net.forward semantics."""
    T, B = data.shape[0], data.shape[1]
    # NCHW -> NHWC "row" layout (T, B, H, W*C); done once per forward, outside the loop.
    x = jnp.transpose(data, (0, 1, 3, 4, 2)).reshape(T, B, H_IN, LIN)
    m1n = conv1_stage(x, prep["m1w"], prep["b1row"])        # (T, B, 15, 180)
    return recurrent_stage(m1n, prep)                       # (B, 10)


if __name__ == "__main__":
    key = jax.random.PRNGKey(0)
    pkey, dkey = jax.random.split(key)
    prep = init_params(pkey)

    data = jax.random.normal(
        dkey, (T_STEPS, BATCH, C_IN, H_IN, W_IN), dtype=jnp.float32)

    fwd = jax.jit(net_forward)
    out = jax.block_until_ready(fwd(prep, data))
    assert out.shape == (BATCH, NFC) and out.dtype == jnp.float32
    assert bool(jnp.all(jnp.isfinite(out)))
    print("KERNEL_OK")
</pallas_src>

<mosaic_0001>
module attributes {stable_mosaic.version = 11 : i64} {
  func.func @_conv1_pool_norm_kernel(%arg0: i32, %arg1: i32, %arg2: memref<1x1x34x68xf32, #tpu.memory_space<vmem>>, %arg3: memref<5x68x360xf32, #tpu.memory_space<vmem>>, %arg4: memref<1x360xf32, #tpu.memory_space<vmem>>, %arg5: memref<1x1x15x180xf32, #tpu.memory_space<vmem>>) attributes {dimension_semantics = [#tpu.dimension_semantics<parallel>, #tpu.dimension_semantics<parallel>], iteration_bounds = array<i64: 3, 2>, scalar_prefetch = 0 : i64, scratch_operands = 0 : i64, tpu.core_type = #tpu.core_type<tc>, window_params = [{transform_indices = @transform_0, window_bounds = array<i64: 1, 1, 34, 68>}, {pipeline_mode = #tpu.pipeline_mode<synchronous>, transform_indices = @transform_1, window_bounds = array<i64: 5, 68, 360>}, {pipeline_mode = #tpu.pipeline_mode<synchronous>, transform_indices = @transform_2, window_bounds = array<i64: 1, 360>}, {transform_indices = @transform_3, window_bounds = array<i64: 1, 1, 15, 180>}]} {
    %c0 = arith.constant 0 : index
    %c0_0 = arith.constant 0 : index
    %c0_1 = arith.constant 0 : index
    %c0_2 = arith.constant 0 : index
    %0 = vector.load %arg2[%c0, %c0_0, %c0_1, %c0_2] : memref<1x1x34x68xf32, #tpu.memory_space<vmem>>, vector<1x1x34x68xf32>
    %1 = vector.shape_cast %0 : vector<1x1x34x68xf32> to vector<34x68xf32>
    %cst = arith.constant 0.000000e+00 : f32
    %2 = vector.broadcast %cst : f32 to vector<30x360xf32>
    %3 = vector.extract_strided_slice %1 {offsets = [0, 0], sizes = [30, 68], strides = [1, 1]} : vector<34x68xf32> to vector<30x68xf32>
    %c0_3 = arith.constant 0 : index
    %c0_4 = arith.constant 0 : index
    %c0_5 = arith.constant 0 : index
    %4 = vector.load %arg3[%c0_3, %c0_4, %c0_5] : memref<5x68x360xf32, #tpu.memory_space<vmem>>, vector<1x68x360xf32>
    %5 = vector.shape_cast %4 : vector<1x68x360xf32> to vector<68x360xf32>
    %cst_6 = arith.constant dense<0.000000e+00> : vector<30x360xf32>
    %6 = tpu.matmul %3, %5, %cst_6 {dimension_numbers = #tpu.dot_dimension_numbers<[1], [0], [0], [1], [0, 0, 1, 1], [], []>} : vector<30x68xf32>, vector<68x360xf32>, vector<30x360xf32> -> vector<30x360xf32>
    %7 = arith.addf %2, %6 : vector<30x360xf32>
    %8 = vector.extract_strided_slice %1 {offsets = [1, 0], sizes = [30, 68], strides = [1, 1]} : vector<34x68xf32> to vector<30x68xf32>
    %c1 = arith.constant 1 : index
    %c0_7 = arith.constant 0 : index
    %c0_8 = arith.constant 0 : index
    %9 = vector.load %arg3[%c1, %c0_7, %c0_8] : memref<5x68x360xf32, #tpu.memory_space<vmem>>, vector<1x68x360xf32>
    %10 = vector.shape_cast %9 : vector<1x68x360xf32> to vector<68x360xf32>
    %cst_9 = arith.constant dense<0.000000e+00> : vector<30x360xf32>
    %11 = tpu.matmul %8, %10, %cst_9 {dimension_numbers = #tpu.dot_dimension_numbers<[1], [0], [0], [1], [0, 0, 1, 1], [], []>} : vector<30x68xf32>, vector<68x360xf32>, vector<30x360xf32> -> vector<30x360xf32>
    %12 = arith.addf %7, %11 : vector<30x360xf32>
    %13 = vector.extract_strided_slice %1 {offsets = [2, 0], sizes = [30, 68], strides = [1, 1]} : vector<34x68xf32> to vector<30x68xf32>
    %c2 = arith.constant 2 : index
    %c0_10 = arith.constant 0 : index
    %c0_11 = arith.constant 0 : index
    %14 = vector.load %arg3[%c2, %c0_10, %c0_11] : memref<5x68x360xf32, #tpu.memory_space<vmem>>, vector<1x68x360xf32>
    %15 = vector.shape_cast %14 : vector<1x68x360xf32> to vector<68x360xf32>
    %cst_12 = arith.constant dense<0.000000e+00> : vector<30x360xf32>
    %16 = tpu.matmul %13, %15, %cst_12 {dimension_numbers = #tpu.dot_dimension_numbers<[1], [0], [0], [1], [0, 0, 1, 1], [], []>} : vector<30x68xf32>, vector<68x360xf32>, vector<30x360xf32> -> vector<30x360xf32>
    %17 = arith.addf %12, %16 : vector<30x360xf32>
    %18 = vector.extract_strided_slice %1 {offsets = [3, 0], sizes = [30, 68], strides = [1, 1]} : vector<34x68xf32> to vector<30x68xf32>
    %c3 = arith.constant 3 : index
    %c0_13 = arith.constant 0 : index
    %c0_14 = arith.constant 0 : index
    %19 = vector.load %arg3[%c3, %c0_13, %c0_14] : memref<5x68x360xf32, #tpu.memory_space<vmem>>, vector<1x68x360xf32>
    %20 = vector.shape_cast %19 : vector<1x68x360xf32> to vector<68x360xf32>
    %cst_15 = arith.constant dense<0.000000e+00> : vector<30x360xf32>
    %21 = tpu.matmul %18, %20, %cst_15 {dimension_numbers = #tpu.dot_dimension_numbers<[1], [0], [0], [1], [0, 0, 1, 1], [], []>} : vector<30x68xf32>, vector<68x360xf32>, vector<30x360xf32> -> vector<30x360xf32>
    %22 = arith.addf %17, %21 : vector<30x360xf32>
    %23 = vector.extract_strided_slice %1 {offsets = [4, 0], sizes = [30, 68], strides = [1, 1]} : vector<34x68xf32> to vector<30x68xf32>
    %c4 = arith.constant 4 : index
    %c0_16 = arith.constant 0 : index
    %c0_17 = arith.constant 0 : index
    %24 = vector.load %arg3[%c4, %c0_16, %c0_17] : memref<5x68x360xf32, #tpu.memory_space<vmem>>, vector<1x68x360xf32>
    %25 = vector.shape_cast %24 : vector<1x68x360xf32> to vector<68x360xf32>
    %cst_18 = arith.constant dense<0.000000e+00> : vector<30x360xf32>
    %26 = tpu.matmul %23, %25, %cst_18 {dimension_numbers = #tpu.dot_dimension_numbers<[1], [0], [0], [1], [0, 0, 1, 1], [], []>} : vector<30x68xf32>, vector<68x360xf32>, vector<30x360xf32> -> vector<30x360xf32>
    %27 = arith.addf %22, %26 : vector<30x360xf32>
    %c0_19 = arith.constant 0 : index
    %c0_20 = arith.constant 0 : index
    %28 = vector.load %arg4[%c0_19, %c0_20] : memref<1x360xf32, #tpu.memory_space<vmem>>, vector<1x360xf32>
    %29 = vector.broadcast %28 : vector<1x360xf32> to vector<30x360xf32>
    %30 = arith.addf %27, %29 : vector<30x360xf32>
    %31 = vector.extract_strided_slice %30 {offsets = [0, 0], sizes = [1, 360], strides = [1, 1]} : vector<30x360xf32> to vector<1x360xf32>
    %32 = vector.extract_strided_slice %30 {offsets = [1, 0], sizes = [1, 360], strides = [1, 1]} : vector<30x360xf32> to vector<1x360xf32>
    %33 = arith.maximumf %31, %32 : vector<1x360xf32>
    %34 = vector.extract_strided_slice %30 {offsets = [2, 0], sizes = [1, 360], strides = [1, 1]} : vector<30x360xf32> to vector<1x360xf32>
    %35 = vector.extract_strided_slice %30 {offsets = [3, 0], sizes = [1, 360], strides = [1, 1]} : vector<30x360xf32> to vector<1x360xf32>
    %36 = arith.maximumf %34, %35 : vector<1x360xf32>
    %37 = vector.extract_strided_slice %30 {offsets = [4, 0], sizes = [1, 360], strides = [1, 1]} : vector<30x360xf32> to vector<1x360xf32>
    %38 = vector.extract_strided_slice %30 {offsets = [5, 0], sizes = [1, 360], strides = [1, 1]} : vector<30x360xf32> to vector<1x360xf32>
    %39 = arith.maximumf %37, %38 : vector<1x360xf32>
    %40 = vector.extract_strided_slice %30 {offsets = [6, 0], sizes = [1, 360], strides = [1, 1]} : vector<30x360xf32> to vector<1x360xf32>
    %41 = vector.extract_strided_slice %30 {offsets = [7, 0], sizes = [1, 360], strides = [1, 1]} : vector<30x360xf32> to vector<1x360xf32>
    %42 = arith.maximumf %40, %41 : vector<1x360xf32>
    %43 = vector.extract_strided_slice %30 {offsets = [8, 0], sizes = [1, 360], strides = [1, 1]} : vector<30x360xf32> to vector<1x360xf32>
    %44 = vector.extract_strided_slice %30 {offsets = [9, 0], sizes = [1, 360], strides = [1, 1]} : vector<30x360xf32> to vector<1x360xf32>
    %45 = arith.maximumf %43, %44 : vector<1x360xf32>
    %46 = vector.extract_strided_slice %30 {offsets = [10, 0], sizes = [1, 360], strides = [1, 1]} : vector<30x360xf32> to vector<1x360xf32>
    %47 = vector.extract_strided_slice %30 {offsets = [11, 0], sizes = [1, 360], strides = [1, 1]} : vector<30x360xf32> to vector<1x360xf32>
    %48 = arith.maximumf %46, %47 : vector<1x360xf32>
    %49 = vector.extract_strided_slice %30 {offsets = [12, 0], sizes = [1, 360], strides = [1, 1]} : vector<30x360xf32> to vector<1x360xf32>
    %50 = vector.extract_strided_slice %30 {offsets = [13, 0], sizes = [1, 360], strides = [1, 1]} : vector<30x360xf32> to vector<1x360xf32>
    %51 = arith.maximumf %49, %50 : vector<1x360xf32>
    %52 = vector.extract_strided_slice %30 {offsets = [14, 0], sizes = [1, 360], strides = [1, 1]} : vector<30x360xf32> to vector<1x360xf32>
    %53 = vector.extract_strided_slice %30 {offsets = [15, 0], sizes = [1, 360], strides = [1, 1]} : vector<30x360xf32> to vector<1x360xf32>
    %54 = arith.maximumf %52, %53 : vector<1x360xf32>
    %55 = vector.extract_strided_slice %30 {offsets = [16, 0], sizes = [1, 360], strides = [1, 1]} : vector<30x360xf32> to vector<1x360xf32>
    %56 = vector.extract_strided_slice %30 {offsets = [17, 0], sizes = [1, 360], strides = [1, 1]} : vector<30x360xf32> to vector<1x360xf32>
    %57 = arith.maximumf %55, %56 : vector<1x360xf32>
    %58 = vector.extract_strided_slice %30 {offsets = [18, 0], sizes = [1, 360], strides = [1, 1]} : vector<30x360xf32> to vector<1x360xf32>
    %59 = vector.extract_strided_slice %30 {offsets = [19, 0], sizes = [1, 360], strides = [1, 1]} : vector<30x360xf32> to vector<1x360xf32>
    %60 = arith.maximumf %58, %59 : vector<1x360xf32>
    %61 = vector.extract_strided_slice %30 {offsets = [20, 0], sizes = [1, 360], strides = [1, 1]} : vector<30x360xf32> to vector<1x360xf32>
    %62 = vector.extract_strided_slice %30 {offsets = [21, 0], sizes = [1, 360], strides = [1, 1]} : vector<30x360xf32> to vector<1x360xf32>
    %63 = arith.maximumf %61, %62 : vector<1x360xf32>
    %64 = vector.extract_strided_slice %30 {offsets = [22, 0], sizes = [1, 360], strides = [1, 1]} : vector<30x360xf32> to vector<1x360xf32>
    %65 = vector.extract_strided_slice %30 {offsets = [23, 0], sizes = [1, 360], strides = [1, 1]} : vector<30x360xf32> to vector<1x360xf32>
    %66 = arith.maximumf %64, %65 : vector<1x360xf32>
    %67 = vector.extract_strided_slice %30 {offsets = [24, 0], sizes = [1, 360], strides = [1, 1]} : vector<30x360xf32> to vector<1x360xf32>
    %68 = vector.extract_strided_slice %30 {offsets = [25, 0], sizes = [1, 360], strides = [1, 1]} : vector<30x360xf32> to vector<1x360xf32>
    %69 = arith.maximumf %67, %68 : vector<1x360xf32>
    %70 = vector.extract_strided_slice %30 {offsets = [26, 0], sizes = [1, 360], strides = [1, 1]} : vector<30x360xf32> to vector<1x360xf32>
    %71 = vector.extract_strided_slice %30 {offsets = [27, 0], sizes = [1, 360], strides = [1, 1]} : vector<30x360xf32> to vector<1x360xf32>
    %72 = arith.maximumf %70, %71 : vector<1x360xf32>
    %73 = vector.extract_strided_slice %30 {offsets = [28, 0], sizes = [1, 360], strides = [1, 1]} : vector<30x360xf32> to vector<1x360xf32>
    %74 = vector.extract_strided_slice %30 {offsets = [29, 0], sizes = [1, 360], strides = [1, 1]} : vector<30x360xf32> to vector<1x360xf32>
    %75 = arith.maximumf %73, %74 : vector<1x360xf32>
    %76 = tpu.concatenate %33, %36, %39, %42, %45, %48, %51, %54, %57, %60, %63, %66, %69, %72, %75 in 0 : vector<1x360xf32>, vector<1x360xf32>, vector<1x360xf32>, vector<1x360xf32>, vector<1x360xf32>, vector<1x360xf32>, vector<1x360xf32>, vector<1x360xf32>, vector<1x360xf32>, vector<1x360xf32>, vector<1x360xf32>, vector<1x360xf32>, vector<1x360xf32>, vector<1x360xf32>, vector<1x360xf32> -> vector<15x360xf32>
    %77 = vector.extract_strided_slice %76 {offsets = [0, 0], sizes = [15, 12], strides = [1, 1]} : vector<15x360xf32> to vector<15x12xf32>
    %78 = vector.extract_strided_slice %76 {offsets = [0, 12], sizes = [15, 12], strides = [1, 1]} : vector<15x360xf32> to vector<15x12xf32>
    %79 = arith.maximumf %77, %78 : vector<15x12xf32>
    %80 = vector.extract_strided_slice %76 {offsets = [0, 24], sizes = [15, 12], strides = [1, 1]} : vector<15x360xf32> to vector<15x12xf32>
    %81 = vector.extract_strided_slice %76 {offsets = [0, 36], sizes = [15, 12], strides = [1, 1]} : vector<15x360xf32> to vector<15x12xf32>
    %82 = arith.maximumf %80, %81 : vector<15x12xf32>
    %83 = vector.extract_strided_slice %76 {offsets = [0, 48], sizes = [15, 12], strides = [1, 1]} : vector<15x360xf32> to vector<15x12xf32>
    %84 = vector.extract_strided_slice %76 {offsets = [0, 60], sizes = [15, 12], strides = [1, 1]} : vector<15x360xf32> to vector<15x12xf32>
    %85 = arith.maximumf %83, %84 : vector<15x12xf32>
    %86 = vector.extract_strided_slice %76 {offsets = [0, 72], sizes = [15, 12], strides = [1, 1]} : vector<15x360xf32> to vector<15x12xf32>
    %87 = vector.extract_strided_slice %76 {offsets = [0, 84], sizes = [15, 12], strides = [1, 1]} : vector<15x360xf32> to vector<15x12xf32>
    %88 = arith.maximumf %86, %87 : vector<15x12xf32>
    %89 = vector.extract_strided_slice %76 {offsets = [0, 96], sizes = [15, 12], strides = [1, 1]} : vector<15x360xf32> to vector<15x12xf32>
    %90 = vector.extract_strided_slice %76 {offsets = [0, 108], sizes = [15, 12], strides = [1, 1]} : vector<15x360xf32> to vector<15x12xf32>
    %91 = arith.maximumf %89, %90 : vector<15x12xf32>
    %92 = vector.extract_strided_slice %76 {offsets = [0, 120], sizes = [15, 12], strides = [1, 1]} : vector<15x360xf32> to vector<15x12xf32>
    %93 = vector.extract_strided_slice %76 {offsets = [0, 132], sizes = [15, 12], strides = [1, 1]} : vector<15x360xf32> to vector<15x12xf32>
    %94 = arith.maximumf %92, %93 : vector<15x12xf32>
    %95 = vector.extract_strided_slice %76 {offsets = [0, 144], sizes = [15, 12], strides = [1, 1]} : vector<15x360xf32> to vector<15x12xf32>
    %96 = vector.extract_strided_slice %76 {offsets = [0, 156], sizes = [15, 12], strides = [1, 1]} : vector<15x360xf32> to vector<15x12xf32>
    %97 = arith.maximumf %95, %96 : vector<15x12xf32>
    %98 = vector.extract_strided_slice %76 {offsets = [0, 168], sizes = [15, 12], strides = [1, 1]} : vector<15x360xf32> to vector<15x12xf32>
    %99 = vector.extract_strided_slice %76 {offsets = [0, 180], sizes = [15, 12], strides = [1, 1]} : vector<15x360xf32> to vector<15x12xf32>
    %100 = arith.maximumf %98, %99 : vector<15x12xf32>
    %101 = vector.extract_strided_slice %76 {offsets = [0, 192], sizes = [15, 12], strides = [1, 1]} : vector<15x360xf32> to vector<15x12xf32>
    %102 = vector.extract_strided_slice %76 {offsets = [0, 204], sizes = [15, 12], strides = [1, 1]} : vector<15x360xf32> to vector<15x12xf32>
    %103 = arith.maximumf %101, %102 : vector<15x12xf32>
    %104 = vector.extract_strided_slice %76 {offsets = [0, 216], sizes = [15, 12], strides = [1, 1]} : vector<15x360xf32> to vector<15x12xf32>
    %105 = vector.extract_strided_slice %76 {offsets = [0, 228], sizes = [15, 12], strides = [1, 1]} : vector<15x360xf32> to vector<15x12xf32>
    %106 = arith.maximumf %104, %105 : vector<15x12xf32>
    %107 = vector.extract_strided_slice %76 {offsets = [0, 240], sizes = [15, 12], strides = [1, 1]} : vector<15x360xf32> to vector<15x12xf32>
    %108 = vector.extract_strided_slice %76 {offsets = [0, 252], sizes = [15, 12], strides = [1, 1]} : vector<15x360xf32> to vector<15x12xf32>
    %109 = arith.maximumf %107, %108 : vector<15x12xf32>
    %110 = vector.extract_strided_slice %76 {offsets = [0, 264], sizes = [15, 12], strides = [1, 1]} : vector<15x360xf32> to vector<15x12xf32>
    %111 = vector.extract_strided_slice %76 {offsets = [0, 276], sizes = [15, 12], strides = [1, 1]} : vector<15x360xf32> to vector<15x12xf32>
    %112 = arith.maximumf %110, %111 : vector<15x12xf32>
    %113 = vector.extract_strided_slice %76 {offsets = [0, 288], sizes = [15, 12], strides = [1, 1]} : vector<15x360xf32> to vector<15x12xf32>
    %114 = vector.extract_strided_slice %76 {offsets = [0, 300], sizes = [15, 12], strides = [1, 1]} : vector<15x360xf32> to vector<15x12xf32>
    %115 = arith.maximumf %113, %114 : vector<15x12xf32>
    %116 = vector.extract_strided_slice %76 {offsets = [0, 312], sizes = [15, 12], strides = [1, 1]} : vector<15x360xf32> to vector<15x12xf32>
    %117 = vector.extract_strided_slice %76 {offsets = [0, 324], sizes = [15, 12], strides = [1, 1]} : vector<15x360xf32> to vector<15x12xf32>
    %118 = arith.maximumf %116, %117 : vector<15x12xf32>
    %119 = vector.extract_strided_slice %76 {offsets = [0, 336], sizes = [15, 12], strides = [1, 1]} : vector<15x360xf32> to vector<15x12xf32>
    %120 = vector.extract_strided_slice %76 {offsets = [0, 348], sizes = [15, 12], strides = [1, 1]} : vector<15x360xf32> to vector<15x12xf32>
    %121 = arith.maximumf %119, %120 : vector<15x12xf32>
    %122 = tpu.concatenate %79, %82, %85, %88, %91, %94, %97, %100, %103, %106, %109, %112, %115, %118, %121 in 1 : vector<15x12xf32>, vector<15x12xf32>, vector<15x12xf32>, vector<15x12xf32>, vector<15x12xf32>, vector<15x12xf32>, vector<15x12xf32>, vector<15x12xf32>, vector<15x12xf32>, vector<15x12xf32>, vector<15x12xf32>, vector<15x12xf32>, vector<15x12xf32>, vector<15x12xf32>, vector<15x12xf32> -> vector<15x180xf32>
    %123 = arith.mulf %122, %122 : vector<15x180xf32>
    %cst_21 = arith.constant dense<0.000000e+00> : vector<15xf32>
    %124 = vector.multi_reduction <add>, %123, %cst_21 [1] : vector<15x180xf32> to vector<15xf32>
    %125 = vector.shape_cast %124 : vector<15xf32> to vector<15x1xf32>
    %cst_22 = arith.constant dense<0.000000e+00> : vector<1xf32>
    %126 = vector.multi_reduction <add>, %125, %cst_22 [0] : vector<15x1xf32> to vector<1xf32>
    %127 = vector.shape_cast %126 : vector<1xf32> to vector<1x1xf32>
    %cst_23 = arith.constant 1.000000e-24 : f32
    %128 = vector.broadcast %cst_23 : f32 to vector<1x1xf32>
    %129 = arith.maximumf %127, %128 : vector<1x1xf32>
    %130 = math.rsqrt %129 : vector<1x1xf32>
    %131 = vector.broadcast %130 : vector<1x1xf32> to vector<15x180xf32>
    %132 = arith.mulf %122, %131 : vector<15x180xf32>
    %c0_24 = arith.constant 0 : index
    %c0_25 = arith.constant 0 : index
    %c0_26 = arith.constant 0 : index
    %c0_27 = arith.constant 0 : index
    %133 = vector.load %arg5[%c0_24, %c0_25, %c0_26, %c0_27] : memref<1x1x15x180xf32, #tpu.memory_space<vmem>>, vector<1x1x15x180xf32>
    %134 = vector.shape_cast %133 : vector<1x1x15x180xf32> to vector<15x180xf32>
    %135 = vector.shape_cast %132 : vector<15x180xf32> to vector<1x1x15x180xf32>
    tpu.vector_store %arg5[%c0_24, %c0_25, %c0_26, %c0_27], %135 {strides = array<i32>} : memref<1x1x15x180xf32, #tpu.memory_space<vmem>>, vector<1x1x15x180xf32>,
    return
  }
  func.func @transform_0(%arg0: i32, %arg1: i32) -> (i32, i32, i32, i32) {
    %c0_i32 = arith.constant 0 : i32
    %c0_i32_0 = arith.constant 0 : i32
    %c0_i32_1 = arith.constant 0 : i32
    return %arg0, %arg1, %c0_i32, %c0_i32_0 : i32, i32, i32, i32
  }
  func.func @transform_1(%arg0: i32, %arg1: i32) -> (i32, i32, i32) {
    %c0_i32 = arith.constant 0 : i32
    %c0_i32_0 = arith.constant 0 : i32
    %c0_i32_1 = arith.constant 0 : i32
    %c0_i32_2 = arith.constant 0 : i32
    return %c0_i32, %c0_i32_0, %c0_i32_1 : i32, i32, i32
  }
  func.func @transform_2(%arg0: i32, %arg1: i32) -> (i32, i32) {
    %c0_i32 = arith.constant 0 : i32
    %c0_i32_0 = arith.constant 0 : i32
    %c0_i32_1 = arith.constant 0 : i32
    return %c0_i32, %c0_i32_0 : i32, i32
  }
  func.func @transform_3(%arg0: i32, %arg1: i32) -> (i32, i32, i32, i32) {
    %c0_i32 = arith.constant 0 : i32
    %c0_i32_0 = arith.constant 0 : i32
    %c0_i32_1 = arith.constant 0 : i32
    return %arg0, %arg1, %c0_i32, %c0_i32_0 : i32, i32, i32, i32
  }
}

module attributes {stable_mosaic.version = 11 : i64} {
  func.func @_recurrent_kernel(%arg0: i32, %arg1: memref<1x2x15x180xf32, #tpu.memory_space<vmem>>, %arg2: memref<5x180x352xf32, #tpu.memory_space<vmem>>, %arg3: memref<1x352xf32, #tpu.memory_space<vmem>>, %arg4: memref<15x180xf32, #tpu.memory_space<vmem>>, %arg5: memref<15x180xf32, #tpu.memory_space<vmem>>, %arg6: memref<5x160xf32, #tpu.memory_space<vmem>>, %arg7: memref<5x160xf32, #tpu.memory_space<vmem>>, %arg8: memref<1x10xf32, #tpu.memory_space<vmem>>, %arg9: memref<1x10xf32, #tpu.memory_space<vmem>>, %arg10: memref<180x150xf32, #tpu.memory_space<vmem>>, %arg11: memref<15x150xf32, #tpu.memory_space<vmem>>, %arg12: memref<150x10xf32, #tpu.memory_space<vmem>>, %arg13: memref<160x50xf32, #tpu.memory_space<vmem>>, %arg14: memref<5x50xf32, #tpu.memory_space<vmem>>, %arg15: memref<50x10xf32, #tpu.memory_space<vmem>>, %arg16: memref<1x10xf32, #tpu.memory_space<vmem>>, %arg17: memref<2x10xf32, #tpu.memory_space<vmem>>, %arg18: memref<2x15x180xf32, #tpu.memory_space<vmem>>, %arg19: memref<2x5x160xf32, #tpu.memory_space<vmem>>, %arg20: memref<2x10xf32, #tpu.memory_space<vmem>>) attributes {dimension_semantics = [#tpu.dimension_semantics<arbitrary>], iteration_bounds = array<i64: 3>, scalar_prefetch = 0 : i64, scratch_operands = 3 : i64, tpu.core_type = #tpu.core_type<tc>, window_params = [{transform_indices = @transform_0, window_bounds = array<i64: 1, 2, 15, 180>}, {pipeline_mode = #tpu.pipeline_mode<synchronous>, transform_indices = @transform_1, window_bounds = array<i64: 5, 180, 352>}, {pipeline_mode = #tpu.pipeline_mode<synchronous>, transform_indices = @transform_2, window_bounds = array<i64: 1, 352>}, {pipeline_mode = #tpu.pipeline_mode<synchronous>, transform_indices = @transform_3, window_bounds = array<i64: 15, 180>}, {pipeline_mode = #tpu.pipeline_mode<synchronous>, transform_indices = @transform_4, window_bounds = array<i64: 15, 180>}, {pipeline_mode = #tpu.pipeline_mode<synchronous>, transform_indices = @transform_5, window_bounds = array<i64: 5, 160>}, {pipeline_mode = #tpu.pipeline_mode<synchronous>, transform_indices = @transform_6, window_bounds = array<i64: 5, 160>}, {pipeline_mode = #tpu.pipeline_mode<synchronous>, transform_indices = @transform_7, window_bounds = array<i64: 1, 10>}, {pipeline_mode = #tpu.pipeline_mode<synchronous>, transform_indices = @transform_8, window_bounds = array<i64: 1, 10>}, {pipeline_mode = #tpu.pipeline_mode<synchronous>, transform_indices = @transform_9, window_bounds = array<i64: 180, 150>}, {pipeline_mode = #tpu.pipeline_mode<synchronous>, transform_indices = @transform_10, window_bounds = array<i64: 15, 150>}, {pipeline_mode = #tpu.pipeline_mode<synchronous>, transform_indices = @transform_11, window_bounds = array<i64: 150, 10>}, {pipeline_mode = #tpu.pipeline_mode<synchronous>, transform_indices = @transform_12, window_bounds = array<i64: 160, 50>}, {pipeline_mode = #tpu.pipeline_mode<synchronous>, transform_indices = @transform_13, window_bounds = array<i64: 5, 50>}, {pipeline_mode = #tpu.pipeline_mode<synchronous>, transform_indices = @transform_14, window_bounds = array<i64: 50, 10>}, {pipeline_mode = #tpu.pipeline_mode<synchronous>, transform_indices = @transform_15, window_bounds = array<i64: 1, 10>}, {pipeline_mode = #tpu.pipeline_mode<synchronous>, transform_indices = @transform_16, window_bounds = array<i64: 2, 10>}]} {
    %c0_i32 = arith.constant 0 : i32
    %0 = arith.cmpi eq, %arg0, %c0_i32 : i32
    %1 = arith.extui %0 : i1 to i32
    %c0_i32_0 = arith.constant 0 : i32
    %2 = arith.cmpi ne, %1, %c0_i32_0 : i32
    scf.if %2 {
      %cst_134 = arith.constant 0.000000e+00 : f32
      %257 = vector.broadcast %cst_134 : f32 to vector<2x15x180xf32>
      %c0_135 = arith.constant 0 : index
      %c0_136 = arith.constant 0 : index
      %c0_137 = arith.constant 0 : index
      %258 = vector.load %arg18[%c0_135, %c0_136, %c0_137] : memref<2x15x180xf32, #tpu.memory_space<vmem>>, vector<2x15x180xf32>
      tpu.vector_store %arg18[%c0_135, %c0_136, %c0_137], %257 {strides = array<i32>} : memref<2x15x180xf32, #tpu.memory_space<vmem>>, vector<2x15x180xf32>,
      %cst_138 = arith.constant 0.000000e+00 : f32
      %259 = vector.broadcast %cst_138 : f32 to vector<2x5x160xf32>
      %c0_139 = arith.constant 0 : index
      %c0_140 = arith.constant 0 : index
      %c0_141 = arith.constant 0 : index
      %260 = vector.load %arg19[%c0_139, %c0_140, %c0_141] : memref<2x5x160xf32, #tpu.memory_space<vmem>>, vector<2x5x160xf32>
      tpu.vector_store %arg19[%c0_139, %c0_140, %c0_141], %259 {strides = array<i32>} : memref<2x5x160xf32, #tpu.memory_space<vmem>>, vector<2x5x160xf32>,
      %cst_142 = arith.constant 0.000000e+00 : f32
      %261 = vector.broadcast %cst_142 : f32 to vector<2x10xf32>
      %c0_143 = arith.constant 0 : index
      %c0_144 = arith.constant 0 : index
      %262 = vector.load %arg20[%c0_143, %c0_144] : memref<2x10xf32, #tpu.memory_space<vmem>>, vector<2x10xf32>
      tpu.vector_store %arg20[%c0_143, %c0_144], %261 {strides = array<i32>} : memref<2x10xf32, #tpu.memory_space<vmem>>, vector<2x10xf32>,
      %cst_145 = arith.constant 0.000000e+00 : f32
      %263 = vector.broadcast %cst_145 : f32 to vector<2x10xf32>
      %c0_146 = arith.constant 0 : index
      %c0_147 = arith.constant 0 : index
      %264 = vector.load %arg17[%c0_146, %c0_147] : memref<2x10xf32, #tpu.memory_space<vmem>>, vector<2x10xf32>
      tpu.vector_store %arg17[%c0_146, %c0_147], %263 {strides = array<i32>} : memref<2x10xf32, #tpu.memory_space<vmem>>, vector<2x10xf32>,
    } else {
    }
    %c0 = arith.constant 0 : index
    %c0_1 = arith.constant 0 : index
    %c0_2 = arith.constant 0 : index
    %3 = vector.load %arg18[%c0, %c0_1, %c0_2] : memref<2x15x180xf32, #tpu.memory_space<vmem>>, vector<2x15x180xf32>
    %c0_3 = arith.constant 0 : index
    %c0_4 = arith.constant 0 : index
    %c0_5 = arith.constant 0 : index
    %c0_6 = arith.constant 0 : index
    %4 = vector.load %arg1[%c0_3, %c0_4, %c0_5, %c0_6] : memref<1x2x15x180xf32, #tpu.memory_space<vmem>>, vector<1x2x15x180xf32>
    %5 = vector.shape_cast %4 : vector<1x2x15x180xf32> to vector<2x15x180xf32>
    %6 = arith.addf %3, %5 : vector<2x15x180xf32>
    %c0_7 = arith.constant 0 : index
    %c0_8 = arith.constant 0 : index
    %7 = vector.load %arg4[%c0_7, %c0_8] : memref<15x180xf32, #tpu.memory_space<vmem>>, vector<15x180xf32>
    %8 = vector.shape_cast %7 : vector<15x180xf32> to vector<1x15x180xf32>
    %9 = vector.broadcast %8 : vector<1x15x180xf32> to vector<2x15x180xf32>
    %10 = arith.subf %6, %9 : vector<2x15x180xf32>
    %cst = arith.constant 0.000000e+00 : f32
    %11 = vector.broadcast %cst : f32 to vector<2x15x180xf32>
    %12 = arith.maximumf %10, %11 : vector<2x15x180xf32>
    %cst_9 = arith.constant 0.000000e+00 : f32
    %13 = vector.broadcast %cst_9 : f32 to vector<2x15x180xf32>
    %14 = arith.cmpf oeq, %12, %13 : vector<2x15x180xf32>
    %cst_10 = arith.constant 0.000000e+00 : f32
    %15 = vector.broadcast %cst_10 : f32 to vector<2x15x180xf32>
    %16 = arith.select %14, %6, %15 : vector<2x15x180xi1>, vector<2x15x180xf32>
    %c0_11 = arith.constant 0 : index
    %c0_12 = arith.constant 0 : index
    %17 = vector.load %arg5[%c0_11, %c0_12] : memref<15x180xf32, #tpu.memory_space<vmem>>, vector<15x180xf32>
    %18 = vector.shape_cast %17 : vector<15x180xf32> to vector<1x15x180xf32>
    %19 = vector.broadcast %18 : vector<1x15x180xf32> to vector<2x15x180xf32>
    %20 = arith.mulf %16, %19 : vector<2x15x180xf32>
    %cst_13 = arith.constant 0.000000e+00 : f32
    %21 = vector.broadcast %cst_13 : f32 to vector<2x15x180xf32>
    %22 = arith.maximumf %20, %21 : vector<2x15x180xf32>
    %c0_14 = arith.constant 0 : index
    %c0_15 = arith.constant 0 : index
    %c0_16 = arith.constant 0 : index
    %23 = vector.load %arg18[%c0_14, %c0_15, %c0_16] : memref<2x15x180xf32, #tpu.memory_space<vmem>>, vector<2x15x180xf32>
    tpu.vector_store %arg18[%c0_14, %c0_15, %c0_16], %22 {strides = array<i32>} : memref<2x15x180xf32, #tpu.memory_space<vmem>>, vector<2x15x180xf32>,
    %24 = vector.extract_strided_slice %12 {offsets = [0, 0, 0], sizes = [1, 15, 180], strides = [1, 1, 1]} : vector<2x15x180xf32> to vector<1x15x180xf32>
    %25 = vector.shape_cast %24 : vector<1x15x180xf32> to vector<15x180xf32>
    %cst_17 = arith.constant 0.000000e+00 : f32
    %26 = vector.broadcast %cst_17 : f32 to vector<11x352xf32>
    %27 = vector.extract_strided_slice %25 {offsets = [0, 0], sizes = [11, 180], strides = [1, 1]} : vector<15x180xf32> to vector<11x180xf32>
    %c0_18 = arith.constant 0 : index
    %c0_19 = arith.constant 0 : index
    %c0_20 = arith.constant 0 : index
    %28 = vector.load %arg2[%c0_18, %c0_19, %c0_20] : memref<5x180x352xf32, #tpu.memory_space<vmem>>, vector<1x180x352xf32>
    %29 = vector.shape_cast %28 : vector<1x180x352xf32> to vector<180x352xf32>
    %cst_21 = arith.constant dense<0.000000e+00> : vector<11x352xf32>
    %30 = tpu.matmul %27, %29, %cst_21 {dimension_numbers = #tpu.dot_dimension_numbers<[1], [0], [0], [1], [0, 0, 1, 1], [], []>} : vector<11x180xf32>, vector<180x352xf32>, vector<11x352xf32> -> vector<11x352xf32>
    %31 = arith.addf %26, %30 : vector<11x352xf32>
    %32 = vector.extract_strided_slice %25 {offsets = [1, 0], sizes = [11, 180], strides = [1, 1]} : vector<15x180xf32> to vector<11x180xf32>
    %c1 = arith.constant 1 : index
    %c0_22 = arith.constant 0 : index
    %c0_23 = arith.constant 0 : index
    %33 = vector.load %arg2[%c1, %c0_22, %c0_23] : memref<5x180x352xf32, #tpu.memory_space<vmem>>, vector<1x180x352xf32>
    %34 = vector.shape_cast %33 : vector<1x180x352xf32> to vector<180x352xf32>
    %cst_24 = arith.constant dense<0.000000e+00> : vector<11x352xf32>
    %35 = tpu.matmul %32, %34, %cst_24 {dimension_numbers = #tpu.dot_dimension_numbers<[1], [0], [0], [1], [0, 0, 1, 1], [], []>} : vector<11x180xf32>, vector<180x352xf32>, vector<11x352xf32> -> vector<11x352xf32>
    %36 = arith.addf %31, %35 : vector<11x352xf32>
    %37 = vector.extract_strided_slice %25 {offsets = [2, 0], sizes = [11, 180], strides = [1, 1]} : vector<15x180xf32> to vector<11x180xf32>
    %c2 = arith.constant 2 : index
    %c0_25 = arith.constant 0 : index
    %c0_26 = arith.constant 0 : index
    %38 = vector.load %arg2[%c2, %c0_25, %c0_26] : memref<5x180x352xf32, #tpu.memory_space<vmem>>, vector<1x180x352xf32>
    %39 = vector.shape_cast %38 : vector<1x180x352xf32> to vector<180x352xf32>
    %cst_27 = arith.constant dense<0.000000e+00> : vector<11x352xf32>
    %40 = tpu.matmul %37, %39, %cst_27 {dimension_numbers = #tpu.dot_dimension_numbers<[1], [0], [0], [1], [0, 0, 1, 1], [], []>} : vector<11x180xf32>, vector<180x352xf32>, vector<11x352xf32> -> vector<11x352xf32>
    %41 = arith.addf %36, %40 : vector<11x352xf32>
    %42 = vector.extract_strided_slice %25 {offsets = [3, 0], sizes = [11, 180], strides = [1, 1]} : vector<15x180xf32> to vector<11x180xf32>
    %c3 = arith.constant 3 : index
    %c0_28 = arith.constant 0 : index
    %c0_29 = arith.constant 0 : index
    %43 = vector.load %arg2[%c3, %c0_28, %c0_29] : memref<5x180x352xf32, #tpu.memory_space<vmem>>, vector<1x180x352xf32>
    %44 = vector.shape_cast %43 : vector<1x180x352xf32> to vector<180x352xf32>
    %cst_30 = arith.constant dense<0.000000e+00> : vector<11x352xf32>
    %45 = tpu.matmul %42, %44, %cst_30 {dimension_numbers = #tpu.dot_dimension_numbers<[1], [0], [0], [1], [0, 0, 1, 1], [], []>} : vector<11x180xf32>, vector<180x352xf32>, vector<11x352xf32> -> vector<11x352xf32>
    %46 = arith.addf %41, %45 : vector<11x352xf32>
    %47 = vector.extract_strided_slice %25 {offsets = [4, 0], sizes = [11, 180], strides = [1, 1]} : vector<15x180xf32> to vector<11x180xf32>
    %c4 = arith.constant 4 : index
    %c0_31 = arith.constant 0 : index
    %c0_32 = arith.constant 0 : index
    %48 = vector.load %arg2[%c4, %c0_31, %c0_32] : memref<5x180x352xf32, #tpu.memory_space<vmem>>, vector<1x180x352xf32>
    %49 = vector.shape_cast %48 : vector<1x180x352xf32> to vector<180x352xf32>
    %cst_33 = arith.constant dense<0.000000e+00> : vector<11x352xf32>
    %50 = tpu.matmul %47, %49, %cst_33 {dimension_numbers = #tpu.dot_dimension_numbers<[1], [0], [0], [1], [0, 0, 1, 1], [], []>} : vector<11x180xf32>, vector<180x352xf32>, vector<11x352xf32> -> vector<11x352xf32>
    %51 = arith.addf %46, %50 : vector<11x352xf32>
    %c0_34 = arith.constant 0 : index
    %c0_35 = arith.constant 0 : index
    %52 = vector.load %arg3[%c0_34, %c0_35] : memref<1x352xf32, #tpu.memory_space<vmem>>, vector<1x352xf32>
    %53 = vector.broadcast %52 : vector<1x352xf32> to vector<11x352xf32>
    %54 = arith.addf %51, %53 : vector<11x352xf32>
    %55 = vector.extract_strided_slice %54 {offsets = [0, 0], sizes = [1, 352], strides = [1, 1]} : vector<11x352xf32> to vector<1x352xf32>
    %56 = vector.extract_strided_slice %54 {offsets = [1, 0], sizes = [1, 352], strides = [1, 1]} : vector<11x352xf32> to vector<1x352xf32>
    %57 = arith.maximumf %55, %56 : vector<1x352xf32>
    %58 = vector.extract_strided_slice %54 {offsets = [2, 0], sizes = [1, 352], strides = [1, 1]} : vector<11x352xf32> to vector<1x352xf32>
    %59 = vector.extract_strided_slice %54 {offsets = [3, 0], sizes = [1, 352], strides = [1, 1]} : vector<11x352xf32> to vector<1x352xf32>
    %60 = arith.maximumf %58, %59 : vector<1x352xf32>
    %61 = vector.extract_strided_slice %54 {offsets = [4, 0], sizes = [1, 352], strides = [1, 1]} : vector<11x352xf32> to vector<1x352xf32>
    %62 = vector.extract_strided_slice %54 {offsets = [5, 0], sizes = [1, 352], strides = [1, 1]} : vector<11x352xf32> to vector<1x352xf32>
    %63 = arith.maximumf %61, %62 : vector<1x352xf32>
    %64 = vector.extract_strided_slice %54 {offsets = [6, 0], sizes = [1, 352], strides = [1, 1]} : vector<11x352xf32> to vector<1x352xf32>
    %65 = vector.extract_strided_slice %54 {offsets = [7, 0], sizes = [1, 352], strides = [1, 1]} : vector<11x352xf32> to vector<1x352xf32>
    %66 = arith.maximumf %64, %65 : vector<1x352xf32>
    %67 = vector.extract_strided_slice %54 {offsets = [8, 0], sizes = [1, 352], strides = [1, 1]} : vector<11x352xf32> to vector<1x352xf32>
    %68 = vector.extract_strided_slice %54 {offsets = [9, 0], sizes = [1, 352], strides = [1, 1]} : vector<11x352xf32> to vector<1x352xf32>
    %69 = arith.maximumf %67, %68 : vector<1x352xf32>
    %70 = tpu.concatenate %57, %60, %63, %66, %69 in 0 : vector<1x352xf32>, vector<1x352xf32>, vector<1x352xf32>, vector<1x352xf32>, vector<1x352xf32> -> vector<5x352xf32>
    %71 = vector.extract_strided_slice %70 {offsets = [0, 0], sizes = [5, 32], strides = [1, 1]} : vector<5x352xf32> to vector<5x32xf32>
    %72 = vector.extract_strided_slice %70 {offsets = [0, 32], sizes = [5, 32], strides = [1, 1]} : vector<5x352xf32> to vector<5x32xf32>
    %73 = arith.maximumf %71, %72 : vector<5x32xf32>
    %74 = vector.extract_strided_slice %70 {offsets = [0, 64], sizes = [5, 32], strides = [1, 1]} : vector<5x352xf32> to vector<5x32xf32>
    %75 = vector.extract_strided_slice %70 {offsets = [0, 96], sizes = [5, 32], strides = [1, 1]} : vector<5x352xf32> to vector<5x32xf32>
    %76 = arith.maximumf %74, %75 : vector<5x32xf32>
    %77 = vector.extract_strided_slice %70 {offsets = [0, 128], sizes = [5, 32], strides = [1, 1]} : vector<5x352xf32> to vector<5x32xf32>
    %78 = vector.extract_strided_slice %70 {offsets = [0, 160], sizes = [5, 32], strides = [1, 1]} : vector<5x352xf32> to vector<5x32xf32>
    %79 = arith.maximumf %77, %78 : vector<5x32xf32>
    %80 = vector.extract_strided_slice %70 {offsets = [0, 192], sizes = [5, 32], strides = [1, 1]} : vector<5x352xf32> to vector<5x32xf32>
    %81 = vector.extract_strided_slice %70 {offsets = [0, 224], sizes = [5, 32], strides = [1, 1]} : vector<5x352xf32> to vector<5x32xf32>
    %82 = arith.maximumf %80, %81 : vector<5x32xf32>
    %83 = vector.extract_strided_slice %70 {offsets = [0, 256], sizes = [5, 32], strides = [1, 1]} : vector<5x352xf32> to vector<5x32xf32>
    %84 = vector.extract_strided_slice %70 {offsets = [0, 288], sizes = [5, 32], strides = [1, 1]} : vector<5x352xf32> to vector<5x32xf32>
    %85 = arith.maximumf %83, %84 : vector<5x32xf32>
    %86 = tpu.concatenate %73, %76, %79, %82, %85 in 1 : vector<5x32xf32>, vector<5x32xf32>, vector<5x32xf32>, vector<5x32xf32>, vector<5x32xf32> -> vector<5x160xf32>
    %87 = vector.extract_strided_slice %12 {offsets = [1, 0, 0], sizes = [1, 15, 180], strides = [1, 1, 1]} : vector<2x15x180xf32> to vector<1x15x180xf32>
    %88 = vector.shape_cast %87 : vector<1x15x180xf32> to vector<15x180xf32>
    %cst_36 = arith.constant 0.000000e+00 : f32
    %89 = vector.broadcast %cst_36 : f32 to vector<11x352xf32>
    %90 = vector.extract_strided_slice %88 {offsets = [0, 0], sizes = [11, 180], strides = [1, 1]} : vector<15x180xf32> to vector<11x180xf32>
    %c0_37 = arith.constant 0 : index
    %c0_38 = arith.constant 0 : index
    %c0_39 = arith.constant 0 : index
    %91 = vector.load %arg2[%c0_37, %c0_38, %c0_39] : memref<5x180x352xf32, #tpu.memory_space<vmem>>, vector<1x180x352xf32>
    %92 = vector.shape_cast %91 : vector<1x180x352xf32> to vector<180x352xf32>
    %cst_40 = arith.constant dense<0.000000e+00> : vector<11x352xf32>
    %93 = tpu.matmul %90, %92, %cst_40 {dimension_numbers = #tpu.dot_dimension_numbers<[1], [0], [0], [1], [0, 0, 1, 1], [], []>} : vector<11x180xf32>, vector<180x352xf32>, vector<11x352xf32> -> vector<11x352xf32>
    %94 = arith.addf %89, %93 : vector<11x352xf32>
    %95 = vector.extract_strided_slice %88 {offsets = [1, 0], sizes = [11, 180], strides = [1, 1]} : vector<15x180xf32> to vector<11x180xf32>
    %c1_41 = arith.constant 1 : index
    %c0_42 = arith.constant 0 : index
    %c0_43 = arith.constant 0 : index
    %96 = vector.load %arg2[%c1_41, %c0_42, %c0_43] : memref<5x180x352xf32, #tpu.memory_space<vmem>>, vector<1x180x352xf32>
    %97 = vector.shape_cast %96 : vector<1x180x352xf32> to vector<180x352xf32>
    %cst_44 = arith.constant dense<0.000000e+00> : vector<11x352xf32>
    %98 = tpu.matmul %95, %97, %cst_44 {dimension_numbers = #tpu.dot_dimension_numbers<[1], [0], [0], [1], [0, 0, 1, 1], [], []>} : vector<11x180xf32>, vector<180x352xf32>, vector<11x352xf32> -> vector<11x352xf32>
    %99 = arith.addf %94, %98 : vector<11x352xf32>
    %100 = vector.extract_strided_slice %88 {offsets = [2, 0], sizes = [11, 180], strides = [1, 1]} : vector<15x180xf32> to vector<11x180xf32>
    %c2_45 = arith.constant 2 : index
    %c0_46 = arith.constant 0 : index
    %c0_47 = arith.constant 0 : index
    %101 = vector.load %arg2[%c2_45, %c0_46, %c0_47] : memref<5x180x352xf32, #tpu.memory_space<vmem>>, vector<1x180x352xf32>
    %102 = vector.shape_cast %101 : vector<1x180x352xf32> to vector<180x352xf32>
    %cst_48 = arith.constant dense<0.000000e+00> : vector<11x352xf32>
    %103 = tpu.matmul %100, %102, %cst_48 {dimension_numbers = #tpu.dot_dimension_numbers<[1], [0], [0], [1], [0, 0, 1, 1], [], []>} : vector<11x180xf32>, vector<180x352xf32>, vector<11x352xf32> -> vector<11x352xf32>
    %104 = arith.addf %99, %103 : vector<11x352xf32>
    %105 = vector.extract_strided_slice %88 {offsets = [3, 0], sizes = [11, 180], strides = [1, 1]} : vector<15x180xf32> to vector<11x180xf32>
    %c3_49 = arith.constant 3 : index
    %c0_50 = arith.constant 0 : index
    %c0_51 = arith.constant 0 : index
    %106 = vector.load %arg2[%c3_49, %c0_50, %c0_51] : memref<5x180x352xf32, #tpu.memory_space<vmem>>, vector<1x180x352xf32>
    %107 = vector.shape_cast %106 : vector<1x180x352xf32> to vector<180x352xf32>
    %cst_52 = arith.constant dense<0.000000e+00> : vector<11x352xf32>
    %108 = tpu.matmul %105, %107, %cst_52 {dimension_numbers = #tpu.dot_dimension_numbers<[1], [0], [0], [1], [0, 0, 1, 1], [], []>} : vector<11x180xf32>, vector<180x352xf32>, vector<11x352xf32> -> vector<11x352xf32>
    %109 = arith.addf %104, %108 : vector<11x352xf32>
    %110 = vector.extract_strided_slice %88 {offsets = [4, 0], sizes = [11, 180], strides = [1, 1]} : vector<15x180xf32> to vector<11x180xf32>
    %c4_53 = arith.constant 4 : index
    %c0_54 = arith.constant 0 : index
    %c0_55 = arith.constant 0 : index
    %111 = vector.load %arg2[%c4_53, %c0_54, %c0_55] : memref<5x180x352xf32, #tpu.memory_space<vmem>>, vector<1x180x352xf32>
    %112 = vector.shape_cast %111 : vector<1x180x352xf32> to vector<180x352xf32>
    %cst_56 = arith.constant dense<0.000000e+00> : vector<11x352xf32>
    %113 = tpu.matmul %110, %112, %cst_56 {dimension_numbers = #tpu.dot_dimension_numbers<[1], [0], [0], [1], [0, 0, 1, 1], [], []>} : vector<11x180xf32>, vector<180x352xf32>, vector<11x352xf32> -> vector<11x352xf32>
    %114 = arith.addf %109, %113 : vector<11x352xf32>
    %c0_57 = arith.constant 0 : index
    %c0_58 = arith.constant 0 : index
    %115 = vector.load %arg3[%c0_57, %c0_58] : memref<1x352xf32, #tpu.memory_space<vmem>>, vector<1x352xf32>
    %116 = vector.broadcast %115 : vector<1x352xf32> to vector<11x352xf32>
    %117 = arith.addf %114, %116 : vector<11x352xf32>
    %118 = vector.extract_strided_slice %117 {offsets = [0, 0], sizes = [1, 352], strides = [1, 1]} : vector<11x352xf32> to vector<1x352xf32>
    %119 = vector.extract_strided_slice %117 {offsets = [1, 0], sizes = [1, 352], strides = [1, 1]} : vector<11x352xf32> to vector<1x352xf32>
    %120 = arith.maximumf %118, %119 : vector<1x352xf32>
    %121 = vector.extract_strided_slice %117 {offsets = [2, 0], sizes = [1, 352], strides = [1, 1]} : vector<11x352xf32> to vector<1x352xf32>
    %122 = vector.extract_strided_slice %117 {offsets = [3, 0], sizes = [1, 352], strides = [1, 1]} : vector<11x352xf32> to vector<1x352xf32>
    %123 = arith.maximumf %121, %122 : vector<1x352xf32>
    %124 = vector.extract_strided_slice %117 {offsets = [4, 0], sizes = [1, 352], strides = [1, 1]} : vector<11x352xf32> to vector<1x352xf32>
    %125 = vector.extract_strided_slice %117 {offsets = [5, 0], sizes = [1, 352], strides = [1, 1]} : vector<11x352xf32> to vector<1x352xf32>
    %126 = arith.maximumf %124, %125 : vector<1x352xf32>
    %127 = vector.extract_strided_slice %117 {offsets = [6, 0], sizes = [1, 352], strides = [1, 1]} : vector<11x352xf32> to vector<1x352xf32>
    %128 = vector.extract_strided_slice %117 {offsets = [7, 0], sizes = [1, 352], strides = [1, 1]} : vector<11x352xf32> to vector<1x352xf32>
    %129 = arith.maximumf %127, %128 : vector<1x352xf32>
    %130 = vector.extract_strided_slice %117 {offsets = [8, 0], sizes = [1, 352], strides = [1, 1]} : vector<11x352xf32> to vector<1x352xf32>
    %131 = vector.extract_strided_slice %117 {offsets = [9, 0], sizes = [1, 352], strides = [1, 1]} : vector<11x352xf32> to vector<1x352xf32>
    %132 = arith.maximumf %130, %131 : vector<1x352xf32>
    %133 = tpu.concatenate %120, %123, %126, %129, %132 in 0 : vector<1x352xf32>, vector<1x352xf32>, vector<1x352xf32>, vector<1x352xf32>, vector<1x352xf32> -> vector<5x352xf32>
    %134 = vector.extract_strided_slice %133 {offsets = [0, 0], sizes = [5, 32], strides = [1, 1]} : vector<5x352xf32> to vector<5x32xf32>
    %135 = vector.extract_strided_slice %133 {offsets = [0, 32], sizes = [5, 32], strides = [1, 1]} : vector<5x352xf32> to vector<5x32xf32>
    %136 = arith.maximumf %134, %135 : vector<5x32xf32>
    %137 = vector.extract_strided_slice %133 {offsets = [0, 64], sizes = [5, 32], strides = [1, 1]} : vector<5x352xf32> to vector<5x32xf32>
    %138 = vector.extract_strided_slice %133 {offsets = [0, 96], sizes = [5, 32], strides = [1, 1]} : vector<5x352xf32> to vector<5x32xf32>
    %139 = arith.maximumf %137, %138 : vector<5x32xf32>
    %140 = vector.extract_strided_slice %133 {offsets = [0, 128], sizes = [5, 32], strides = [1, 1]} : vector<5x352xf32> to vector<5x32xf32>
    %141 = vector.extract_strided_slice %133 {offsets = [0, 160], sizes = [5, 32], strides = [1, 1]} : vector<5x352xf32> to vector<5x32xf32>
    %142 = arith.maximumf %140, %141 : vector<5x32xf32>
    %143 = vector.extract_strided_slice %133 {offsets = [0, 192], sizes = [5, 32], strides = [1, 1]} : vector<5x352xf32> to vector<5x32xf32>
    %144 = vector.extract_strided_slice %133 {offsets = [0, 224], sizes = [5, 32], strides = [1, 1]} : vector<5x352xf32> to vector<5x32xf32>
    %145 = arith.maximumf %143, %144 : vector<5x32xf32>
    %146 = vector.extract_strided_slice %133 {offsets = [0, 256], sizes = [5, 32], strides = [1, 1]} : vector<5x352xf32> to vector<5x32xf32>
    %147 = vector.extract_strided_slice %133 {offsets = [0, 288], sizes = [5, 32], strides = [1, 1]} : vector<5x352xf32> to vector<5x32xf32>
    %148 = arith.maximumf %146, %147 : vector<5x32xf32>
    %149 = tpu.concatenate %136, %139, %142, %145, %148 in 1 : vector<5x32xf32>, vector<5x32xf32>, vector<5x32xf32>, vector<5x32xf32>, vector<5x32xf32> -> vector<5x160xf32>
    %150 = vector.shape_cast %86 : vector<5x160xf32> to vector<1x5x160xf32>
    %151 = vector.shape_cast %149 : vector<5x160xf32> to vector<1x5x160xf32>
    %152 = tpu.concatenate %150, %151 in 0 : vector<1x5x160xf32>, vector<1x5x160xf32> -> vector<2x5x160xf32>
    %153 = arith.mulf %152, %152 : vector<2x5x160xf32>
    %cst_59 = arith.constant dense<0.000000e+00> : vector<2x5xf32>
    %154 = vector.multi_reduction <add>, %153, %cst_59 [2] : vector<2x5x160xf32> to vector<2x5xf32>
    %155 = vector.shape_cast %154 : vector<2x5xf32> to vector<2x5x1xf32>
    %cst_60 = arith.constant dense<0.000000e+00> : vector<2x1xf32>
    %156 = vector.multi_reduction <add>, %155, %cst_60 [1] : vector<2x5x1xf32> to vector<2x1xf32>
    %157 = vector.shape_cast %156 : vector<2x1xf32> to vector<2x1x1xf32>
    %cst_61 = arith.constant 1.000000e-24 : f32
    %158 = vector.broadcast %cst_61 : f32 to vector<2x1x1xf32>
    %159 = arith.maximumf %157, %158 : vector<2x1x1xf32>
    %160 = math.rsqrt %159 : vector<2x1x1xf32>
    %161 = vector.broadcast %160 : vector<2x1x1xf32> to vector<2x5x160xf32>
    %162 = arith.mulf %152, %161 : vector<2x5x160xf32>
    %c0_62 = arith.constant 0 : index
    %c0_63 = arith.constant 0 : index
    %c0_64 = arith.constant 0 : index
    %163 = vector.load %arg19[%c0_62, %c0_63, %c0_64] : memref<2x5x160xf32, #tpu.memory_space<vmem>>, vector<2x5x160xf32>
    %164 = arith.addf %163, %162 : vector<2x5x160xf32>
    %c0_65 = arith.constant 0 : index
    %c0_66 = arith.constant 0 : index
    %165 = vector.load %arg6[%c0_65, %c0_66] : memref<5x160xf32, #tpu.memory_space<vmem>>, vector<5x160xf32>
    %166 = vector.shape_cast %165 : vector<5x160xf32> to vector<1x5x160xf32>
    %167 = vector.broadcast %166 : vector<1x5x160xf32> to vector<2x5x160xf32>
    %168 = arith.subf %164, %167 : vector<2x5x160xf32>
    %cst_67 = arith.constant 0.000000e+00 : f32
    %169 = vector.broadcast %cst_67 : f32 to vector<2x5x160xf32>
    %170 = arith.maximumf %168, %169 : vector<2x5x160xf32>
    %cst_68 = arith.constant 0.000000e+00 : f32
    %171 = vector.broadcast %cst_68 : f32 to vector<2x5x160xf32>
    %172 = arith.cmpf oeq, %170, %171 : vector<2x5x160xf32>
    %cst_69 = arith.constant 0.000000e+00 : f32
    %173 = vector.broadcast %cst_69 : f32 to vector<2x5x160xf32>
    %174 = arith.select %172, %164, %173 : vector<2x5x160xi1>, vector<2x5x160xf32>
    %c0_70 = arith.constant 0 : index
    %c0_71 = arith.constant 0 : index
    %175 = vector.load %arg7[%c0_70, %c0_71] : memref<5x160xf32, #tpu.memory_space<vmem>>, vector<5x160xf32>
    %176 = vector.shape_cast %175 : vector<5x160xf32> to vector<1x5x160xf32>
    %177 = vector.broadcast %176 : vector<1x5x160xf32> to vector<2x5x160xf32>
    %178 = arith.mulf %174, %177 : vector<2x5x160xf32>
    %cst_72 = arith.constant 0.000000e+00 : f32
    %179 = vector.broadcast %cst_72 : f32 to vector<2x5x160xf32>
    %180 = arith.maximumf %178, %179 : vector<2x5x160xf32>
    %c0_73 = arith.constant 0 : index
    %c0_74 = arith.constant 0 : index
    %c0_75 = arith.constant 0 : index
    %181 = vector.load %arg19[%c0_73, %c0_74, %c0_75] : memref<2x5x160xf32, #tpu.memory_space<vmem>>, vector<2x5x160xf32>
    tpu.vector_store %arg19[%c0_73, %c0_74, %c0_75], %180 {strides = array<i32>} : memref<2x5x160xf32, #tpu.memory_space<vmem>>, vector<2x5x160xf32>,
    %182 = vector.extract_strided_slice %12 {offsets = [0, 0, 0], sizes = [1, 15, 180], strides = [1, 1, 1]} : vector<2x15x180xf32> to vector<1x15x180xf32>
    %183 = vector.shape_cast %182 : vector<1x15x180xf32> to vector<15x180xf32>
    %c0_76 = arith.constant 0 : index
    %c0_77 = arith.constant 0 : index
    %184 = vector.load %arg10[%c0_76, %c0_77] : memref<180x150xf32, #tpu.memory_space<vmem>>, vector<180x150xf32>
    %cst_78 = arith.constant dense<0.000000e+00> : vector<15x150xf32>
    %185 = tpu.matmul %183, %184, %cst_78 {dimension_numbers = #tpu.dot_dimension_numbers<[1], [0], [0], [1], [0, 0, 1, 1], [], []>} : vector<15x180xf32>, vector<180x150xf32>, vector<15x150xf32> -> vector<15x150xf32>
    %c0_79 = arith.constant 0 : index
    %c0_80 = arith.constant 0 : index
    %186 = vector.load %arg11[%c0_79, %c0_80] : memref<15x150xf32, #tpu.memory_space<vmem>>, vector<15x150xf32>
    %187 = arith.mulf %185, %186 : vector<15x150xf32>
    %cst_81 = arith.constant dense<0.000000e+00> : vector<150xf32>
    %188 = vector.multi_reduction <add>, %187, %cst_81 [0] : vector<15x150xf32> to vector<150xf32>
    %189 = vector.shape_cast %188 : vector<150xf32> to vector<1x150xf32>
    %190 = vector.extract_strided_slice %170 {offsets = [0, 0, 0], sizes = [1, 5, 160], strides = [1, 1, 1]} : vector<2x5x160xf32> to vector<1x5x160xf32>
    %191 = vector.shape_cast %190 : vector<1x5x160xf32> to vector<5x160xf32>
    %c0_82 = arith.constant 0 : index
    %c0_83 = arith.constant 0 : index
    %192 = vector.load %arg13[%c0_82, %c0_83] : memref<160x50xf32, #tpu.memory_space<vmem>>, vector<160x50xf32>
    %cst_84 = arith.constant dense<0.000000e+00> : vector<5x50xf32>
    %193 = tpu.matmul %191, %192, %cst_84 {dimension_numbers = #tpu.dot_dimension_numbers<[1], [0], [0], [1], [0, 0, 1, 1], [], []>} : vector<5x160xf32>, vector<160x50xf32>, vector<5x50xf32> -> vector<5x50xf32>
    %c0_85 = arith.constant 0 : index
    %c0_86 = arith.constant 0 : index
    %194 = vector.load %arg14[%c0_85, %c0_86] : memref<5x50xf32, #tpu.memory_space<vmem>>, vector<5x50xf32>
    %195 = arith.mulf %193, %194 : vector<5x50xf32>
    %cst_87 = arith.constant dense<0.000000e+00> : vector<50xf32>
    %196 = vector.multi_reduction <add>, %195, %cst_87 [0] : vector<5x50xf32> to vector<50xf32>
    %197 = vector.shape_cast %196 : vector<50xf32> to vector<1x50xf32>
    %c0_88 = arith.constant 0 : index
    %c0_89 = arith.constant 0 : index
    %198 = vector.load %arg12[%c0_88, %c0_89] : memref<150x10xf32, #tpu.memory_space<vmem>>, vector<150x10xf32>
    %cst_90 = arith.constant dense<0.000000e+00> : vector<1x10xf32>
    %199 = tpu.matmul %189, %198, %cst_90 {dimension_numbers = #tpu.dot_dimension_numbers<[1], [0], [0], [1], [0, 0, 1, 1], [], []>} : vector<1x150xf32>, vector<150x10xf32>, vector<1x10xf32> -> vector<1x10xf32>
    %c0_91 = arith.constant 0 : index
    %c0_92 = arith.constant 0 : index
    %200 = vector.load %arg15[%c0_91, %c0_92] : memref<50x10xf32, #tpu.memory_space<vmem>>, vector<50x10xf32>
    %cst_93 = arith.constant dense<0.000000e+00> : vector<1x10xf32>
    %201 = tpu.matmul %197, %200, %cst_93 {dimension_numbers = #tpu.dot_dimension_numbers<[1], [0], [0], [1], [0, 0, 1, 1], [], []>} : vector<1x50xf32>, vector<50x10xf32>, vector<1x10xf32> -> vector<1x10xf32>
    %202 = arith.addf %199, %201 : vector<1x10xf32>
    %c0_94 = arith.constant 0 : index
    %c0_95 = arith.constant 0 : index
    %203 = vector.load %arg16[%c0_94, %c0_95] : memref<1x10xf32, #tpu.memory_space<vmem>>, vector<1x10xf32>
    %204 = arith.addf %202, %203 : vector<1x10xf32>
    %205 = vector.extract_strided_slice %12 {offsets = [1, 0, 0], sizes = [1, 15, 180], strides = [1, 1, 1]} : vector<2x15x180xf32> to vector<1x15x180xf32>
    %206 = vector.shape_cast %205 : vector<1x15x180xf32> to vector<15x180xf32>
    %c0_96 = arith.constant 0 : index
    %c0_97 = arith.constant 0 : index
    %207 = vector.load %arg10[%c0_96, %c0_97] : memref<180x150xf32, #tpu.memory_space<vmem>>, vector<180x150xf32>
    %cst_98 = arith.constant dense<0.000000e+00> : vector<15x150xf32>
    %208 = tpu.matmul %206, %207, %cst_98 {dimension_numbers = #tpu.dot_dimension_numbers<[1], [0], [0], [1], [0, 0, 1, 1], [], []>} : vector<15x180xf32>, vector<180x150xf32>, vector<15x150xf32> -> vector<15x150xf32>
    %c0_99 = arith.constant 0 : index
    %c0_100 = arith.constant 0 : index
    %209 = vector.load %arg11[%c0_99, %c0_100] : memref<15x150xf32, #tpu.memory_space<vmem>>, vector<15x150xf32>
    %210 = arith.mulf %208, %209 : vector<15x150xf32>
    %cst_101 = arith.constant dense<0.000000e+00> : vector<150xf32>
    %211 = vector.multi_reduction <add>, %210, %cst_101 [0] : vector<15x150xf32> to vector<150xf32>
    %212 = vector.shape_cast %211 : vector<150xf32> to vector<1x150xf32>
    %213 = vector.extract_strided_slice %170 {offsets = [1, 0, 0], sizes = [1, 5, 160], strides = [1, 1, 1]} : vector<2x5x160xf32> to vector<1x5x160xf32>
    %214 = vector.shape_cast %213 : vector<1x5x160xf32> to vector<5x160xf32>
    %c0_102 = arith.constant 0 : index
    %c0_103 = arith.constant 0 : index
    %215 = vector.load %arg13[%c0_102, %c0_103] : memref<160x50xf32, #tpu.memory_space<vmem>>, vector<160x50xf32>
    %cst_104 = arith.constant dense<0.000000e+00> : vector<5x50xf32>
    %216 = tpu.matmul %214, %215, %cst_104 {dimension_numbers = #tpu.dot_dimension_numbers<[1], [0], [0], [1], [0, 0, 1, 1], [], []>} : vector<5x160xf32>, vector<160x50xf32>, vector<5x50xf32> -> vector<5x50xf32>
    %c0_105 = arith.constant 0 : index
    %c0_106 = arith.constant 0 : index
    %217 = vector.load %arg14[%c0_105, %c0_106] : memref<5x50xf32, #tpu.memory_space<vmem>>, vector<5x50xf32>
    %218 = arith.mulf %216, %217 : vector<5x50xf32>
    %cst_107 = arith.constant dense<0.000000e+00> : vector<50xf32>
    %219 = vector.multi_reduction <add>, %218, %cst_107 [0] : vector<5x50xf32> to vector<50xf32>
    %220 = vector.shape_cast %219 : vector<50xf32> to vector<1x50xf32>
    %c0_108 = arith.constant 0 : index
    %c0_109 = arith.constant 0 : index
    %221 = vector.load %arg12[%c0_108, %c0_109] : memref<150x10xf32, #tpu.memory_space<vmem>>, vector<150x10xf32>
    %cst_110 = arith.constant dense<0.000000e+00> : vector<1x10xf32>
    %222 = tpu.matmul %212, %221, %cst_110 {dimension_numbers = #tpu.dot_dimension_numbers<[1], [0], [0], [1], [0, 0, 1, 1], [], []>} : vector<1x150xf32>, vector<150x10xf32>, vector<1x10xf32> -> vector<1x10xf32>
    %c0_111 = arith.constant 0 : index
    %c0_112 = arith.constant 0 : index
    %223 = vector.load %arg15[%c0_111, %c0_112] : memref<50x10xf32, #tpu.memory_space<vmem>>, vector<50x10xf32>
    %cst_113 = arith.constant dense<0.000000e+00> : vector<1x10xf32>
    %224 = tpu.matmul %220, %223, %cst_113 {dimension_numbers = #tpu.dot_dimension_numbers<[1], [0], [0], [1], [0, 0, 1, 1], [], []>} : vector<1x50xf32>, vector<50x10xf32>, vector<1x10xf32> -> vector<1x10xf32>
    %225 = arith.addf %222, %224 : vector<1x10xf32>
    %c0_114 = arith.constant 0 : index
    %c0_115 = arith.constant 0 : index
    %226 = vector.load %arg16[%c0_114, %c0_115] : memref<1x10xf32, #tpu.memory_space<vmem>>, vector<1x10xf32>
    %227 = arith.addf %225, %226 : vector<1x10xf32>
    %228 = tpu.concatenate %204, %227 in 0 : vector<1x10xf32>, vector<1x10xf32> -> vector<2x10xf32>
    %229 = arith.mulf %228, %228 : vector<2x10xf32>
    %cst_116 = arith.constant dense<0.000000e+00> : vector<2xf32>
    %230 = vector.multi_reduction <add>, %229, %cst_116 [1] : vector<2x10xf32> to vector<2xf32>
    %231 = vector.shape_cast %230 : vector<2xf32> to vector<2x1xf32>
    %cst_117 = arith.constant 1.000000e-24 : f32
    %232 = vector.broadcast %cst_117 : f32 to vector<2x1xf32>
    %233 = arith.maximumf %231, %232 : vector<2x1xf32>
    %234 = math.rsqrt %233 : vector<2x1xf32>
    %235 = vector.broadcast %234 : vector<2x1xf32> to vector<2x10xf32>
    %236 = arith.mulf %228, %235 : vector<2x10xf32>
    %c0_118 = arith.constant 0 : index
    %c0_119 = arith.constant 0 : index
    %237 = vector.load %arg20[%c0_118, %c0_119] : memref<2x10xf32, #tpu.memory_space<vmem>>, vector<2x10xf32>
    %238 = arith.addf %237, %236 : vector<2x10xf32>
    %c0_120 = arith.constant 0 : index
    %c0_121 = arith.constant 0 : index
    %239 = vector.load %arg8[%c0_120, %c0_121] : memref<1x10xf32, #tpu.memory_space<vmem>>, vector<1x10xf32>
    %240 = vector.broadcast %239 : vector<1x10xf32> to vector<2x10xf32>
    %241 = arith.subf %238, %240 : vector<2x10xf32>
    %cst_122 = arith.constant 0.000000e+00 : f32
    %242 = vector.broadcast %cst_122 : f32 to vector<2x10xf32>
    %243 = arith.maximumf %241, %242 : vector<2x10xf32>
    %cst_123 = arith.constant 0.000000e+00 : f32
    %244 = vector.broadcast %cst_123 : f32 to vector<2x10xf32>
    %245 = arith.cmpf oeq, %243, %244 : vector<2x10xf32>
    %cst_124 = arith.constant 0.000000e+00 : f32
    %246 = vector.broadcast %cst_124 : f32 to vector<2x10xf32>
    %247 = arith.select %245, %238, %246 : vector<2x10xi1>, vector<2x10xf32>
    %c0_125 = arith.constant 0 : index
    %c0_126 = arith.constant 0 : index
    %248 = vector.load %arg9[%c0_125, %c0_126] : memref<1x10xf32, #tpu.memory_space<vmem>>, vector<1x10xf32>
    %249 = vector.broadcast %248 : vector<1x10xf32> to vector<2x10xf32>
    %250 = arith.mulf %247, %249 : vector<2x10xf32>
    %cst_127 = arith.constant 0.000000e+00 : f32
    %251 = vector.broadcast %cst_127 : f32 to vector<2x10xf32>
    %252 = arith.maximumf %250, %251 : vector<2x10xf32>
    %c0_128 = arith.constant 0 : index
    %c0_129 = arith.constant 0 : index
    %253 = vector.load %arg20[%c0_128, %c0_129] : memref<2x10xf32, #tpu.memory_space<vmem>>, vector<2x10xf32>
    tpu.vector_store %arg20[%c0_128, %c0_129], %252 {strides = array<i32>} : memref<2x10xf32, #tpu.memory_space<vmem>>, vector<2x10xf32>,
    %c0_130 = arith.constant 0 : index
    %c0_131 = arith.constant 0 : index
    %254 = vector.load %arg17[%c0_130, %c0_131] : memref<2x10xf32, #tpu.memory_space<vmem>>, vector<2x10xf32>
    %255 = arith.addf %254, %243 : vector<2x10xf32>
    %c0_132 = arith.constant 0 : index
    %c0_133 = arith.constant 0 : index
    %256 = vector.load %arg17[%c0_132, %c0_133] : memref<2x10xf32, #tpu.memory_space<vmem>>, vector<2x10xf32>
    tpu.vector_store %arg17[%c0_132, %c0_133], %255 {strides = array<i32>} : memref<2x10xf32, #tpu.memory_space<vmem>>, vector<2x10xf32>,
    return
  }
  func.func @transform_0(%arg0: i32) -> (i32, i32, i32, i32) {
    %c0_i32 = arith.constant 0 : i32
    %c0_i32_0 = arith.constant 0 : i32
    %c0_i32_1 = arith.constant 0 : i32
    %c0_i32_2 = arith.constant 0 : i32
    return %arg0, %c0_i32, %c0_i32_0, %c0_i32_1 : i32, i32, i32, i32
  }
  func.func @transform_1(%arg0: i32) -> (i32, i32, i32) {
    %c0_i32 = arith.constant 0 : i32
    %c0_i32_0 = arith.constant 0 : i32
    %c0_i32_1 = arith.constant 0 : i32
    %c0_i32_2 = arith.constant 0 : i32
    return %c0_i32, %c0_i32_0, %c0_i32_1 : i32, i32, i32
  }
  func.func @transform_2(%arg0: i32) -> (i32, i32) {
    %c0_i32 = arith.constant 0 : i32
    %c0_i32_0 = arith.constant 0 : i32
    %c0_i32_1 = arith.constant 0 : i32
    return %c0_i32, %c0_i32_0 : i32, i32
  }
  func.func @transform_3(%arg0: i32) -> (i32, i32) {
    %c0_i32 = arith.constant 0 : i32
    %c0_i32_0 = arith.constant 0 : i32
    %c0_i32_1 = arith.constant 0 : i32
    return %c0_i32, %c0_i32_0 : i32, i32
  }
  func.func @transform_4(%arg0: i32) -> (i32, i32) {
    %c0_i32 = arith.constant 0 : i32
    %c0_i32_0 = arith.constant 0 : i32
    %c0_i32_1 = arith.constant 0 : i32
    return %c0_i32, %c0_i32_0 : i32, i32
  }
  func.func @transform_5(%arg0: i32) -> (i32, i32) {
    %c0_i32 = arith.constant 0 : i32
    %c0_i32_0 = arith.constant 0 : i32
    %c0_i32_1 = arith.constant 0 : i32
    return %c0_i32, %c0_i32_0 : i32, i32
  }
  func.func @transform_6(%arg0: i32) -> (i32, i32) {
    %c0_i32 = arith.constant 0 : i32
    %c0_i32_0 = arith.constant 0 : i32
    %c0_i32_1 = arith.constant 0 : i32
    return %c0_i32, %c0_i32_0 : i32, i32
  }
  func.func @transform_7(%arg0: i32) -> (i32, i32) {
    %c0_i32 = arith.constant 0 : i32
    %c0_i32_0 = arith.constant 0 : i32
    %c0_i32_1 = arith.constant 0 : i32
    return %c0_i32, %c0_i32_0 : i32, i32
  }
  func.func @transform_8(%arg0: i32) -> (i32, i32) {
    %c0_i32 = arith.constant 0 : i32
    %c0_i32_0 = arith.constant 0 : i32
    %c0_i32_1 = arith.constant 0 : i32
    return %c0_i32, %c0_i32_0 : i32, i32
  }
  func.func @transform_9(%arg0: i32) -> (i32, i32) {
    %c0_i32 = arith.constant 0 : i32
    %c0_i32_0 = arith.constant 0 : i32
    %c0_i32_1 = arith.constant 0 : i32
    return %c0_i32, %c0_i32_0 : i32, i32
  }
  func.func @transform_10(%arg0: i32) -> (i32, i32) {
    %c0_i32 = arith.constant 0 : i32
    %c0_i32_0 = arith.constant 0 : i32
    %c0_i32_1 = arith.constant 0 : i32
    return %c0_i32, %c0_i32_0 : i32, i32
  }
  func.func @transform_11(%arg0: i32) -> (i32, i32) {
    %c0_i32 = arith.constant 0 : i32
    %c0_i32_0 = arith.constant 0 : i32
    %c0_i32_1 = arith.constant 0 : i32
    return %c0_i32, %c0_i32_0 : i32, i32
  }
  func.func @transform_12(%arg0: i32) -> (i32, i32) {
    %c0_i32 = arith.constant 0 : i32
    %c0_i32_0 = arith.constant 0 : i32
    %c0_i32_1 = arith.constant 0 : i32
    return %c0_i32, %c0_i32_0 : i32, i32
  }
  func.func @transform_13(%arg0: i32) -> (i32, i32) {
    %c0_i32 = arith.constant 0 : i32
    %c0_i32_0 = arith.constant 0 : i32
    %c0_i32_1 = arith.constant 0 : i32
    return %c0_i32, %c0_i32_0 : i32, i32
  }
  func.func @transform_14(%arg0: i32) -> (i32, i32) {
    %c0_i32 = arith.constant 0 : i32
    %c0_i32_0 = arith.constant 0 : i32
    %c0_i32_1 = arith.constant 0 : i32
    return %c0_i32, %c0_i32_0 : i32, i32
  }
  func.func @transform_15(%arg0: i32) -> (i32, i32) {
    %c0_i32 = arith.constant 0 : i32
    %c0_i32_0 = arith.constant 0 : i32
    %c0_i32_1 = arith.constant 0 : i32
    return %c0_i32, %c0_i32_0 : i32, i32
  }
  func.func @transform_16(%arg0: i32) -> (i32, i32) {
    %c0_i32 = arith.constant 0 : i32
    %c0_i32_0 = arith.constant 0 : i32
    %c0_i32_1 = arith.constant 0 : i32
    return %c0_i32, %c0_i32_0 : i32, i32
  }
}

</mosaic_0001>

<bundles_post_ra>
// kernel: net_forward.2
= control target key start
LH: loop header
LB: loop body
LE: loop exit
PB: predicated region body
PF: predicated region fallthrough
CT: control target
= control target key end

     0   :  { %8 = vsyncpa [#allocation3], 0  ;;  %s3096_s0 = inlined_call_operand.vmem [shape: f32[3,2,34,68], index: 0, kind: input, shape index: {}]   ;;  %s3097_s1 = inlined_call_operand.hbm [shape: f32[5,68,360], index: 1, kind: input, shape index: {}]   ;;  %s3098_s2 = inlined_call_operand.hbm [shape: f32[1,360], index: 2, kind: input, shape index: {}]   ;;  %s3099_s3 = inlined_call_operand.vmem [shape: f32[3,2,15,180], index: 3, kind: output, shape index: {}]  }
   0x1   :  { %9 = vsyncpa [#allocation5], 0  ;;  %s2641_s12 = smov 0   ;;  %s2643_s13 = smov 0  }
   0x2   :  { %s2645_s14 = smov 0   ;;  %s2647_s15 = smov 0  }
   0x3   :  { %s2649_s16 = smov 0  }
   0x4 LB: > { %s1953_s17 = sadd.s32 4294967295, %s2600_s16   ;;  %s24_s18 = sadd.s32 1, %s2592_s14  ;;  %s2600_s16 = sphi %s2649_s16, %s15_s16   ;;  %s2596_s15 = sphi %s2647_s15, %s3111_s15   ;;  %s2592_s14 = sphi %s2645_s14, %s3110_s14   ;;  %s2588_s13 = sphi %s2643_s13, %s3109_s13   ;;  %s2584_s12 = sphi %s2641_s12, %s3108_s12  }
   0x5   : > { %p25_p0 = scmp.ge.s32.totalorder %s24_s18, 2  ;;  %s27_s19 = sadd.s32 1, %s2596_s15 }
   0x6   : > { %p1955_p1 = scmp.ge.s32.totalorder %s2600_s16, 1  ;;  %p130_p2 = scmp.lt.s32.totalorder %s2600_s16, 7 }
   0x7   : > { %s3113_s18 = smov (%p25_p0, %s24_s18), 0  ;;  %s3115_s19 = smov (!%p25_p0, %s27_s19), %s2596_s15 }
   0x8   : > { %p2674_p3 = pnand %p1955_p1, %p130_p2  ;;  %p29_p4 = scmp.ge.s32.totalorder %s3115_s19, 3 }
   0x9   : > { %p2678_p5 = scmp.eq.s32.totalorder %s1953_s17, 0  ;;  %s2602_s22 = smov [#allocation2]  }
   0xa   : > { %s3103_s20 = scalar_select %p2674_p3, 1, 0 }
   0xb   : > { %s3104_s21 = scalar_select %p2678_p5, 1, 0 }
   0xc   : > { %p2426_p6 = pneg %p2674_p3  ;;  %s3117_s19 = smov (%p29_p4, %s3115_s19), 0 }
   0xd   : > { %s142_s23 = sshll.u32 %s2602_s22, 4  ;;  %s2498_s27 = scalar_lea.hbm %s3097_s1, 17280  ;;  %s143_s23 = int_to_ptr.vmem [resolvable:$true] %s142_s23 }
   0xe   : > { %p2688_p7 = pnand %p2678_p5, %p2426_p6  ;;  %p2499_p8 = scmp.ne.s32.totalorder %s3097_s1, %s2498_s27 }
   0xf   : > { %p2505_p12 = scmp.lt.u32.totalorder %s2498_s27, %s3097_s1 }
  0x10   : > { %p2500_p9 = pneg %p2688_p7 }
  0x12   : > { %p2501_p10 = pnand %p2500_p9, %p2499_p8 }
  0x14   : > { %p2502_p11 = pneg %p2501_p10 }
  0x16   : > { %p2507_p13 = pnand %p2505_p12, %p2502_p11 }
  0x18   : > { %2510 = shalt.err (!%p2507_p13)
}
  0x19   : > { %s2511_s5 = scalar_lea.vmem %s143_s23, 17280  ;;  %p2519_p4 = scmp.lt.s32.totalorder %s143_s23, %s143_s23 }
  0x1a   : > { %p2512_p0 = scmp.ne.s32.totalorder %s143_s23, %s2511_s5  ;;  %p2520_p6 = scmp.lt.s32.totalorder %s2511_s5, %s2511_s5 }
  0x1c   : > { %p2514_p1 = pnand %p2512_p0, %p2500_p9  ;;  %p2521_p5 = por %p2520_p6, %p2519_p4 }
  0x1e   : > { %p2515_p2 = pneg %p2514_p1 }
  0x20   : > { %p2522_p3 = pnand %p2521_p5, %p2515_p2 }
  0x22   : > { %2525 = shalt.err (!%p2522_p3)
}
  0x23   : > { %s2603_s6 = smov 384   ;;  %s2604_s7 = smov 24  }
  0x24   : > { %2429 = dma.hbm_to_vmem [thread:$0]  (!%p2688_p7), %s3097_s1, 17280, %s143_s23, [#allocation3], %s2603_s6, %s2603_s6, %s2604_s7  }
  0x25   : > { %s2605_s10 = smov [#allocation4]   ;;  %s2526_s25 = scalar_lea.hbm %s3098_s2, 48 }
  0x26   : > { %s156_s11 = sshll.u32 %s2605_s10, 4  ;;  %p2527_p3 = scmp.ne.s32.totalorder %s3098_s2, %s2526_s25  ;;  %s157_s11 = int_to_ptr.vmem [resolvable:$true] %s156_s11 }
  0x27   : > { %p2533_p10 = scmp.lt.u32.totalorder %s2526_s25, %s3098_s2 }
  0x28   : > { %p2529_p5 = pnand %p2527_p3, %p2500_p9 }
  0x2a   : > { %p2530_p8 = pneg %p2529_p5 }
  0x2c   : > { %p2535_p11 = pnand %p2533_p10, %p2530_p8 }
  0x2e   : > { %2538 = shalt.err (!%p2535_p11)
}
  0x2f   : > { %s2539_s23 = scalar_lea.vmem %s157_s11, 48  ;;  %s2546_s30 = scalar_lea.vmem %s157_s11, 64 }
  0x30   : > { %p2540_p12 = scmp.ne.s32.totalorder %s157_s11, %s2539_s23  ;;  %p2547_p1 = scmp.lt.s32.totalorder %s157_s11, %s157_s11 }
  0x31   : > { %p2548_p2 = scmp.lt.s32.totalorder %s2546_s30, %s2539_s23 }
  0x32   : > { %p2542_p13 = pnand %p2540_p12, %p2500_p9 }
  0x33   : > { %p2549_p4 = por %p2548_p2, %p2547_p1 }
  0x34   : > { %p2543_p0 = pneg %p2542_p13 }
  0x36   : > { %p2550_p6 = pnand %p2549_p4, %p2543_p0 }
  0x38   : > { %2553 = shalt.err (!%p2550_p6)
}
  0x39   : > { %2432 = dma.hbm_to_vmem [thread:$0]  (!%p2688_p7), %s3098_s2, 48, %s157_s11, [#allocation5]  }
  0x3a   : > { %p3106_p3 = scmp.ne.s32.totalorder %s3103_s20, 0 }
  0x3b   : > { %p3107_p5 = scmp.ne.s32.totalorder (!%p3106_p3), %s3104_s21, 0 }
  0x3c   : > { %181 = sbr.rel (%p3106_p3) target bundleno = 877 (0x36d), region = 32 }
  0x43   : > { %2575 = dma.done.wait (%p3107_p5), [#allocation3], 17280  }
  0x44   : > { %2577 = vsyncadd (%p3107_p5), [#allocation3], 4294950016 }
  0x45   : > { %2579 = dma.done.wait (%p3107_p5), [#allocation5], 48  }
  0x46   : > { %2581 = vsyncadd (%p3107_p5), [#allocation5], 4294967248  ;;  %p217_p7 = scmp.lt.s32.totalorder %s2588_s13, 2  ;;  %p219_p9 = scmp.lt.s32.totalorder %s2584_s12, 1  ;;  %v2606_v0 = vmov 0.0   ;;  %v269_v1 = vld [vmem:[#allocation2 + $0xe0] sm:$0xff] }
  0x47   : > { %390 = vmatprep.mubr.f32.mxu0 %v2606_v0  ;;  %v272_v2 = vld [vmem:[#allocation2 + $0xf8] sm:$0xff]  ;;  %v270_v3 = vld [vmem:[#allocation2 + $0xe8] sm:$0xff]  ;;  %v273_v5 = vld [vmem:[#allocation2 + $0x100] sm:$0xff]  ;;  %vm299_vm0 = vcmask 1046528   ;;  %vm307_vm1 = vcmask 556032   ;;  %vm316_vm2 = vcmask 1043456  }
  0x48   : > { %s3119_s13 = smov (!%p217_p7, %s2588_s13), 2  ;;  %s3121_s12 = smov (!%p219_p9, %s2584_s12), 1  ;;  %v2208_v4 = vpack.c.bf16 %v272_v2, %v269_v1  ;;  %v268_v6 = vld [vmem:[#allocation2 + $0xd8] sm:$0xff]  ;;  %v271_v7 = vld [vmem:[#allocation2 + $0xf0] sm:$0xff]  ;;  %v2224_v8 = vpack.c.bf16 %v273_v5, %v270_v3  ;;  %v278_v11 = vld [vmem:[#allocation2 + $0x128] sm:$0xff]  ;;  %vm719_vm3 = vcmask 1045504  }
  0x49   : > { %s2417_s20 = smul.u32 10, %s3119_s13  ;;  %s1964_s24 = sshll.u32 %s3119_s13, 3  ;;  %v2210_v9 = vpack.c.bf16 %v271_v7, %v268_v6  ;;  %v275_v10 = vld [vmem:[#allocation2 + $0x110] sm:$0xff]  ;;  %v276_v12 = vld [vmem:[#allocation2 + $0x118] sm:$0xff]  ;;  %v274_v15 = vld [vmem:[#allocation2 + $0x108] sm:$0xff]  ;;  %vm959_vm4 = vcmask 1044480  }
  0x4a   : > { %s2416_s6 = smul.u32 5, %s3121_s12  ;;  %s1963_s7 = sshll.u32 %s3121_s12, 2  ;;  %2209 = vmatprep.subr.bf16.mxu0 %v2208_v4  ;;  %v2212_v13 = vpack.c.bf16 %v278_v11, %v275_v10  ;;  %v279_v14 = vld [vmem:[#allocation2 + $0x130] sm:$0xff]  ;;  %v277_v16 = vld [vmem:[#allocation2 + $0x120] sm:$0xff]  ;;  %2225 = vmatprep.subr.bf16.mxu1 %v2224_v8  ;;  %v284_v20 = vld [vmem:[#allocation2 + $0x158] sm:$0xff]  ;;  %vm1579_vm5 = vcmask 1040384  }
  0x4b   : > { %s2749_s8 = sadd.s32 %s1964_s24, %s1963_s7  ;;  %2211 = vmatpush1.bf16.msra.mxu0 %v2210_v9  ;;  %v2228_v17 = vpack.c.bf16 %v279_v14, %v276_v12  ;;  %v2214_v18 = vpack.c.bf16 %v277_v16, %v274_v15  ;;  %v281_v19 = vld [vmem:[#allocation2 + $0x140] sm:$0xff]  ;;  %v282_v21 = vld [vmem:[#allocation2 + $0x148] sm:$0xff]  ;;  %2227 = vmatpush3.bf16.msra.mxu1 %v2224_v8  ;;  %v280_v24 = vld [vmem:[#allocation2 + $0x138] sm:$0xff]  ;;  %vm1583_vm6 = vcmask 1041408   ;;  %vm1587_vm7 = vcmask 1042432   ;;  %s2607_s11 = smov 116  }
  0x4c   : > { %s2751_s21 = sadd.s32 %s2417_s20, %s2416_s6  ;;  %2213 = vmatprep.subr.bf16.mxu0 %v2212_v13  ;;  %v2216_v22 = vpack.c.bf16 %v284_v20, %v281_v19  ;;  %v285_v23 = vld [vmem:[#allocation2 + $0x160] sm:$0xff]  ;;  %v283_v25 = vld [vmem:[#allocation2 + $0x150] sm:$0xff]  ;;  %v290_v28 = vld [vmem:[#allocation2 + $0x188] sm:$0xff]  ;;  %s2608_s17 = smov 80   ;;  %vm1649_vm8 = vcmask 949248   ;;  %vm1760_vm9 = vcmask 97280  }
  0x4d   : > { %s1962_s12 = sshll.u32 %s2751_s21, 3  ;;  %2229 = vmatprep.subr.bf16.mxu1 %v2228_v17  ;;  %v2232_v26 = vpack.c.bf16 %v285_v23, %v282_v21  ;;  %v287_v27 = vld [vmem:[#allocation2 + $0x170] sm:$0xff]  ;;  %v288_v29 = vld [vmem:[#allocation2 + $0x178] sm:$0xff]  ;;  %v2218_v31 = vpack.c.bf16 %v283_v25, %v280_v24  ;;  %v286_v32 = vld [vmem:[#allocation2 + $0x168] sm:$0xff]  ;;  %s2609_s22 = smov 104   ;;  %vm1763_vm10 = vcmask 195584  }
  0x4e   : > { %s2757_s10 = scalar_lea.vmem %s3096_s0, %s1962_s12  ;;  %v291_v30 = vld [vmem:[#allocation2 + $0x190] sm:$0xff]  ;;  %v2220_v33 = vpack.c.bf16 %v290_v28, %v287_v27  ;;  %v289_v34 = vld [vmem:[#allocation2 + $0x180] sm:$0xff]  ;;  %v294_v44 = vld [vmem:[#allocation2 + $0x1a8] sm:$0xf]  ;;  %s2610_s25 = smov 124   ;;  %vm1766_vm11 = vcmask 293888  }
  0x4f   : > { %2215 = vmatpush1.bf16.msra.mxu0 %v2214_v18  ;;  %2231 = vmatpush3.bf16.msra.mxu1 %v2228_v17  ;;  %v2760_v35 = vld [vmem:[%s2757_s10] sm:$0xff]  ;;  %v2763_v36 = vld [vmem:[%s2757_s10 + $0x8] sm:$0xff]  ;;  %v2236_v37 = vpack.c.bf16 %v291_v30, %v288_v29  ;;  %v2222_v40 = vpack.c.bf16 %v289_v34, %v286_v32  ;;  %v2769_v43 = vld [vmem:[%s2757_s10 + $0x10] sm:$0xff]  ;;  %s2611_s26 = smov 92   ;;  %s2612_s27 = smov 112   ;;  %vm1769_vm12 = vcmask 392192  }
  0x50   : > { %2217 = vmatprep.subr.bf16.mxu0 %v2216_v22  ;;  %2233 = vmatprep.subr.bf16.mxu1 %v2232_v26  ;;  %v300_v38 = vrot.slane %v2760_v35, 1  ;;  %v301_v39 = vrot.slane %v2763_v36, 1  ;;  %v293_v42 = vld [vmem:[#allocation2 + $0x1a0] sm:$0xf]  ;;  %v241_v45 = vld [vmem:[#allocation2 + $0x8] sm:$0xff]  ;;  %v1200_v47 = vrot.slane %v2760_v35, 4 }
  0x51   : > { %v244_v46 = vld [vmem:[#allocation2 + $0x20] sm:$0xff]  ;;  %v292_v48 = vld [vmem:[#allocation2 + $0x198] sm:$0xf]  ;;  %v242_v49 = vld [vmem:[#allocation2 + $0x10] sm:$0xff]  ;;  %v303_v51 = vrot.slane %v2769_v43, 1  ;;  %v1201_v54 = vrot.slane %v2763_v36, 4 }
  0x52   : > { %v302_v41 = vsel %vm299_vm0, %v300_v38, %v301_v39  ;;  %v245_v50 = vld [vmem:[#allocation2 + $0x28] sm:$0xff]  ;;  %v240_v52 = vld [vmem:[#allocation2] sm:$0xff]  ;;  %v243_v53 = vld [vmem:[#allocation2 + $0x18] sm:$0xff]  ;;  %v1203_v55 = vrot.slane %v2769_v43, 4  ;;  %v2240_v56 = vpack.c.bf16 %v244_v46, %v241_v45  ;;  %s2613_s28 = smov 100   ;;  %s2614_s29 = smov 68  }
  0x53   : > { %2219 = vmatpush1.bf16.msra.mxu0 %v2218_v31  ;;  %2235 = vmatpush3.bf16.msra.mxu1 %v2232_v26  ;;  %v247_v57 = vld [vmem:[#allocation2 + $0x38] sm:$0xff]  ;;  %v250_v58 = vld [vmem:[#allocation2 + $0x50] sm:$0xff]  ;;  %v2256_v60 = vpack.c.bf16 %v245_v50, %v242_v49  ;;  %v248_v61 = vld [vmem:[#allocation2 + $0x40] sm:$0xff]  ;;  %v2782_v63 = vsel %vm316_vm2, %v1200_v47, %v1201_v54  ;;  %v2242_v3 = vpack.c.bf16 %v243_v53, %v240_v52  ;;  %s2615_s23 = smov 44   ;;  %s2616_s30 = smov 56   ;;  %vm1772_vm13 = vcmask 490496  }
  0x54   : > { %2221 = vmatprep.subr.bf16.mxu0 %v2220_v33  ;;  %2237 = vmatprep.subr.bf16.mxu1 %v2236_v37  ;;  %v2778_v59 = vld [vmem:[%s2757_s10 + $0x18] sm:$0xff]  ;;  %v2785_v1 = vsel %vm316_vm2, %v1201_v54, %v1203_v55  ;;  %v304_v4 = vsel %vm299_vm0, %v301_v39, %v303_v51  ;;  %v2244_v5 = vpack.c.bf16 %v250_v58, %v247_v57  ;;  %v246_v6 = vld [vmem:[#allocation2 + $0x30] sm:$0xff]  ;;  %v249_v7 = vld [vmem:[#allocation2 + $0x48] sm:$0xff]  ;;  %s2617_s4 = smov 32   ;;  %s2618_s5 = smov 8   ;;  %vm1775_vm14 = vcmask 588800  }
  0x55   : > { %2106 = vmatprep.mubr.msk.f32.mxu1 %vm307_vm1, %v302_v41  ;;  %v251_v62 = vld [vmem:[#allocation2 + $0x58] sm:$0xff]  ;;  %v1205_v2 = vrot.slane %v2778_v59, 4  ;;  %v253_v10 = vld [vmem:[#allocation2 + $0x68] sm:$0xff]  ;;  %v256_v11 = vld [vmem:[#allocation2 + $0x80] sm:$0xff]  ;;  %v305_v12 = vrot.slane %v2778_v59, 1  ;;  %v2246_v15 = vpack.c.bf16 %v249_v7, %v246_v6  ;;  %s2619_s20 = smov 88  }
  0x56   : > { %v2260_v9 = vpack.c.bf16 %v251_v62, %v248_v61  ;;  %v254_v13 = vld [vmem:[#allocation2 + $0x70] sm:$0xff]  ;;  %v257_v14 = vld [vmem:[#allocation2 + $0x88] sm:$0xff]  ;;  %v2248_v16 = vpack.c.bf16 %v256_v11, %v253_v10  ;;  %v252_v17 = vld [vmem:[#allocation2 + $0x60] sm:$0xff]  ;;  %v721_v61 = vrot.slane %v2763_v36, 2  ;;  %s2620_s24 = smov 20   ;;  %vm1790_vm15 = vcmask 31744  }
  0x57   : > { %2223 = vmatpush1.bf16.msra.mxu0 %v2222_v40  ;;  %2239 = vmatpush3.bf16.msra.mxu1 %v2236_v37  ;;  %v2793_v8 = vsel %vm316_vm2, %v1203_v55, %v1205_v2  ;;  %v255_v18 = vld [vmem:[#allocation2 + $0x78] sm:$0xff]  ;;  %v2264_v19 = vpack.c.bf16 %v257_v14, %v254_v13  ;;  %v306_v20 = vsel %vm299_vm0, %v303_v51, %v305_v12  ;;  %v262_v22 = vld [vmem:[#allocation2 + $0xb0] sm:$0xff]  ;;  %v260_v23 = vld [vmem:[#allocation2 + $0xa0] sm:$0xff]  ;;  %s1965_s6 = sshll.u32 %s2749_s8, 3 }
  0x58   : > { %1966 = vmatprep.subr.msk.mxu0 %vm316_vm2, %v293_v42  ;;  %2104 = vmatprep.subr.msk.mxu1 %vm316_vm2, %v294_v44  ;;  %v259_v21 = vld [vmem:[#allocation2 + $0x98] sm:$0xff]  ;;  %v2250_v25 = vpack.c.bf16 %v255_v18, %v252_v17  ;;  %v258_v27 = vld [vmem:[#allocation2 + $0x90] sm:$0xff]  ;;  %v261_v28 = vld [vmem:[#allocation2 + $0xa8] sm:$0xff]  ;;  %s234_s12 = scalar_lea.vmem %s3099_s3, %s1965_s6 }
  0x59   : > { %v263_v24 = vld [vmem:[#allocation2 + $0xb8] sm:$0xff]  ;;  %v2252_v26 = vpack.c.bf16 %v262_v22, %v259_v21  ;;  %v2254_v30 = vpack.c.bf16 %v261_v28, %v258_v27  ;;  %v265_v31 = vld [vmem:[#allocation2 + $0xc8] sm:$0xf]  ;;  %v696_v33 = vld [vmem:[#allocation2 + $0x1d0] sm:$0xff] }
  0x5a   : > { %v2268_v29 = vpack.c.bf16 %v263_v24, %v260_v23  ;;  %v693_v32 = vld [vmem:[#allocation2 + $0x1b8] sm:$0xff]  ;;  %v266_v34 = vld [vmem:[#allocation2 + $0xd0] sm:$0xf]  ;;  %v694_v37 = vld [vmem:[#allocation2 + $0x1c0] sm:$0xff] }
  0x5b   : > { %1967 = vmatpush1.msk.msra.mxu0 %vm316_vm2, %v292_v48  ;;  %2105 = vmatpush3.msk.msra.mxu1 %vm316_vm2, %v294_v44  ;;  %v697_v38 = vld [vmem:[#allocation2 + $0x1d8] sm:$0xff]  ;;  %v692_v39 = vld [vmem:[#allocation2 + $0x1b0] sm:$0xff]  ;;  %v695_v40 = vld [vmem:[#allocation2 + $0x1c8] sm:$0xff]  ;;  %v2272_v42 = vpack.c.bf16 %v696_v33, %v693_v32 }
  0x5c   : > { %2241 = vmatprep.subr.bf16.mxu0 %v2240_v56  ;;  %2257 = vmatprep.subr.bf16.mxu1 %v2256_v60  ;;  %v699_v44 = vld [vmem:[#allocation2 + $0x1e8] sm:$0xff]  ;;  %v702_v45 = vld [vmem:[#allocation2 + $0x200] sm:$0xff]  ;;  %v2288_v46 = vpack.c.bf16 %v697_v38, %v694_v37  ;;  %v700_v47 = vld [vmem:[#allocation2 + $0x1f0] sm:$0xff]  ;;  %v2274_v49 = vpack.c.bf16 %v695_v40, %v692_v39 }
  0x5d   : > { %1968 = vmatmul.mubr.msk.f32.vlgmr.msra.gmra.mrb[0].mxu0 %vm307_vm1, %v302_v41  ;;  %2107 = vmatmul.mubr.msk.f32.vlgmr.msra.gmra.mrb[0].mxu1 %vm307_vm1, %v304_v4  ;;  %v264_v41 = vld [vmem:[#allocation2 + $0xc0] sm:$0xf]  ;;  %v703_v48 = vld [vmem:[#allocation2 + $0x208] sm:$0xff]  ;;  %v2276_v50 = vpack.c.bf16 %v702_v45, %v699_v44  ;;  %v701_v52 = vld [vmem:[#allocation2 + $0x1f8] sm:$0xff] }
  0x5e   : > { %2243 = vmatpush1.bf16.msra.mxu0 %v2242_v3  ;;  %2259 = vmatpush3.bf16.msra.mxu1 %v2256_v60  ;;  %v698_v51 = vld [vmem:[#allocation2 + $0x1e0] sm:$0xff]  ;;  %v2292_v53 = vpack.c.bf16 %v703_v48, %v700_v47  ;;  %v705_v54 = vld [vmem:[#allocation2 + $0x218] sm:$0xff]  ;;  %v708_v55 = vld [vmem:[#allocation2 + $0x230] sm:$0xff]  ;;  %v720_v60 = vrot.slane %v2760_v35, 2  ;;  %v725_v47 = vrot.slane %v2778_v59, 2 }
  0x5f   : > { %2245 = vmatprep.subr.bf16.mxu0 %v2244_v5  ;;  %2261 = vmatprep.subr.bf16.mxu1 %v2260_v9  ;;  %v706_v56 = vld [vmem:[#allocation2 + $0x220] sm:$0xff]  ;;  %v709_v57 = vld [vmem:[#allocation2 + $0x238] sm:$0xff]  ;;  %v2278_v58 = vpack.c.bf16 %v701_v52, %v698_v51  ;;  %v2280_v62 = vpack.c.bf16 %v708_v55, %v705_v54  ;;  %v704_v3 = vld [vmem:[#allocation2 + $0x210] sm:$0xff]  ;;  %v960_v51 = vrot.slane %v2760_v35, 3  ;;  %v961_v52 = vrot.slane %v2763_v36, 3 }
  0x60   : > { %396 = vmatprep.mubr.f32.mxu0 %v2606_v0  ;;  %2109 = vmatprep.mubr.msk.f32.mxu1 %vm307_vm1, %v306_v20  ;;  %v2296_v5 = vpack.c.bf16 %v709_v57, %v706_v56  ;;  %v711_v6 = vld [vmem:[#allocation2 + $0x248] sm:$0xff]  ;;  %v714_v7 = vld [vmem:[#allocation2 + $0x260] sm:$0xff]  ;;  %v722_v13 = vsel %vm719_vm3, %v720_v60, %v721_v61  ;;  %v713_v17 = vld [vmem:[#allocation2 + $0x258] sm:$0xff] }
  0x61   : > { %1969 = vmatmul.mubr.msk.f32.gmra.mrb[2].mxu0 %vm307_vm1, %v304_v4  ;;  %2110 = vmatmul.mubr.msk.f32.gmra.mrb[2].mxu1 %vm307_vm1, %v305_v12  ;;  %v707_v4 = vld [vmem:[#allocation2 + $0x228] sm:$0xff]  ;;  %v2827_v11 = vld [vmem:[%s2757_s10 + $0x20] sm:$0x3]  ;;  %v717_v21 = vld [vmem:[#allocation2 + $0x278] sm:$0xf] }
  0x62   : > { %2247 = vmatpush1.bf16.msra.mxu0 %v2246_v15  ;;  %402 = vmatprep.mubr.f32.mxu0 %v2606_v0  ;;  %v715_v10 = vld [vmem:[#allocation2 + $0x268] sm:$0xff]  ;;  %v1207_v14 = vrot.slane %v2827_v11, 4  ;;  %v2284_v15 = vpack.c.bf16 %v714_v7, %v711_v6  ;;  %v932_v22 = vld [vmem:[#allocation2 + $0x290] sm:$0xff]  ;;  %v933_v24 = vld [vmem:[#allocation2 + $0x298] sm:$0xff] }
  0x63   : > { %2263 = vmatpush3.bf16.msra.mxu1 %v2260_v9  ;;  %2249 = vmatprep.subr.bf16.mxu0 %v2248_v16  ;;  %v712_v9 = vld [vmem:[#allocation2 + $0x250] sm:$0xff]  ;;  %v710_v16 = vld [vmem:[#allocation2 + $0x240] sm:$0xff]  ;;  %v935_v23 = vld [vmem:[#allocation2 + $0x2a8] sm:$0xff] }
  0x64   : > { %2265 = vmatprep.subr.bf16.mxu1 %v2264_v19  ;;  %2130 = vmatprep.mubr.msk.f32.mxu1 %vm307_vm1, %v2760_v35  ;;  %v2300_v18 = vpack.c.bf16 %v715_v10, %v712_v9  ;;  %v931_v27 = vld [vmem:[#allocation2 + $0x288] sm:$0xff]  ;;  %v934_v28 = vld [vmem:[#allocation2 + $0x2a0] sm:$0xff]  ;;  %v941_v32 = vld [vmem:[#allocation2 + $0x2d8] sm:$0xff] }
  0x65   : > { %1970 = vmatmul.mubr.msk.f32.gmra.mrb[4].mxu0 %vm307_vm1, %v306_v20  ;;  %v2286_v20 = vpack.c.bf16 %v713_v17, %v710_v16  ;;  %v942_v37 = vld [vmem:[#allocation2 + $0x2e0] sm:$0xff]  ;;  %v2306_v38 = vpack.c.bf16 %v934_v28, %v931_v27  ;;  %v944_v45 = vld [vmem:[#allocation2 + $0x2f0] sm:$0xff]  ;;  %v945_v48 = vld [vmem:[#allocation2 + $0x2f8] sm:$0xff]  ;;  %v963_v16 = vrot.slane %v2769_v43, 3 }
  0x66   : > { %2251 = vmatpush1.bf16.msra.mxu0 %v2250_v25  ;;  %408 = vmatprep.mubr.f32.mxu0 %v2606_v0  ;;  %v936_v25 = vld [vmem:[#allocation2 + $0x2b0] sm:$0xff]  ;;  %v943_v54 = vld [vmem:[#allocation2 + $0x2e8] sm:$0xff]  ;;  %v946_v55 = vld [vmem:[#allocation2 + $0x300] sm:$0xff] }
  0x67   : > { %2267 = vmatpush3.bf16.msra.mxu1 %v2264_v19  ;;  %2253 = vmatprep.subr.bf16.mxu0 %v2252_v26  ;;  %v2839_v19 = vsel %vm316_vm2, %v1205_v2, %v1207_v14  ;;  %v718_v2 = vld [vmem:[#allocation2 + $0x280] sm:$0xf]  ;;  %v723_v26 = vrot.slane %v2769_v43, 2  ;;  %v2320_v33 = vpack.c.bf16 %v936_v25, %v933_v24  ;;  %v953_v60 = vld [vmem:[#allocation2 + $0x338] sm:$0xff]  ;;  %v956_v9 = vld [vmem:[#allocation2 + $0x350] sm:$0xf]  ;;  %v964_v27 = vsel %vm959_vm4, %v961_v52, %v963_v16 }
  0x68   : > { %2269 = vmatprep.subr.bf16.mxu1 %v2268_v29  ;;  %v1174_v10 = vld [vmem:[#allocation2 + $0x368] sm:$0xff]  ;;  %v1175_v14 = vld [vmem:[#allocation2 + $0x370] sm:$0xff]  ;;  %v1173_v17 = vld [vmem:[#allocation2 + $0x360] sm:$0xff] }
  0x69   : > { %1971 = vmatmul.mubr.msk.f32.gmra.mrb[6].mxu0 %vm307_vm1, %v305_v12  ;;  %v2282_v12 = vpack.c.bf16 %v707_v4, %v704_v3  ;;  %v724_v39 = vsel %vm719_vm3, %v721_v61, %v723_v26  ;;  %v726_v57 = vsel %vm719_vm3, %v723_v26, %v725_v47  ;;  %v951_v61 = vld [vmem:[#allocation2 + $0x328] sm:$0xff]  ;;  %v949_v4 = vld [vmem:[#allocation2 + $0x318] sm:$0xff]  ;;  %v1181_v24 = vld [vmem:[#allocation2 + $0x3a0] sm:$0xff] }
  0x6a   : > { %2255 = vmatpush1.bf16.msra.mxu0 %v2254_v30  ;;  %581 = vmatprep.mubr.f32.mxu0 %v2606_v0  ;;  %v2304_v30 = vpack.c.bf16 %v935_v23, %v932_v22  ;;  %v1180_v22 = vld [vmem:[#allocation2 + $0x398] sm:$0xff]  ;;  %v1183_v23 = vld [vmem:[#allocation2 + $0x3b0] sm:$0xff] }
  0x6b   : > { %2271 = vmatpush3.bf16.msra.mxu1 %v2268_v29  ;;  %1977 = vmatprep.subr.msk.mxu0 %vm316_vm2, %v265_v31  ;;  %v716_v29 = vld [vmem:[#allocation2 + $0x270] sm:$0xf]  ;;  %v938_v31 = vld [vmem:[#allocation2 + $0x2c0] sm:$0xff]  ;;  %v1184_v25 = vld [vmem:[#allocation2 + $0x3b8] sm:$0xff] }
  0x6c   : > { %2128 = vmatprep.subr.msk.mxu1 %vm316_vm2, %v266_v34  ;;  %v2308_v40 = vpack.c.bf16 %v941_v32, %v938_v31  ;;  %v1179_v28 = vld [vmem:[#allocation2 + $0x390] sm:$0xff]  ;;  %v1186_v31 = vld [vmem:[#allocation2 + $0x3c8] sm:$0xff]  ;;  %v1189_v32 = vld [vmem:[#allocation2 + $0x3e0] sm:$0xff] }
  0x6e   : > { %1978 = vmatpush1.msk.msra.mxu0 %vm316_vm2, %v264_v41  ;;  %v937_v41 = vld [vmem:[#allocation2 + $0x2b8] sm:$0xff] }
  0x6f   : > { %2129 = vmatpush3.msk.msra.mxu1 %vm316_vm2, %v266_v34  ;;  %2273 = vmatprep.subr.bf16.mxu0 %v2272_v42  ;;  %v939_v34 = vld [vmem:[#allocation2 + $0x2c8] sm:$0xff]  ;;  %v940_v42 = vld [vmem:[#allocation2 + $0x2d0] sm:$0xff] }
  0x70   : > { %2289 = vmatprep.subr.bf16.mxu1 %v2288_v46  ;;  %1979 = vmatmul.mubr.msk.f32.vlgmr.msra.gmra.mrb[0].mxu0 %vm307_vm1, %v2760_v35  ;;  %v2324_v44 = vpack.c.bf16 %v942_v37, %v939_v34  ;;  %v954_v35 = vld [vmem:[#allocation2 + $0x340] sm:$0xff]  ;;  %v1187_v34 = vld [vmem:[#allocation2 + $0x3d0] sm:$0xff]  ;;  %v1190_v37 = vld [vmem:[#allocation2 + $0x3e8] sm:$0xff] }
  0x71   : > { %2131 = vmatmul.mubr.msk.f32.vlgmr.msra.gmra.mrb[0].mxu1 %vm307_vm1, %v2763_v36  ;;  %2275 = vmatpush1.bf16.msra.mxu0 %v2274_v49  ;;  %v948_v49 = vld [vmem:[#allocation2 + $0x310] sm:$0xff]  ;;  %v2332_v6 = vpack.c.bf16 %v954_v35, %v951_v61  ;;  %v1412_v61 = vld [vmem:[#allocation4] sm:$0x7] }
  0x72   : > { %2291 = vmatpush3.bf16.msra.mxu1 %v2288_v46  ;;  %2277 = vmatprep.subr.bf16.mxu0 %v2276_v50  ;;  %v947_v46 = vld [vmem:[#allocation2 + $0x308] sm:$0xff]  ;;  %v2310_v50 = vpack.c.bf16 %v940_v42, %v937_v41  ;;  %v2328_v56 = vpack.c.bf16 %v948_v49, %v945_v48  ;;  %v1185_v41 = vld [vmem:[#allocation2 + $0x3c0] sm:$0xff]  ;;  %v1188_v42 = vld [vmem:[#allocation2 + $0x3d8] sm:$0xff] }
  0x73   : > { %2293 = vmatprep.subr.bf16.mxu1 %v2292_v53  ;;  %587 = vmatprep.mubr.f32.mxu0 %v2606_v0  ;;  %v2346_v49 = vpack.c.bf16 %v1188_v42, %v1185_v41 }
  0x74   : > { %1980 = vmatmul.mubr.msk.f32.gmra.mrb[2].mxu0 %vm307_vm1, %v2763_v36  ;;  %2133 = vmatprep.mubr.msk.f32.mxu1 %vm307_vm1, %v2769_v43  ;;  %v2314_v36 = vpack.c.bf16 %v946_v55, %v943_v54  ;;  %v1198_v55 = vld [vmem:[#allocation2 + $0x428] sm:$0xf] }
  0x75   : > { %2279 = vmatpush1.bf16.msra.mxu0 %v2278_v58  ;;  %593 = vmatprep.mubr.f32.mxu0 %v2606_v0  ;;  %v950_v58 = vld [vmem:[#allocation2 + $0x320] sm:$0xff] }
  0x76   : > { %2295 = vmatpush3.bf16.msra.mxu1 %v2292_v53  ;;  %2281 = vmatprep.subr.bf16.mxu0 %v2280_v62  ;;  %v2312_v53 = vpack.c.bf16 %v947_v46, %v944_v45  ;;  %v962_v62 = vsel %vm959_vm4, %v960_v51, %v961_v52  ;;  %v2316_v3 = vpack.c.bf16 %v953_v60, %v950_v58  ;;  %v1192_v45 = vld [vmem:[#allocation2 + $0x3f8] sm:$0xff]  ;;  %v1195_v46 = vld [vmem:[#allocation2 + $0x410] sm:$0xff]  ;;  %v1194_v52 = vld [vmem:[#allocation2 + $0x408] sm:$0xff] }
  0x77   : > { %2297 = vmatprep.subr.bf16.mxu1 %v2296_v5  ;;  %2134 = vmatmul.mubr.msk.f32.gmra.mrb[2].mxu1 %vm307_vm1, %v2778_v59  ;;  %v1191_v51 = vld [vmem:[#allocation2 + $0x3f0] sm:$0xff] }
  0x78   : > { %1981 = vmatmul.mubr.msk.f32.gmra.mrb[4].mxu0 %vm307_vm1, %v2769_v43  ;;  %2154 = vmatprep.mubr.msk.f32.mxu1 %vm307_vm1, %v722_v13  ;;  %v2340_v43 = vpack.c.bf16 %v1183_v23, %v1180_v22  ;;  %v2350_v54 = vpack.c.bf16 %v1194_v52, %v1191_v51 }
  0x79   : > { %2283 = vmatpush1.bf16.msra.mxu0 %v2282_v12  ;;  %599 = vmatprep.mubr.f32.mxu0 %v2606_v0  ;;  %v1177_v12 = vld [vmem:[#allocation2 + $0x380] sm:$0xff] }
  0x7a   : > { %2299 = vmatpush3.bf16.msra.mxu1 %v2296_v5  ;;  %2285 = vmatprep.subr.bf16.mxu0 %v2284_v15  ;;  %v952_v5 = vld [vmem:[#allocation2 + $0x330] sm:$0xff]  ;;  %v1178_v15 = vld [vmem:[#allocation2 + $0x388] sm:$0xff] }
  0x7b   : > { %2301 = vmatprep.subr.bf16.mxu1 %v2300_v18  ;;  %v2318_v7 = vpack.c.bf16 %v952_v5, %v949_v4 }
  0x7c   : > { %1982 = vmatmul.mubr.msk.f32.gmra.mrb[6].mxu0 %vm307_vm1, %v2778_v59 }
  0x7d   : > { %2287 = vmatpush1.bf16.msra.mxu0 %v2286_v20  ;;  %808 = vmatprep.mubr.f32.mxu0 %v2606_v0  ;;  %v955_v20 = vld [vmem:[#allocation2 + $0x348] sm:$0xf] }
  0x7e   : > { %2303 = vmatpush3.bf16.msra.mxu1 %v2300_v18  ;;  %1988 = vmatprep.subr.msk.mxu0 %vm316_vm2, %v717_v21  ;;  %v1176_v18 = vld [vmem:[#allocation2 + $0x378] sm:$0xff]  ;;  %v2336_v21 = vpack.c.bf16 %v1177_v12, %v1174_v10 }
  0x7f   : > { %2152 = vmatprep.subr.msk.mxu1 %vm316_vm2, %v718_v2  ;;  %v2338_v26 = vpack.c.bf16 %v1176_v18, %v1173_v17 }
  0x81   : > { %1989 = vmatpush1.msk.msra.mxu0 %vm316_vm2, %v716_v29  ;;  %v1182_v29 = vld [vmem:[#allocation2 + $0x3a8] sm:$0xff] }
  0x82   : > { %2153 = vmatpush3.msk.msra.mxu1 %vm316_vm2, %v718_v2  ;;  %2305 = vmatprep.subr.bf16.mxu0 %v2304_v30  ;;  %v2352_v2 = vpack.c.bf16 %v1178_v15, %v1175_v14  ;;  %v2356_v30 = vpack.c.bf16 %v1184_v25, %v1181_v24 }
  0x83   : > { %2321 = vmatprep.subr.bf16.mxu1 %v2320_v33  ;;  %1990 = vmatmul.mubr.msk.f32.vlgmr.msra.gmra.mrb[0].mxu0 %vm307_vm1, %v722_v13  ;;  %v957_v13 = vld [vmem:[#allocation2 + $0x358] sm:$0xf] }
  0x84   : > { %2155 = vmatmul.mubr.msk.f32.vlgmr.msra.gmra.mrb[0].mxu1 %vm307_vm1, %v724_v39  ;;  %2307 = vmatpush1.bf16.msra.mxu0 %v2306_v38  ;;  %v967_v38 = vrot.slane %v2827_v11, 3  ;;  %v1193_v11 = vld [vmem:[#allocation2 + $0x400] sm:$0xff] }
  0x85   : > { %2323 = vmatpush3.bf16.msra.mxu1 %v2320_v33  ;;  %2309 = vmatprep.subr.bf16.mxu0 %v2308_v40  ;;  %v965_v33 = vrot.slane %v2778_v59, 3  ;;  %v2344_v40 = vpack.c.bf16 %v1189_v32, %v1186_v31  ;;  %v2360_v59 = vpack.c.bf16 %v1190_v37, %v1187_v34 }
  0x86   : > { %2325 = vmatprep.subr.bf16.mxu1 %v2324_v44  ;;  %814 = vmatprep.mubr.f32.mxu0 %v2606_v0 }
  0x87   : > { %1991 = vmatmul.mubr.msk.f32.gmra.mrb[2].mxu0 %vm307_vm1, %v724_v39  ;;  %2157 = vmatprep.mubr.msk.f32.mxu1 %vm307_vm1, %v726_v57  ;;  %v2342_v39 = vpack.c.bf16 %v1182_v29, %v1179_v28  ;;  %v968_v48 = vsel %vm959_vm4, %v965_v33, %v967_v38 }
  0x88   : > { %2311 = vmatpush1.bf16.msra.mxu0 %v2310_v50  ;;  %820 = vmatprep.mubr.f32.mxu0 %v2606_v0  ;;  %v2348_v50 = vpack.c.bf16 %v1195_v46, %v1192_v45 }
  0x89   : > { %2327 = vmatpush3.bf16.msra.mxu1 %v2324_v44  ;;  %2313 = vmatprep.subr.bf16.mxu0 %v2312_v53  ;;  %v966_v44 = vsel %vm959_vm4, %v963_v16, %v965_v33 }
  0x8a   : > { %2329 = vmatprep.subr.bf16.mxu1 %v2328_v56  ;;  %2158 = vmatmul.mubr.msk.f32.gmra.mrb[2].mxu1 %vm307_vm1, %v725_v47 }
  0x8b   : > { %1992 = vmatmul.mubr.msk.f32.gmra.mrb[4].mxu0 %vm307_vm1, %v726_v57  ;;  %2178 = vmatprep.mubr.msk.f32.mxu1 %vm307_vm1, %v962_v62  ;;  %v1197_v57 = vld [vmem:[#allocation2 + $0x420] sm:$0xf] }
  0x8c   : > { %2315 = vmatpush1.bf16.msra.mxu0 %v2314_v36  ;;  %826 = vmatprep.mubr.f32.mxu0 %v2606_v0 }
  0x8d   : > { %2331 = vmatpush3.bf16.msra.mxu1 %v2328_v56  ;;  %2317 = vmatprep.subr.bf16.mxu0 %v2316_v3  ;;  %v1199_v56 = vld [vmem:[#allocation2 + $0x430] sm:$0xf] }
  0x8e   : > { %2333 = vmatprep.subr.bf16.mxu1 %v2332_v6 }
  0x8f   : > { %1993 = vmatmul.mubr.msk.f32.gmra.mrb[6].mxu0 %vm307_vm1, %v725_v47  ;;  %v1196_v47 = vld [vmem:[#allocation2 + $0x418] sm:$0xff] }
  0x90   : > { %2319 = vmatpush1.bf16.msra.mxu0 %v2318_v7  ;;  %1050 = vmatprep.mubr.f32.mxu0 %v2606_v0  ;;  %v2364_v53 = vpack.c.bf16 %v1196_v47, %v1193_v11 }
  0x91   : > { %2335 = vmatpush3.bf16.msra.mxu1 %v2332_v6  ;;  %1999 = vmatprep.subr.msk.mxu0 %vm316_vm2, %v956_v9 }
  0x92   : > { %2176 = vmatprep.subr.msk.mxu1 %vm316_vm2, %v957_v13 }
  0x94   : > { %2000 = vmatpush1.msk.msra.mxu0 %vm316_vm2, %v955_v20 }
  0x95   : > { %2177 = vmatpush3.msk.msra.mxu1 %vm316_vm2, %v957_v13  ;;  %2337 = vmatprep.subr.bf16.mxu0 %v2336_v21 }
  0x96   : > { %2353 = vmatprep.subr.bf16.mxu1 %v2352_v2  ;;  %2001 = vmatmul.mubr.msk.f32.vlgmr.msra.gmra.mrb[0].mxu0 %vm307_vm1, %v962_v62 }
  0x97   : > { %2179 = vmatmul.mubr.msk.f32.vlgmr.msra.gmra.mrb[0].mxu1 %vm307_vm1, %v964_v27  ;;  %2339 = vmatpush1.bf16.msra.mxu0 %v2338_v26 }
  0x98   : > { %2355 = vmatpush3.bf16.msra.mxu1 %v2352_v2  ;;  %2341 = vmatprep.subr.bf16.mxu0 %v2340_v43 }
  0x99   : > { %2357 = vmatprep.subr.bf16.mxu1 %v2356_v30  ;;  %1056 = vmatprep.mubr.f32.mxu0 %v2606_v0 }
  0x9a   : > { %2002 = vmatmul.mubr.msk.f32.gmra.mrb[2].mxu0 %vm307_vm1, %v964_v27  ;;  %2181 = vmatprep.mubr.msk.f32.mxu1 %vm307_vm1, %v966_v44 }
  0x9b   : > { %2343 = vmatpush1.bf16.msra.mxu0 %v2342_v39  ;;  %1062 = vmatprep.mubr.f32.mxu0 %v2606_v0 }
  0x9c   : > { %2359 = vmatpush3.bf16.msra.mxu1 %v2356_v30  ;;  %2345 = vmatprep.subr.bf16.mxu0 %v2344_v40 }
  0x9d   : > { %2361 = vmatprep.subr.bf16.mxu1 %v2360_v59  ;;  %2182 = vmatmul.mubr.msk.f32.gmra.mrb[2].mxu1 %vm307_vm1, %v968_v48 }
  0x9e   : > { %2003 = vmatmul.mubr.msk.f32.gmra.mrb[4].mxu0 %vm307_vm1, %v966_v44  ;;  %2202 = vmatprep.mubr.msk.f32.mxu1 %vm307_vm1, %v2782_v63 }
  0x9f   : > { %2347 = vmatpush1.bf16.msra.mxu0 %v2346_v49  ;;  %1068 = vmatprep.mubr.f32.mxu0 %v2606_v0 }
  0xa0   : > { %2363 = vmatpush3.bf16.msra.mxu1 %v2360_v59  ;;  %2349 = vmatprep.subr.bf16.mxu0 %v2348_v50 }
  0xa1   : > { %2365 = vmatprep.subr.bf16.mxu1 %v2364_v53 }
  0xa2   : > { %2004 = vmatmul.mubr.msk.f32.gmra.mrb[6].mxu0 %vm307_vm1, %v968_v48 }
  0xa3   : > { %2351 = vmatpush1.bf16.msra.mxu0 %v2350_v54  ;;  %1290 = vmatprep.mubr.f32.mxu0 %v2606_v0 }
  0xa4   : > { %2367 = vmatpush3.bf16.msra.mxu1 %v2364_v53  ;;  %2010 = vmatprep.subr.msk.mxu0 %vm316_vm2, %v1198_v55 }
  0xa5   : > { %2200 = vmatprep.subr.msk.mxu1 %vm316_vm2, %v1199_v56 }
  0xa7   : > { %2011 = vmatpush1.msk.msra.mxu0 %vm316_vm2, %v1197_v57 }
  0xa8   : > { %2201 = vmatpush3.msk.msra.mxu1 %vm316_vm2, %v1199_v56  ;;  %2012 = vmatmul.mubr.msk.f32.vlgmr.msra.gmra.mrb[0].mxu0 %vm307_vm1, %v2782_v63  ;;  %v1414_v63 = vlaneseq }
  0xa9   : > { %2203 = vmatmul.mubr.msk.f32.vlgmr.msra.gmra.mrb[0].mxu1 %vm307_vm1, %v2785_v1  ;;  %1296 = vmatprep.mubr.f32.mxu0 %v2606_v0 }
  0xaa   : > { %2205 = vmatprep.mubr.msk.f32.mxu1 %vm307_vm1, %v2793_v8  ;;  %v1415_v58 = vshrl.u32 %v1414_v63, 7 }
  0xac   : > { %2013 = vmatmul.mubr.msk.f32.gmra.mrb[2].mxu0 %vm307_vm1, %v2785_v1  ;;  %v1416_v60 = vsub.s32 0, %v1415_v58  ;;  %v1424_v35 = vsub.s32 2, %v1415_v58  ;;  %v1420_v36 = vsub.s32 1, %v1415_v58 }
  0xad   : > { %2206 = vmatmul.mubr.msk.f32.gmra.mrb[2].mxu1 %vm307_vm1, %v2839_v19  ;;  %1302 = vmatprep.mubr.f32.mxu0 %v2606_v0 }
  0xae   : > { %v1417_v1 = vrot.slane %v1412_v61, %v1416_v60  ;;  %v1425_v62 = vrot.slane %v1412_v61, %v1424_v35  ;;  %v2917_v3 = vrot.slane %v1412_v61, %v1420_v36 }
  0xb0   : > { %2014 = vmatmul.mubr.msk.f32.gmra.mrb[4].mxu0 %vm307_vm1, %v2793_v8 }
  0xb1   : > { %1308 = vmatprep.mubr.f32.mxu0 %v2606_v0 }
  0xb4   : > { %2015 = vmatmul.mubr.msk.f32.gmra.mrb[6].mxu0 %vm307_vm1, %v2839_v19 }
 0x17b   : > { %v1292_v4 = vpop.f32.mrb[0].mxu0 }
 0x17c   : > { %v1429_v5 = vadd.f32 %v1417_v1, %v1292_v4  ;;  %v2204_v6 = vpop.f32.mrb[0].mxu1  ;;  %v1294_v7 = vpop.f32.mrb[1].mxu0 }
 0x17d   : > { %v1434_v8 = vadd.f32 %v2204_v6, %v1425_v62  ;;  %v1430_v0 = vadd.f32 %v2917_v3, %v1294_v7  ;;  %v1381_v9 = vpop.f32.mrb[1].mxu1 }
 0x17e   : > { %v1444_v10 = vrot.slane %v1429_v5, 1  ;;  %v1431_v19 = vadd.f32 %v1425_v62, %v1381_v9 }
 0x17f   : > { %v1458_v12 = vrot.slane %v1434_v8, 1  ;;  %v1445_v13 = vrot.slane %v1430_v0, 1  ;;  %v1298_v14 = vpop.f32.mrb[2].mxu0 }
 0x180   : > { %v2920_v15 = vmax.f32 %v1429_v5, %v1444_v10  ;;  %v1446_v16 = vrot.slane %v1431_v19, 1  ;;  %v2207_v17 = vpop.f32.mrb[2].mxu1  ;;  %v1300_v18 = vpop.f32.mrb[3].mxu0  ;;  %v1432_v22 = vadd.f32 %v1417_v1, %v1298_v14 }
 0x181   : > { %v2922_v20 = vmax.f32 %v1434_v8, %v1458_v12  ;;  %v1451_v21 = vmax.f32 %v1430_v0, %v1445_v13  ;;  %v1440_v23 = vadd.f32 %v2207_v17, %v1425_v62  ;;  %v1391_v2 = vpop.f32.mrb[3].mxu1  ;;  %v1433_v27 = vadd.f32 %v2917_v3, %v1300_v18 }
 0x182   : > { %v1492_v24 = vrot.slane %v2920_v15, 1  ;;  %v1498_v25 = vrot.slane %v2920_v15, 2  ;;  %v2926_v26 = vmax.f32 %v1431_v19, %v1446_v16  ;;  %v1504_v43 = vrot.slane %v2920_v15, 3 }
 0x183   : > { %v1515_v28 = vrot.slane %v2922_v20, 4  ;;  %v1493_v29 = vrot.slane %v1451_v21, 1  ;;  %v1304_v30 = vpop.f32.mrb[4].mxu0  ;;  %v1521_v32 = vrot.slane %v2922_v20, 5  ;;  %v1499_v33 = vrot.slane %v1451_v21, 2 }
 0x184   : > { %v1580_v31 = vsel %vm1579_vm5, %v2920_v15, %v1492_v24  ;;  %v1494_v34 = vrot.slane %v2926_v26, 1  ;;  %v1306_v37 = vpop.f32.mrb[5].mxu0  ;;  %v1505_v39 = vrot.slane %v1451_v21, 3  ;;  %v1500_v40 = vrot.slane %v2926_v26, 2 }
 0x185   : > { %v2936_v38 = vsel %vm1583_vm6, %v1580_v31, %v1498_v25  ;;  %v1456_v41 = vrot.slane %v1432_v22, 1  ;;  %v1581_v42 = vsel %vm1579_vm5, %v1451_v21, %v1493_v29  ;;  %v1482_v44 = vrot.slane %v1440_v23, 1 }
 0x186   : > { %v1582_v59 = vsel %vm1579_vm5, %v2926_v26, %v1494_v34  ;;  %v1457_v45 = vrot.slane %v1433_v27, 1  ;;  %v1506_v46 = vrot.slane %v2926_v26, 3  ;;  %v1437_v47 = vadd.f32 %v1425_v62, %v1391_v2 }
 0x187   : > { %v2943_v11 = vmax.f32 %v1432_v22, %v1456_v41  ;;  %v1435_v48 = vadd.f32 %v1417_v1, %v1304_v30  ;;  %v1310_v49 = vpop.f32.mrb[6].mxu0  ;;  %v2945_v50 = vmax.f32 %v1440_v23, %v1482_v44  ;;  %v1436_v52 = vadd.f32 %v2917_v3, %v1306_v37 }
 0x188   : > { %v1463_v51 = vmax.f32 %v1433_v27, %v1457_v45  ;;  %v1438_v53 = vadd.f32 %v1417_v1, %v1310_v49  ;;  %v1312_v54 = vpop.f32.mrb[7].mxu0  ;;  %v1585_v55 = vsel %vm1583_vm6, %v1581_v42, %v1499_v33  ;;  %v1586_v56 = vsel %vm1583_vm6, %v1582_v59, %v1500_v40 }
 0x189   : > { %v1470_v57 = vrot.slane %v1437_v47, 1  ;;  %v1468_v63 = vrot.slane %v1435_v48, 1  ;;  %v1513_v58 = vrot.slane %v2943_v11, 4  ;;  %v1519_v60 = vrot.slane %v2943_v11, 5 }
 0x18a   : > { %v1563_v61 = vrot.slane %v2945_v50, 4  ;;  %v1514_v35 = vrot.slane %v1463_v51, 4  ;;  %v1469_v4 = vrot.slane %v1436_v52, 1  ;;  %v1480_v5 = vrot.slane %v1438_v53, 1 }
 0x18b   : > { %v2953_v36 = vmax.f32 %v1437_v47, %v1470_v57  ;;  %v1474_v62 = vmax.f32 %v1435_v48, %v1468_v63  ;;  %v1569_v1 = vrot.slane %v2945_v50, 5  ;;  %v1520_v6 = vrot.slane %v1463_v51, 5 }
 0x18c   : > { %v1439_v7 = vadd.f32 %v2917_v3, %v1312_v54  ;;  %v1589_v8 = vsel %vm1587_vm7, %v1585_v55, %v1505_v39  ;;  %v1526_v10 = vrot.slane %v1463_v51, 6  ;;  %v1532_v19 = vrot.slane %v1463_v51, 7 }
 0x18d   : > { %v1542_v0 = vrot.slane %v2953_v36, 1  ;;  %v1540_v9 = vrot.slane %v1474_v62, 1  ;;  %v1548_v12 = vrot.slane %v2953_v36, 2  ;;  %v1546_v13 = vrot.slane %v1474_v62, 2 }
 0x18e   : > { %v1475_v14 = vmax.f32 %v1436_v52, %v1469_v4  ;;  %v1486_v16 = vmax.f32 %v1438_v53, %v1480_v5  ;;  %v1554_v17 = vrot.slane %v2953_v36, 3  ;;  %v1481_v21 = vrot.slane %v1439_v7, 1 }
 0x18f   : > { %v1603_v18 = vsel %vm1579_vm5, %v1474_v62, %v1540_v9  ;;  %v1592_v22 = vsel %vm316_vm2, %v1589_v8, %v1514_v35  ;;  %v1552_v3 = vrot.slane %v1474_v62, 3  ;;  %v1605_v25 = vsel %vm1579_vm5, %v2953_v36, %v1542_v0 }
 0x190   : > { %v1541_v23 = vrot.slane %v1475_v14, 1  ;;  %v1547_v2 = vrot.slane %v1475_v14, 2  ;;  %v1561_v24 = vrot.slane %v1486_v16, 4  ;;  %v1567_v27 = vrot.slane %v1486_v16, 5 }
 0x191   : > { %v1487_v29 = vmax.f32 %v1439_v7, %v1481_v21  ;;  %v1595_v30 = vsel %vm959_vm4, %v1592_v22, %v1520_v6  ;;  %v1553_v31 = vrot.slane %v1475_v14, 3  ;;  %v1606_v37 = vsel %vm1583_vm6, %v1603_v18, %v1546_v13 }
 0x192   : > { %v1604_v33 = vsel %vm1579_vm5, %v1475_v14, %v1541_v23  ;;  %v1598_v34 = vsel %vm719_vm3, %v1595_v30, %v1526_v10  ;;  %v1609_v42 = vsel %vm1587_vm7, %v1606_v37, %v1552_v3  ;;  %v1573_v59 = vrot.slane %v1486_v16, 6 }
 0x193   : > { %v1562_v39 = vrot.slane %v1487_v29, 4  ;;  %v1568_v40 = vrot.slane %v1487_v29, 5  ;;  %v2970_v41 = vsel %vm299_vm0, %v1598_v34, %v1532_v19  ;;  %v1612_v44 = vsel %vm316_vm2, %v1609_v42, %v1561_v24 }
 0x194   : > { %1633 = vrot.lane.b32.xlu1 %v2970_v41, %s2607_s11  ;;  %v1607_v45 = vsel %vm1583_vm6, %v1604_v33, %v1547_v2  ;;  %v1525_v47 = vrot.slane %v2943_v11, 6  ;;  %v1615_v48 = vsel %vm959_vm4, %v1612_v44, %v1567_v27  ;;  %v1574_v49 = vrot.slane %v1487_v29, 6 }
 0x195   : > { %v1610_v51 = vsel %vm1587_vm7, %v1607_v45, %v1553_v31  ;;  %v1588_v52 = vsel %vm1587_vm7, %v2936_v38, %v1504_v43  ;;  %v2985_v53 = vsel %vm719_vm3, %v1615_v48, %v1573_v59  ;;  %v1531_v55 = vrot.slane %v2943_v11, 7 }
 0x196   : > { %v1613_v54 = vsel %vm316_vm2, %v1610_v51, %v1562_v39  ;;  %v1591_v57 = vsel %vm316_vm2, %v1588_v52, %v1513_v58  ;;  %1625 = vrot.lane.b32.xlu0 %v2985_v53, %s2607_s11  ;;  %v1527_v15 = vrot.slane %v2922_v20, 6  ;;  %v1590_v43 = vsel %vm1587_vm7, %v1586_v56, %v1506_v46 }
 0x197   : > { %v1616_v63 = vsel %vm959_vm4, %v1613_v54, %v1568_v40  ;;  %v1594_v35 = vsel %vm959_vm4, %v1591_v57, %v1519_v60  ;;  %v1593_v58 = vsel %vm316_vm2, %v1590_v43, %v1515_v28  ;;  %v1608_v36 = vsel %vm1583_vm6, %v1605_v25, %v1548_v12 }
 0x198   : > { %v2999_v38 = vsel %vm719_vm3, %v1616_v63, %v1574_v49  ;;  %v1597_v11 = vsel %vm719_vm3, %v1594_v35, %v1525_v47  ;;  %v1533_v26 = vrot.slane %v2922_v20, 7  ;;  %v1596_v46 = vsel %vm959_vm4, %v1593_v58, %v1521_v32 }
 0x199   : > { %1635 = vrot.lane.b32.xlu1 %v2999_v38, %s2607_s11  ;;  %v1600_v60 = vsel %vm299_vm0, %v1597_v11, %v1531_v55  ;;  %v1611_v56 = vsel %vm1587_vm7, %v1608_v36, %v1554_v17  ;;  %v1599_v62 = vsel %vm719_vm3, %v1596_v46, %v1527_v15  ;;  %v1575_v4 = vrot.slane %v2945_v50, 6 }
 0x19a   : > { %v1614_v28 = vsel %vm316_vm2, %v1611_v56, %v1563_v61  ;;  %1623 = vrot.lane.b32.xlu0 %v1600_v60, %s2607_s11  ;;  %v1602_v5 = vsel %vm299_vm0, %v1599_v62, %v1533_v26  ;;  %vm1778_vm2 = vcmask 687104   ;;  %vm1784_vm5 = vcmask 883712  }
 0x19b   : > { %v1617_v20 = vsel %vm959_vm4, %v1614_v28, %v1569_v1  ;;  %vm1781_vm4 = vcmask 785408   ;;  %vm1796_vm6 = vcmask 228352   ;;  %vm1799_vm7 = vcmask 326656  }
 0x19c   : > { %v1620_v32 = vsel %vm719_vm3, %v1617_v20, %v1575_v4  ;;  %vm1793_vm3 = vcmask 130048  }
 0x19d   : > { %1645 = vrot.lane.b32.xlu1 %v1602_v5, %s2607_s11 }
 0x19e   : > { %1647 = vrot.lane.b32.xlu0 %v1620_v32, %s2607_s11 }
 0x206   : > { %v1634_v6 = vpop.permute.xlu1 %1633 }
 0x207   : > { %v1640_v1 = vmax.f32 %v2970_v41, %v1634_v6  ;;  %v1639_v10 = vmax.f32 %v1600_v60, %v1634_v6 }
 0x208   : > { %v1626_v7 = vpop.permute.xlu0 %1625 }
 0x209   : > { %v1630_v16 = vmax.f32 %v2985_v53, %v1626_v7 }
 0x20b   : > { %v1636_v8 = vpop.permute.xlu1 %1635 }
 0x20c   : > { %v1624_v0 = vpop.permute.xlu0 %1623  ;;  %v1641_v17 = vmax.f32 %v2985_v53, %v1636_v8  ;;  %v1642_v18 = vmax.f32 %v2999_v38, %v1636_v8 }
 0x20d   : > { %v3027_v9 = vmax.f32 %v1600_v60, %v1624_v0 }
 0x20f   : > { %v1646_v61 = vpop.permute.xlu1 %1645  ;;  %1662 = vrot.lane.b32.xlu0 %v3027_v9, %s2607_s11  ;;  %1680 = vrot.lane.b32.xlu1 %v3027_v9, %s2608_s17 }
 0x210   : > { %v1658_v50 = vmax.f32 %v1602_v5, %v1646_v61  ;;  %v1650_v19 = vsel %vm1649_vm8, %v1634_v6, %v1646_v61  ;;  %v1648_v12 = vpop.permute.xlu0 %1647 }
 0x211   : > { %v1654_v13 = vmax.f32 %v2970_v41, %v1650_v19  ;;  %v1659_v14 = vmax.f32 %v1620_v32, %v1648_v12  ;;  %v1651_v21 = vsel %vm1649_vm8, %v1636_v8, %v1648_v12  ;;  %vm1812_vm8 = vcmask 423936  }
 0x212   : > { %v1655_v22 = vmax.f32 %v2999_v38, %v1651_v21 }
 0x213   : > { %1668 = vrot.lane.b32.xlu0 %v3027_v9, %s2609_s22  ;;  %1736 = vrot.lane.b32.xlu1 %v1658_v50, %s2610_s25 }
 0x217   : > { %1674 = vrot.lane.b32.xlu0 %v3027_v9, %s2611_s26  ;;  %1742 = vrot.lane.b32.xlu1 %v1658_v50, %s2612_s27 }
 0x21b   : > { %1748 = vrot.lane.b32.xlu0 %v1658_v50, %s2613_s28  ;;  %1692 = vrot.lane.b32.xlu1 %v1640_v1, %s2614_s29 }
 0x21f   : > { %1690 = vrot.lane.b32.xlu0 %v1639_v10, %s2614_s29  ;;  %1708 = vrot.lane.b32.xlu1 %v1640_v1, %s2615_s23 }
 0x223   : > { %1702 = vrot.lane.b32.xlu0 %v1640_v1, %s2616_s30  ;;  %1714 = vrot.lane.b32.xlu1 %v1640_v1, %s2617_s4 }
 0x227   : > { %1738 = vrot.lane.b32.xlu1 %v1659_v14, %s2610_s25  ;;  %1728 = vrot.lane.b32.xlu0 %v1654_v13, %s2618_s5 }
 0x22b   : > { %1756 = vrot.lane.b32.xlu1 %v1659_v14, %s2619_s20  ;;  %1744 = vrot.lane.b32.xlu0 %v1659_v14, %s2612_s27 }
 0x22f   : > { %1670 = vrot.lane.b32.xlu1 %v1630_v16, %s2609_s22  ;;  %1750 = vrot.lane.b32.xlu0 %v1659_v14, %s2613_s28 }
 0x233   : > { %1676 = vrot.lane.b32.xlu1 %v1630_v16, %s2611_s26  ;;  %1664 = vrot.lane.b32.xlu0 %v1630_v16, %s2607_s11 }
 0x237   : > { %1682 = vrot.lane.b32.xlu1 %v1630_v16, %s2608_s17  ;;  %1694 = vrot.lane.b32.xlu0 %v1641_v17, %s2614_s29 }
 0x23b   : > { %1696 = vrot.lane.b32.xlu1 %v1642_v18, %s2614_s29  ;;  %1704 = vrot.lane.b32.xlu0 %v1642_v18, %s2616_s30 }
 0x23f   : > { %1710 = vrot.lane.b32.xlu1 %v1642_v18, %s2615_s23  ;;  %1722 = vrot.lane.b32.xlu0 %v1642_v18, %s2620_s24 }
 0x243   : > { %1716 = vrot.lane.b32.xlu1 %v1642_v18, %s2617_s4  ;;  %1730 = vrot.lane.b32.xlu0 %v1655_v22, %s2618_s5 }
 0x247   : > { %1754 = vrot.lane.b32.xlu1 %v1658_v50, %s2619_s20  ;;  %1720 = vrot.lane.b32.xlu0 %v1640_v1, %s2620_s24 }
 0x281   : > { %v1663_v3 = vpop.permute.xlu0 %1662  ;;  %v1681_v23 = vpop.permute.xlu1 %1680 }
 0x282   : > { %v1761_v54 = vsel %vm1760_vm9, %v3027_v9, %v1663_v3 }
 0x285   : > { %v1669_v2 = vpop.permute.xlu0 %1668  ;;  %v1737_v24 = vpop.permute.xlu1 %1736 }
 0x286   : > { %v1764_v55 = vsel %vm1763_vm10, %v1761_v54, %v1669_v2 }
 0x289   : > { %v1675_v25 = vpop.permute.xlu0 %1674  ;;  %v1743_v27 = vpop.permute.xlu1 %1742 }
 0x28a   : > { %v1767_v35 = vsel %vm1766_vm11, %v1764_v55, %v1675_v25 }
 0x28b   : > { %v1770_v58 = vsel %vm1769_vm12, %v1767_v35, %v1681_v23 }
 0x28d   : > { %v3049_v29 = vpop.permute.xlu0 %1748  ;;  %v1693_v30 = vpop.permute.xlu1 %1692 }
 0x291   : > { %v1691_v31 = vpop.permute.xlu0 %1690  ;;  %v1709_v33 = vpop.permute.xlu1 %1708 }
 0x292   : > { %v1698_v38 = vsel %vm307_vm1, %v1691_v31, %v1693_v30 }
 0x293   : > { %v1773_v26 = vsel %vm1772_vm13, %v1770_v58, %v1698_v38 }
 0x295   : > { %v1703_v34 = vpop.permute.xlu0 %1702  ;;  %v1715_v37 = vpop.permute.xlu1 %1714 }
 0x296   : > { %v1776_v56 = vsel %vm1775_vm14, %v1773_v26, %v1703_v34 }
 0x297   : > { %v1779_v20 = vsel %vm1778_vm2, %v1776_v56, %v1709_v33 }
 0x298   : > { %v1782_v50 = vsel %vm1781_vm4, %v1779_v20, %v1715_v37 }
 0x299   : > { %v3051_v39 = vpop.permute.xlu0 %1728  ;;  %v1739_v40 = vpop.permute.xlu1 %1738 }
 0x29a   : > { %v1791_v62 = vsel %vm1790_vm15, %v3051_v39, %v1737_v24 }
 0x29b   : > { %v1794_v32 = vsel %vm1793_vm3, %v1791_v62, %v1743_v27 }
 0x29c   : > { %v1797_v10 = vsel %vm1796_vm6, %v1794_v32, %v3049_v29 }
 0x29d   : > { %v1745_v41 = vpop.permute.xlu0 %1744  ;;  %v1757_v42 = vpop.permute.xlu1 %1756 }
 0x2a1   : > { %v1751_v59 = vpop.permute.xlu0 %1750  ;;  %v1671_v44 = vpop.permute.xlu1 %1670 }
 0x2a5   : > { %v1665_v45 = vpop.permute.xlu0 %1664  ;;  %v1677_v47 = vpop.permute.xlu1 %1676 }
 0x2a6   : > { %v1762_v48 = vsel %vm1760_vm9, %v1630_v16, %v1665_v45  ;;  %vm1806_vm9 = vcmask 424960  }
 0x2a7   : > { %v1765_v49 = vsel %vm1763_vm10, %v1762_v48, %v1671_v44 }
 0x2a8   : > { %v1768_v53 = vsel %vm1766_vm11, %v1765_v49, %v1677_v47 }
 0x2a9   : > { %v1695_v51 = vpop.permute.xlu0 %1694  ;;  %v1683_v52 = vpop.permute.xlu1 %1682 }
 0x2aa   : > { %v1771_v15 = vsel %vm1769_vm12, %v1768_v53, %v1683_v52 }
 0x2ad   : > { %v1705_v57 = vpop.permute.xlu0 %1704  ;;  %v1697_v63 = vpop.permute.xlu1 %1696 }
 0x2ae   : > { %v1699_v43 = vsel %vm307_vm1, %v1695_v51, %v1697_v63  ;;  %vm1787_vm1 = vcmask 982016  }
 0x2af   : > { %v1774_v11 = vsel %vm1772_vm13, %v1771_v15, %v1699_v43 }
 0x2b0   : > { %v1777_v46 = vsel %vm1775_vm14, %v1774_v11, %v1705_v57 }
 0x2b1   : > { %v1723_v36 = vpop.permute.xlu0 %1722  ;;  %v1711_v60 = vpop.permute.xlu1 %1710 }
 0x2b2   : > { %v1780_v4 = vsel %vm1778_vm2, %v1777_v46, %v1711_v60 }
 0x2b5   : > { %v1731_v28 = vpop.permute.xlu0 %1730  ;;  %v1717_v5 = vpop.permute.xlu1 %1716 }
 0x2b6   : > { %v1792_v6 = vsel %vm1790_vm15, %v1731_v28, %v1739_v40  ;;  %v1783_v7 = vsel %vm1781_vm4, %v1780_v4, %v1717_v5 }
 0x2b7   : > { %v1795_v8 = vsel %vm1793_vm3, %v1792_v6, %v1745_v41  ;;  %v1786_v0 = vsel %vm1784_vm5, %v1783_v7, %v1723_v36 }
 0x2b8   : > { %v1798_v9 = vsel %vm1796_vm6, %v1795_v8, %v1751_v59  ;;  %v1789_v61 = vsel %vm1787_vm1, %v1786_v0, %v1731_v28 }
 0x2b9   : > { %v1721_v1 = vpop.permute.xlu0 %1720  ;;  %v1755_v19 = vpop.permute.xlu1 %1754  ;;  %v1801_v12 = vsel %vm1799_vm7, %v1798_v9, %v1757_v42  ;;  %v1804_v13 = vmul.f32 %v1789_v61, %v1789_v61 }
 0x2ba   : > { %v1785_v14 = vsel %vm1784_vm5, %v1782_v50, %v1721_v1  ;;  %v1800_v16 = vsel %vm1799_vm7, %v1797_v10, %v1755_v19  ;;  %v1805_v17 = vmul.f32 %v1801_v12, %v1801_v12 }
 0x2bb   : > { %v1788_v18 = vsel %vm1787_vm1, %v1785_v14, %v3051_v39  ;;  %v1803_v21 = vmul.f32 %v1800_v16, %v1800_v16  ;;  %v1811_v22 = vsel %vm299_vm0, %v1804_v13, 0.0 }
 0x2bc   : > { %v1813_v3 = vsel %vm1812_vm8, %v1805_v17, 0.0  ;;  %v1802_v23 = vmul.f32 %v1788_v18, %v1788_v18 }
 0x2bd   : > { %v1814_v2 = vadd.f32 %v1813_v3, %v1811_v22  ;;  %v1807_v24 = vsel %vm1806_vm9, %v1803_v21, 0.0 }
 0x2be   : > { %v1808_v25 = vadd.f32 %v1807_v24, %v1802_v23 }
 0x2bf   : > { %1815 = vadd.xlane.f32.xlu0 %v1814_v2 }
 0x2c0   : > { %1809 = vadd.xlane.f32.xlu1 %v1808_v25 }
 0x34c   : > { %v1816_v27 = vpop.xlane.xlu0 %1815 }
 0x34d   : > { %v1817_v29 = vsel %vm299_vm0, %v1816_v27, 0.0  ;;  %v1810_v30 = vpop.xlane.xlu1 %1809 }
 0x34e   : > { %v1818_v31 = vadd.f32 %v1817_v29, %v1810_v30 }
 0x350   : > { %v1819_v33 = vrot.slane %v1818_v31, 4 }
 0x352   : > { %v1820_v34 = vadd.f32 %v1819_v33, %v1818_v31 }
 0x354   : > { %v1821_v37 = vrot.slane %v1820_v34, 2 }
 0x356   : > { %v1822_v39 = vadd.f32 %v1821_v37, %v1820_v34 }
 0x358   : > { %v1823_v40 = vrot.slane %v1822_v39, 1 }
 0x35a   : > { %v1824_v41 = vadd.f32 %v1823_v40, %v1822_v39 }
 0x35c   : > { %v1825_v42 = vmax.f32 %v1824_v41, 1e-24 }
 0x35e   : > { %2496 = vrsqrt.f32 %v1825_v42 }
 0x368   : > { %v2497_v59 = vpop.eup %2496 }
 0x369   : > { %v1827_v44 = vmul.f32 %v2497_v59, %v1788_v18  ;;  %v1828_v45 = vmul.f32 %v2497_v59, %v1800_v16  ;;  %v1829_v47 = vmul.f32 %v2497_v59, %v1789_v61  ;;  %v1830_v48 = vmul.f32 %v2497_v59, %v1801_v12 }
 0x36b   : > { %1831 = vst [vmem:[%s234_s12] sm:$0xff] %v1827_v44  ;;  %1832 = vst.msk [vmem:[%s234_s12 + $0x8] sm:$0xff] %vm1806_vm9, %v1828_v45 }
 0x36c   : > { %1833 = vst [vmem:[%s234_s12 + $0x10] sm:$0x7f] %v1829_v47  ;;  %1834 = vst.msk [vmem:[%s234_s12 + $0x18] sm:$0x7f] %vm1812_vm8, %v1830_v48 }
 0x36d PF: > { %s15_s16 = sadd.s32 1, %s2600_s16   ;;  %s3108_s12 = smov %s2592_s14 }
 0x36e   : > { %p12_p8 = scmp.ge.s32.totalorder %s15_s16, 8   ;;  %s3109_s13 = smov %s2596_s15 }
 0x36f   : > { %s3110_s14 = smov %s3113_s18  ;;  %s3111_s15 = smov %s3117_s19 }
 0x370   :  { %14 = sbr.rel (!%p12_p8) target bundleno = 4 (0x4), region = 75 }
 0x377   :  { %1864 = vsyncpa [#allocation3], 1 }
 0x378   :  { %1866 = vsyncpa [#allocation3 + $0x1], 1 }
 0x379   :  { %1867 = vsyncpa [#allocation5], 1 }

// kernel: net_forward.3
= control target key start
LH: loop header
LB: loop body
LE: loop exit
PB: predicated region body
PF: predicated region fallthrough
CT: control target
= control target key end

     0   :  { %s8385_s0 = inlined_call_operand.vmem [shape: f32[3,2,15,180], index: 0, kind: input, shape index: {}]   ;;  %s8386_s1 = inlined_call_operand.vmem [shape: f32[5,180,352], index: 1, kind: input, shape index: {}]   ;;  %s8387_s2 = inlined_call_operand.vmem [shape: f32[1,352], index: 2, kind: input, shape index: {}]   ;;  %s8388_s3 = inlined_call_operand.vmem [shape: f32[15,180], index: 3, kind: input, shape index: {}]   ;;  %s8389_s4 = inlined_call_operand.vmem [shape: f32[15,180], index: 4, kind: input, shape index: {}]   ;;  %s8390_s5 = inlined_call_operand.vmem [shape: f32[5,160], index: 5, kind: input, shape index: {}]   ;;  %s8391_s6 = inlined_call_operand.vmem [shape: f32[5,160], index: 6, kind: input, shape index: {}]   ;;  %s8392_s7 = inlined_call_operand.vmem [shape: f32[1,10], index: 7, kind: input, shape index: {}]   ;;  %s8393_s8 = inlined_call_operand.vmem [shape: f32[1,10], index: 8, kind: input, shape index: {}]   ;;  %s8394_s9 = inlined_call_operand.vmem [shape: f32[180,150], index: 9, kind: input, shape index: {}]   ;;  %s8395_s10 = inlined_call_operand.vmem [shape: f32[15,150], index: 10, kind: input, shape index: {}]   ;;  %s8396_s11 = inlined_call_operand.vmem [shape: f32[150,10], index: 11, kind: input, shape index: {}]   ;;  %s8397_s12 = inlined_call_operand.vmem [shape: f32[160,50], index: 12, kind: input, shape index: {}]   ;;  %s8398_s13 = inlined_call_operand.vmem [shape: f32[5,50], index: 13, kind: input, shape index: {}]   ;;  %s8399_s14 = inlined_call_operand.vmem [shape: f32[50,10], index: 14, kind: input, shape index: {}]   ;;  %s8400_s15 = inlined_call_operand.vmem [shape: f32[1,10], index: 15, kind: input, shape index: {}]   ;;  %s8401_s16 = inlined_call_operand.hbm [shape: f32[2,10], index: 16, kind: output, shape index: {}]  }
   0x1   :  { %8530 = sst [smem:[#allocation130_spill]] %s8385_s0 }
   0x2   :  { %21 = vsyncpa [#allocation6], 0  ;;  %s5456_s21 = smov 0  }
   0x3 LB: > { %s5462_s22 = sadd.s32 4294967295, %s5361_s21   ;;  %p3841_p0 = scmp.ge.s32.totalorder %s5361_s21, 1  ;;  %s5361_s21 = sphi %s5456_s21, %s27_s21  }
   0x4   : > { %p458_p1 = scmp.lt.s32.totalorder %s5361_s21, 4 }
   0x6   : > { %p459_p2 = pnand %p3841_p0, %p458_p1 }
   0x8   : > { %462 = sbr.rel (%p459_p2) target bundleno = 1881 (0x759), region = 84 }
   0xf   : > { %p503_p3 = scmp.lt.s32.totalorder %s5462_s22, 2  ;;  %s8531_s27 = sld [smem:[#allocation130_spill]] }
  0x10   : > { %p3844_p4 = scmp.ne.s32.totalorder %s5462_s22, 0 }
  0x11   : > { %s504_s23 = scalar_select %p503_p3, %s5462_s22, 2 }
  0x12   : > { %511 = sbr.rel (%p3844_p4) target bundleno = 26 (0x1a), region = 88  ;;  %vm513_vm0 = vcmask (!%p3844_p4), 424960   ;;  %vm516_vm1 = vcmask (!%p3844_p4), 423936   ;;  %vm523_vm2 = vcmask (!%p3844_p4), 258048   ;;  %v5363_v0 = vmov (!%p3844_p4), 0.0  }
  0x13   : > { %s4215_s24 = sshll.u32 %s504_s23, 6  ;;  %512 = vst [vmem:[#allocation2] sm:$0xff] (!%p3844_p4), %v5363_v0  ;;  %515 = vst [vmem:[#allocation2 + $0x10] sm:$0x7f] (!%p3844_p4), %v5363_v0  ;;  %vm527_vm3 = vcmask (!%p3844_p4), 74752  }
  0x14   : > { %518 = vst [vmem:[#allocation2 + $0x20] sm:$0xff] (!%p3844_p4), %v5363_v0  ;;  %520 = vst [vmem:[#allocation2 + $0x30] sm:$0x7f] (!%p3844_p4), %v5363_v0 }
  0x15   : > { %s5471_s28 = scalar_lea.vmem %s8531_s27, %s4215_s24  ;;  %522 = vst [vmem:[#allocation3] sm:$0x1f] (!%p3844_p4), %v5363_v0  ;;  %525 = vst [vmem:[#allocation3 + $0x10] sm:$0x1f] (!%p3844_p4), %v5363_v0 }
  0x16   : > { %514 = vst.msk [vmem:[#allocation2 + $0x8] sm:$0xff] (!%p3844_p4), %vm513_vm0, %v5363_v0  ;;  %519 = vst.msk [vmem:[#allocation2 + $0x28] sm:$0xff] (!%p3844_p4), %vm513_vm0, %v5363_v0 }
  0x17   : > { %517 = vst.msk [vmem:[#allocation2 + $0x18] sm:$0x7f] (!%p3844_p4), %vm516_vm1, %v5363_v0  ;;  %521 = vst.msk [vmem:[#allocation2 + $0x38] sm:$0x7f] (!%p3844_p4), %vm516_vm1, %v5363_v0 }
  0x18   : > { %524 = vst.msk [vmem:[#allocation3 + $0x8] sm:$0x1f] (!%p3844_p4), %vm523_vm2, %v5363_v0  ;;  %526 = vst.msk [vmem:[#allocation3 + $0x18] sm:$0x1f] (!%p3844_p4), %vm523_vm2, %v5363_v0 }
  0x19   : > { %528 = vst.msk [vmem:[#allocation4] sm:$0x3] %vm527_vm3, %v5363_v0  ;;  %529 = vst.msk [vmem:[#allocation5] sm:$0x3] %vm527_vm3, %v5363_v0 }
  0x1a PF: > { %v3846_v1 = vld [vmem:[%s8386_s1 + $0x230] sm:$0xff]  ;;  %v3849_v2 = vld [vmem:[%s8386_s1 + $0x248] sm:$0xff]  ;;  %v3847_v3 = vld [vmem:[%s8386_s1 + $0x238] sm:$0xff]  ;;  %v8402_v4 = vmov 0.0|0.0   ;;  %vm611_vm4 = vcmask 424960   ;;  %vm763_vm5 = vcmask 1046528  }
  0x1b   : > { %4310 = vmatprep.subr.bf16.mxu1 %v8402_v4  ;;  %v5484_v5 = vpack.c.bf16 %v3849_v2, %v3846_v1  ;;  %v3850_v6 = vld [vmem:[%s8386_s1 + $0x250] sm:$0xff]  ;;  %v3845_v7 = vld [vmem:[%s8386_s1 + $0x228] sm:$0xff]  ;;  %v3848_v8 = vld [vmem:[%s8386_s1 + $0x240] sm:$0xff]  ;;  %vm614_vm8 = vcmask 423936   ;;  %vm776_vm13 = vcmask 1043456   ;;  %vm1173_vm14 = vcmask 1045504  }
  0x1c   : > { %v5495_v9 = vpack.c.bf16 %v3850_v6, %v3847_v3  ;;  %v5497_v10 = vpack.c.bf16 %v3848_v8, %v3845_v7  ;;  %v3852_v11 = vld [vmem:[%s8386_s1 + $0x260] sm:$0xff]  ;;  %v3855_v12 = vld [vmem:[%s8386_s1 + $0x278] sm:$0xff]  ;;  %v3853_v13 = vld [vmem:[%s8386_s1 + $0x268] sm:$0xff]  ;;  %vm1423_vm15 = vcmask 1044480   ;;  %vm1929_vm2 = vcmask 1040384   ;;  %s5366_s24 = smov 96  }
  0x1d   : > { %4267 = vmatprep.subr.bf16.mxu0 %v5484_v5  ;;  %v5509_v14 = vpack.c.bf16 %v3855_v12, %v3852_v11  ;;  %v3856_v15 = vld [vmem:[%s8386_s1 + $0x280] sm:$0xff]  ;;  %v3851_v16 = vld [vmem:[%s8386_s1 + $0x258] sm:$0xff]  ;;  %v3854_v17 = vld [vmem:[%s8386_s1 + $0x270] sm:$0xff]  ;;  %vm1933_vm3 = vcmask 1041408   ;;  %s5367_s25 = smov 32   ;;  %s5368_s26 = smov 64  }
  0x1e   : > { %4312 = vmatpush1.bf16.msra.mxu1 %v5495_v9  ;;  %4269 = vmatpush1.bf16.msra.mxu0 %v5497_v10  ;;  %v5522_v18 = vpack.c.bf16 %v3856_v15, %v3853_v13  ;;  %v5524_v19 = vpack.c.bf16 %v3854_v17, %v3851_v16  ;;  %v3858_v20 = vld [vmem:[%s8386_s1 + $0x290] sm:$0xff]  ;;  %v3861_v21 = vld [vmem:[%s8386_s1 + $0x2a8] sm:$0xff]  ;;  %v3859_v22 = vld [vmem:[%s8386_s1 + $0x298] sm:$0xff]  ;;  %s5370_s20 = smov [#allocation5]   ;;  %p5292_p5 = scmp.eq.s32.totalorder %s5462_s22, 2 }
  0x1f   : > { %4313 = vmatprep.subr.bf16.mxu1 %v8402_v4  ;;  %4271 = vmatprep.subr.bf16.mxu0 %v5509_v14  ;;  %v5537_v23 = vpack.c.bf16 %v3861_v21, %v3858_v20  ;;  %v3862_v24 = vld [vmem:[%s8386_s1 + $0x2b0] sm:$0xff]  ;;  %v3857_v25 = vld [vmem:[%s8386_s1 + $0x288] sm:$0xff]  ;;  %v3860_v26 = vld [vmem:[%s8386_s1 + $0x2a0] sm:$0xff]  ;;  %s3799_s23 = sshll.u32 %s5370_s20, 4  ;;  %s3800_s23 = int_to_ptr.vmem [resolvable:$true] %s3799_s23 }
  0x20   : > { %v3864_v27 = vld [vmem:[%s8386_s1 + $0x2c0] sm:$0xff]  ;;  %v3867_v28 = vld [vmem:[%s8386_s1 + $0x2d8] sm:$0xff]  ;;  %v5556_v29 = vpack.c.bf16 %v3862_v24, %v3859_v22  ;;  %v5558_v30 = vpack.c.bf16 %v3860_v26, %v3857_v25  ;;  %v3865_v31 = vld [vmem:[%s8386_s1 + $0x2c8] sm:$0xff]  ;;  %p5332_p9 = scmp.lt.s32.totalorder %s3800_s23, %s3800_s23 }
  0x21   : > { %v5565_v32 = vpack.c.bf16 %v3867_v28, %v3864_v27  ;;  %v3868_v33 = vld [vmem:[%s8386_s1 + $0x2e0] sm:$0xff]  ;;  %v3863_v34 = vld [vmem:[%s8386_s1 + $0x2b8] sm:$0xff]  ;;  %v3866_v35 = vld [vmem:[%s8386_s1 + $0x2d0] sm:$0xff] }
  0x22   : > { %4315 = vmatpush1.bf16.msra.mxu1 %v5522_v18  ;;  %4273 = vmatpush1.bf16.msra.mxu0 %v5524_v19  ;;  %v3870_v36 = vld [vmem:[%s8386_s1 + $0x2f0] sm:$0xff]  ;;  %v3873_v37 = vld [vmem:[%s8386_s1 + $0x308] sm:$0xff]  ;;  %v5584_v38 = vpack.c.bf16 %v3868_v33, %v3865_v31  ;;  %v5586_v39 = vpack.c.bf16 %v3866_v35, %v3863_v34  ;;  %v3871_v40 = vld [vmem:[%s8386_s1 + $0x2f8] sm:$0xff] }
  0x23   : > { %4316 = vmatprep.subr.bf16.mxu1 %v8402_v4  ;;  %4275 = vmatprep.subr.bf16.mxu0 %v5537_v23  ;;  %v5593_v41 = vpack.c.bf16 %v3873_v37, %v3870_v36  ;;  %v3874_v42 = vld [vmem:[%s8386_s1 + $0x310] sm:$0xff]  ;;  %v3869_v43 = vld [vmem:[%s8386_s1 + $0x2e8] sm:$0xff]  ;;  %v3872_v44 = vld [vmem:[%s8386_s1 + $0x300] sm:$0xff] }
  0x24   : > { %v3876_v45 = vld [vmem:[%s8386_s1 + $0x320] sm:$0xff]  ;;  %v3879_v46 = vld [vmem:[%s8386_s1 + $0x338] sm:$0xff]  ;;  %v5612_v47 = vpack.c.bf16 %v3874_v42, %v3871_v40  ;;  %v5614_v48 = vpack.c.bf16 %v3872_v44, %v3869_v43  ;;  %v3877_v49 = vld [vmem:[%s8386_s1 + $0x328] sm:$0xff] }
  0x25   : > { %v5621_v50 = vpack.c.bf16 %v3879_v46, %v3876_v45  ;;  %v3880_v51 = vld [vmem:[%s8386_s1 + $0x340] sm:$0xff]  ;;  %v3875_v52 = vld [vmem:[%s8386_s1 + $0x318] sm:$0xff]  ;;  %v3878_v53 = vld [vmem:[%s8386_s1 + $0x330] sm:$0xff] }
  0x26   : > { %4318 = vmatpush1.bf16.msra.mxu1 %v5556_v29  ;;  %4277 = vmatpush1.bf16.msra.mxu0 %v5558_v30  ;;  %v3882_v54 = vld [vmem:[%s8386_s1 + $0x350] sm:$0xff]  ;;  %v3885_v55 = vld [vmem:[%s8386_s1 + $0x368] sm:$0xff]  ;;  %v5640_v56 = vpack.c.bf16 %v3880_v51, %v3877_v49  ;;  %v5642_v57 = vpack.c.bf16 %v3878_v53, %v3875_v52  ;;  %v3883_v58 = vld [vmem:[%s8386_s1 + $0x358] sm:$0xff] }
  0x27   : > { %4319 = vmatprep.subr.bf16.mxu1 %v8402_v4  ;;  %4279 = vmatprep.subr.bf16.mxu0 %v5565_v32  ;;  %v3886_v59 = vld [vmem:[%s8386_s1 + $0x370] sm:$0xff]  ;;  %v5652_v60 = vpack.c.bf16 %v3885_v55, %v3882_v54  ;;  %v3881_v61 = vld [vmem:[%s8386_s1 + $0x348] sm:$0xff]  ;;  %v3884_v62 = vld [vmem:[%s8386_s1 + $0x360] sm:$0xff] }
  0x28   : > { %v3888_v63 = vld [vmem:[%s8386_s1 + $0x380] sm:$0xff]  ;;  %v3891_v0 = vld [vmem:[%s8386_s1 + $0x398] sm:$0xff]  ;;  %v3889_v1 = vld [vmem:[%s8386_s1 + $0x388] sm:$0xff]  ;;  %v5689_v15 = vpack.c.bf16 %v3886_v59, %v3883_v58  ;;  %v5691_v16 = vpack.c.bf16 %v3884_v62, %v3881_v61 }
  0x29   : > { %v3892_v2 = vld [vmem:[%s8386_s1 + $0x3a0] sm:$0xff]  ;;  %v3887_v3 = vld [vmem:[%s8386_s1 + $0x378] sm:$0xff]  ;;  %v3890_v6 = vld [vmem:[%s8386_s1 + $0x390] sm:$0xff]  ;;  %v5700_v22 = vpack.c.bf16 %v3891_v0, %v3888_v63 }
  0x2a   : > { %4321 = vmatpush1.bf16.msra.mxu1 %v5584_v38  ;;  %4281 = vmatpush1.bf16.msra.mxu0 %v5586_v39  ;;  %v3894_v7 = vld [vmem:[%s8386_s1 + $0x3b0] sm:$0xff]  ;;  %v3897_v8 = vld [vmem:[%s8386_s1 + $0x3c8] sm:$0xff]  ;;  %v3895_v11 = vld [vmem:[%s8386_s1 + $0x3b8] sm:$0xff]  ;;  %v5724_v35 = vpack.c.bf16 %v3892_v2, %v3889_v1  ;;  %v5730_v44 = vpack.c.bf16 %v3890_v6, %v3887_v3 }
  0x2b   : > { %4322 = vmatprep.subr.bf16.mxu1 %v8402_v4  ;;  %4283 = vmatprep.subr.bf16.mxu0 %v5593_v41  ;;  %v531_v12 = vld [vmem:[#allocation2 + $0x8] sm:$0xff]  ;;  %v533_v13 = vld [vmem:[#allocation2 + $0x18] sm:$0x7f]  ;;  %v3898_v17 = vld [vmem:[%s8386_s1 + $0x3d0] sm:$0xff]  ;;  %v5732_v45 = vpack.c.bf16 %v3897_v8, %v3894_v7 }
  0x2c   : > { %v539_v20 = vld [vmem:[%s5471_s28 + $0x8] sm:$0xff]  ;;  %v541_v21 = vld [vmem:[%s5471_s28 + $0x18] sm:$0x7f]  ;;  %v3896_v25 = vld [vmem:[%s8386_s1 + $0x3c0] sm:$0xff]  ;;  %v5734_v46 = vpack.c.bf16 %v3898_v17, %v3895_v11 }
  0x2d   : > { %v3893_v24 = vld [vmem:[%s8386_s1 + $0x3a8] sm:$0xff]  ;;  %v547_v26 = vadd.f32 %v539_v20, %v531_v12  ;;  %v549_v27 = vadd.f32 %v541_v21, %v533_v13  ;;  %v3900_v31 = vld [vmem:[%s8386_s1 + $0x3e0] sm:$0xff]  ;;  %v3903_v33 = vld [vmem:[%s8386_s1 + $0x3f8] sm:$0xff] }
  0x2e   : > { %4324 = vmatpush1.bf16.msra.mxu1 %v5612_v47  ;;  %4285 = vmatpush1.bf16.msra.mxu0 %v5614_v48  ;;  %v5711_v28 = vld [vmem:[%s8388_s3 + $0x8] sm:$0xff]  ;;  %v5722_v34 = vld [vmem:[%s8388_s3 + $0x18] sm:$0x7f]  ;;  %v530_v40 = vld [vmem:[#allocation2] sm:$0xff]  ;;  %v5749_v63 = vpack.c.bf16 %v3896_v25, %v3893_v24  ;;  %v5751_v0 = vpack.c.bf16 %v3903_v33, %v3900_v31 }
  0x2f   : > { %4325 = vmatprep.subr.bf16.mxu1 %v8402_v4  ;;  %4287 = vmatprep.subr.bf16.mxu0 %v5621_v50  ;;  %v559_v36 = vsub.f32 %v547_v26, %v5711_v28  ;;  %v561_v37 = vsub.f32 %v549_v27, %v5722_v34  ;;  %v532_v42 = vld [vmem:[#allocation2 + $0x10] sm:$0x7f]  ;;  %v534_v43 = vld [vmem:[#allocation2 + $0x20] sm:$0xff]  ;;  %v5756_v1 = vld [vmem:[%s8389_s4 + $0x8] sm:$0xff] }
  0x30   : > { %v536_v49 = vld [vmem:[#allocation2 + $0x30] sm:$0x7f]  ;;  %v538_v51 = vld [vmem:[%s5471_s28] sm:$0xff]  ;;  %v5761_v2 = vld [vmem:[%s8389_s4 + $0x18] sm:$0x7f] }
  0x31   : > { %v540_v52 = vld [vmem:[%s5471_s28 + $0x10] sm:$0x7f]  ;;  %v5740_v53 = vmax.f32 %v559_v36, 0.0  ;;  %v5742_v54 = vmax.f32 %v561_v37, 0.0  ;;  %v542_v55 = vld [vmem:[%s5471_s28 + $0x20] sm:$0xff]  ;;  %v546_v59 = vadd.f32 %v538_v51, %v530_v40  ;;  %v3901_v8 = vld [vmem:[%s8386_s1 + $0x3e8] sm:$0xff] }
  0x32   : > { %4327 = vmatpush1.bf16.msra.mxu1 %v5640_v56  ;;  %4289 = vmatpush1.bf16.msra.mxu0 %v5642_v57  ;;  %v544_v58 = vld [vmem:[%s5471_s28 + $0x30] sm:$0x7f]  ;;  %v548_v61 = vadd.f32 %v540_v52, %v532_v42  ;;  %v554_v62 = vld [vmem:[%s8388_s3] sm:$0xff]  ;;  %v550_v3 = vadd.f32 %v542_v55, %v534_v43  ;;  %v3899_v17 = vld [vmem:[%s8386_s1 + $0x3d8] sm:$0xff] }
  0x33   : > { %4328 = vmatprep.subr.bf16.mxu1 %v8402_v4  ;;  %4291 = vmatprep.subr.bf16.mxu0 %v5652_v60  ;;  %8532 = vst [vmem:[#allocation8_spill] sm:$0xff] %v5740_v53  ;;  %8533 = vst [vmem:[#allocation9_spill] sm:$0xff] %v5742_v54  ;;  %v552_v6 = vadd.f32 %v544_v58, %v536_v49  ;;  %v556_v7 = vld [vmem:[%s8388_s3 + $0x10] sm:$0x7f]  ;;  %vm575_vm6 = vcmp.eq.f32.partialorder %v5740_v53, 0.0  ;;  %vm577_vm7 = vcmp.eq.f32.partialorder %v5742_v54, 0.0 }
  0x34   : > { %v767_v11 = vrot.slane %v5740_v53, 1  ;;  %v5773_v12 = vrot.slane %v5742_v54, 1  ;;  %v3904_v13 = vld [vmem:[%s8386_s1 + $0x400] sm:$0xff]  ;;  %v3902_v20 = vld [vmem:[%s8386_s1 + $0x3f0] sm:$0xff]  ;;  %v583_v21 = vsel %vm575_vm6, %v547_v26, 0.0  ;;  %v585_v24 = vsel %vm577_vm7, %v549_v27, 0.0 }
  0x35   : > { %v558_v25 = vsub.f32 %v546_v59, %v554_v62  ;;  %v560_v31 = vsub.f32 %v548_v61, %v556_v7  ;;  %v595_v33 = vmul.f32 %v5756_v1, %v583_v21  ;;  %v597_v36 = vmul.f32 %v5761_v2, %v585_v24  ;;  %v3906_v40 = vld [vmem:[%s8386_s1 + $0x410] sm:$0xff]  ;;  %v3909_v26 = vld [vmem:[%s8386_s1 + $0x428] sm:$0xff]  ;;  %v3907_v27 = vld [vmem:[%s8386_s1 + $0x418] sm:$0xff] }
  0x36   : > { %4330 = vmatpush1.bf16.msra.mxu1 %v5689_v15  ;;  %4293 = vmatpush1.bf16.msra.mxu0 %v5691_v16  ;;  %v769_v37 = vsel %vm763_vm5, %v767_v11, %v5773_v12  ;;  %v562_v42 = vsub.f32 %v550_v3, %v554_v62  ;;  %v564_v43 = vsub.f32 %v552_v6, %v556_v7  ;;  %v3910_v58 = vld [vmem:[%s8386_s1 + $0x430] sm:$0xff]  ;;  %v590_v24 = vld [vmem:[%s8389_s4] sm:$0xff]  ;;  %v3905_v7 = vld [vmem:[%s8386_s1 + $0x408] sm:$0xff]  ;;  %vm1937_vm6 = vcmask 1042432  }
  0x37   : > { %4331 = vmatprep.subr.bf16.mxu1 %v8402_v4  ;;  %4295 = vmatprep.subr.bf16.mxu0 %v5700_v22  ;;  %v5803_v49 = vmax.f32 %v558_v25, 0.0  ;;  %v5805_v51 = vmax.f32 %v560_v31, 0.0  ;;  %v5807_v52 = vpack.c.bf16 %v3904_v13, %v3901_v8  ;;  %v5809_v55 = vpack.c.bf16 %v3902_v20, %v3899_v17  ;;  %v592_v62 = vld [vmem:[%s8389_s4 + $0x10] sm:$0x7f]  ;;  %v3908_v8 = vld [vmem:[%s8386_s1 + $0x420] sm:$0xff] }
  0x38   : > { %3919 = vmatprep.mubr.msk.f32.mxu1 %vm611_vm4, %v769_v37  ;;  %3916 = vmatprep.mubr.msk.f32.mxu0 %vm611_vm4, %v769_v37  ;;  %v603_v11 = vmax.f32 %v595_v33, 0.0  ;;  %v605_v21 = vmax.f32 %v597_v36, 0.0  ;;  %v5828_v13 = vmax.f32 %v562_v42, 0.0  ;;  %v5830_v17 = vmax.f32 %v564_v43, 0.0 }
  0x39   : > { %vm574_vm9 = vcmp.eq.f32.partialorder %v5803_v49, 0.0  ;;  %vm576_vm10 = vcmp.eq.f32.partialorder %v5805_v51, 0.0  ;;  %v5836_v20 = vpack.c.bf16 %v3909_v26, %v3906_v40  ;;  %v5842_v37 = vpack.c.bf16 %v3910_v58, %v3907_v27  ;;  %v3912_v27 = vld [vmem:[%s8386_s1 + $0x440] sm:$0xf] }
  0x3a   : > { %4333 = vmatpush1.bf16.msra.mxu1 %v5724_v35  ;;  %4297 = vmatpush1.bf16.msra.mxu0 %v5730_v44  ;;  %8534 = vst [vmem:[#allocation10_spill] sm:$0xff] %v5828_v13  ;;  %8535 = vst [vmem:[#allocation11_spill] sm:$0xff] %v5830_v17  ;;  %v582_v25 = vsel %vm574_vm9, %v546_v59, 0.0  ;;  %v584_v31 = vsel %vm576_vm10, %v548_v61, 0.0  ;;  %vm578_vm11 = vcmp.eq.f32.partialorder %v5828_v13, 0.0  ;;  %vm580_vm12 = vcmp.eq.f32.partialorder %v5830_v17, 0.0 }
  0x3b   : > { %4334 = vmatprep.subr.bf16.mxu1 %v8402_v4  ;;  %4299 = vmatprep.subr.bf16.mxu0 %v5732_v45  ;;  %612 = vst.msk [vmem:[#allocation2 + $0x8] sm:$0xff] %vm611_vm4, %v603_v11  ;;  %v594_v33 = vmul.f32 %v590_v24, %v582_v25  ;;  %v596_v36 = vmul.f32 %v592_v62, %v584_v31  ;;  %8536 = vst [vmem:[#allocation12_spill] sm:$0xff] %v5842_v37  ;;  %v586_v43 = vsel %vm578_vm11, %v550_v3, 0.0  ;;  %v8538_v11 = vmov 0.0|0.0   ;;  %v3911_v31 = vld [vmem:[%s8386_s1 + $0x438] sm:$0xf] }
  0x3c   : > { %615 = vst.msk [vmem:[#allocation2 + $0x18] sm:$0x7f] %vm614_vm8, %v605_v21  ;;  %v5844_v42 = vpack.c.bf16 %v3908_v8, %v3905_v7  ;;  %v598_v40 = vmul.f32 %v590_v24, %v586_v43  ;;  %v765_v21 = vrot.slane %v5805_v51, 1  ;;  %v624_v24 = vld [vmem:[%s8386_s1 + $0x20] sm:$0xff]  ;;  %v625_v7 = vld [vmem:[%s8386_s1 + $0x28] sm:$0xff]  ;;  %v8404_v25 = vmov 0.0  }
  0x3d   : > { %v602_v59 = vmax.f32 %v594_v33, 0.0  ;;  %v604_v61 = vmax.f32 %v596_v36, 0.0  ;;  %v3913_v8 = vld [vmem:[%s8386_s1 + $0x448] sm:$0xf]  ;;  %v620_v33 = vld [vmem:[%s8386_s1] sm:$0xff]  ;;  %v623_v36 = vld [vmem:[%s8386_s1 + $0x18] sm:$0xff] }
  0x3e   : > { %4336 = vmatpush1.bf16.msra.mxu1 %v5734_v46  ;;  %4301 = vmatpush1.bf16.msra.mxu0 %v5749_v63  ;;  %8537 = vst [vmem:[#allocation13_spill] sm:$0xff] %v5844_v42  ;;  %v606_v58 = vmax.f32 %v598_v40, 0.0  ;;  %v1427_v17 = vrot.slane %v5740_v53, 3  ;;  %v6588_v13 = vrot.slane %v5742_v54, 3  ;;  %vm1970_vm7 = vcmask 261120  }
  0x3f   : > { %4337 = vmatprep.subr.bf16.mxu1 %v8402_v4  ;;  %4303 = vmatprep.subr.bf16.mxu0 %v5751_v0  ;;  %v588_v4 = vsel %vm580_vm12, %v552_v6, 0.0  ;;  %610 = vst [vmem:[#allocation2] sm:$0xff] %v602_v59  ;;  %613 = vst [vmem:[#allocation2 + $0x10] sm:$0x7f] %v604_v61  ;;  %v764_v6 = vrot.slane %v5803_v49, 1  ;;  %v627_v59 = vld [vmem:[%s8386_s1 + $0x38] sm:$0xff] }
  0x40   : > { %v600_v26 = vmul.f32 %v592_v62, %v588_v4  ;;  %v621_v4 = vld [vmem:[%s8386_s1 + $0x8] sm:$0xff]  ;;  %v622_v62 = vld [vmem:[%s8386_s1 + $0x10] sm:$0xff]  ;;  %616 = vst [vmem:[#allocation2 + $0x20] sm:$0xff] %v606_v58  ;;  %v631_v58 = vld [vmem:[%s8386_s1 + $0x58] sm:$0xff]  ;;  %vm1974_vm9 = vcmask 785408   ;;  %vm2916_vm10 = vcmask 258048  }
  0x41   : > { %v766_v43 = vsel %vm763_vm5, %v764_v6, %v765_v21  ;;  %v5884_v40 = vpack.c.bf16 %v624_v24, %v621_v4  ;;  %v630_v61 = vld [vmem:[%s8386_s1 + $0x50] sm:$0xff]  ;;  %v629_v24 = vld [vmem:[%s8386_s1 + $0x48] sm:$0xff] }
  0x42   : > { %4339 = vmatpush1.bf16.msra.mxu1 %v5807_v52  ;;  %4305 = vmatpush1.bf16.msra.mxu0 %v5809_v55  ;;  %v608_v3 = vmax.f32 %v600_v26, 0.0  ;;  %v5886_v26 = vpack.c.bf16 %v625_v7, %v622_v62  ;;  %v5905_v6 = vpack.c.bf16 %v630_v61, %v627_v59  ;;  %v626_v4 = vld [vmem:[%s8386_s1 + $0x30] sm:$0xff]  ;;  %v633_v7 = vld [vmem:[%s8386_s1 + $0x68] sm:$0xff]  ;;  %v632_v59 = vld [vmem:[%s8386_s1 + $0x60] sm:$0xff] }
  0x43   : > { %4340 = vmatprep.subr.bf16.mxu1 %v8538_v11  ;;  %4307 = vmatprep.subr.bf16.mxu0 %v5836_v20  ;;  %8539 = vst [vmem:[#allocation14_spill] sm:$0xff] %v5884_v40  ;;  %v635_v61 = vld [vmem:[%s8386_s1 + $0x78] sm:$0xff] }
  0x44   : > { %618 = vst [vmem:[#allocation2 + $0x30] sm:$0x7f] %v608_v3  ;;  %8540 = vst [vmem:[#allocation15_spill] sm:$0xff] %v5886_v26  ;;  %v5902_v3 = vpack.c.bf16 %v623_v36, %v620_v33  ;;  %v637_v33 = vld [vmem:[%s8386_s1 + $0x88] sm:$0xff]  ;;  %v5931_v36 = vpack.c.bf16 %v629_v24, %v626_v4  ;;  %v642_v4 = vld [vmem:[%s8386_s1 + $0xb0] sm:$0xff] }
  0x45   : > { %8542 = vst [vmem:[#allocation17_spill] sm:$0xff] %v5905_v6  ;;  %v640_v24 = vld [vmem:[%s8386_s1 + $0xa0] sm:$0xff] }
  0x46   : > { %4342 = vmatpush1.bf16.msra.mxu1 %v5842_v37  ;;  %4309 = vmatpush1.bf16.msra.mxu0 %v5844_v42  ;;  %8541 = vst [vmem:[#allocation16_spill] sm:$0xff] %v5902_v3  ;;  %8544 = vst [vmem:[#allocation19_spill] sm:$0xff] %v5931_v36  ;;  %v4014_v42 = vld [vmem:[%s8386_s1 + $0x6c8] sm:$0xff]  ;;  %v3994_v37 = vld [vmem:[%s8386_s1 + $0x660] sm:$0xf] }
  0x47   : > { %907 = vmatprep.subr.mxu1 %v8404_v25  ;;  %3914 = vmatprep.subr.msk.mxu0 %vm776_vm13, %v3912_v27  ;;  %v628_v27 = vld [vmem:[%s8386_s1 + $0x40] sm:$0xff] }
  0x48   : > { %v5915_v62 = vpack.c.bf16 %v631_v58, %v628_v27  ;;  %v639_v58 = vld [vmem:[%s8386_s1 + $0x98] sm:$0xff]  ;;  %v644_v25 = vld [vmem:[%s8386_s1 + $0xc0] sm:$0xff] }
  0x4a   : > { %3918 = vmatpush1.msk.msra.mxu1 %vm776_vm13, %v3913_v8  ;;  %3915 = vmatpush1.msk.msra.mxu0 %vm776_vm13, %v3911_v31  ;;  %8543 = vst [vmem:[#allocation18_spill] sm:$0xff] %v5915_v62  ;;  %v636_v8 = vld [vmem:[%s8386_s1 + $0x80] sm:$0xff]  ;;  %v634_v31 = vld [vmem:[%s8386_s1 + $0x70] sm:$0xff] }
  0x4b   : > { %4387 = vmatprep.subr.bf16.mxu1 %v8538_v11  ;;  %928 = vmatmul.mubr.f32.vlgmr.msra.gmra.mrb[0].mxu1 %v766_v43  ;;  %v5947_v27 = vpack.c.bf16 %v637_v33, %v634_v31  ;;  %v638_v31 = vld [vmem:[%s8386_s1 + $0x90] sm:$0xff]  ;;  %v641_v33 = vld [vmem:[%s8386_s1 + $0xa8] sm:$0xff] }
  0x4c   : > { %4344 = vmatprep.subr.bf16.mxu0 %v5884_v40  ;;  %4389 = vmatpush1.bf16.msra.mxu1 %v5886_v26  ;;  %v4011_v40 = vld [vmem:[%s8386_s1 + $0x6b0] sm:$0xff] }
  0x4d   : > { %851 = vmatmul.mubr.f32.vlgmr.msra.gmra.mrb[0].mxu0 %v766_v43  ;;  %4390 = vmatprep.subr.bf16.mxu1 %v8538_v11  ;;  %v5936_v43 = vpack.c.bf16 %v636_v8, %v633_v7  ;;  %8546 = vst [vmem:[#allocation21_spill] sm:$0xff] %v5947_v27  ;;  %v5963_v7 = vpack.c.bf16 %v635_v61, %v632_v59  ;;  %v645_v61 = vld [vmem:[%s8386_s1 + $0xc8] sm:$0xff] }
  0x4e   : > { %4346 = vmatpush1.bf16.msra.mxu0 %v5902_v3  ;;  %3920 = vmatprep.mubr.msk.f32.mxu1 %vm611_vm4, %v5773_v12  ;;  %v5968_v8 = vpack.c.bf16 %v642_v4, %v639_v58  ;;  %v648_v58 = vld [vmem:[%s8386_s1 + $0xe0] sm:$0xff]  ;;  %v649_v4 = vld [vmem:[%s8386_s1 + $0xe8] sm:$0xff] }
  0x4f   : > { %4348 = vmatprep.subr.bf16.mxu0 %v5905_v6  ;;  %8545 = vst [vmem:[#allocation20_spill] sm:$0xff] %v5936_v43  ;;  %3917 = vmatprep.mubr.msk.f32.mxu0 %vm611_vm4, %v5773_v12  ;;  %v643_v12 = vld [vmem:[%s8386_s1 + $0xb8] sm:$0xff]  ;;  %8547 = vst [vmem:[#allocation22_spill] sm:$0xff] %v5963_v7 }
  0x50   : > { %4392 = vmatpush1.bf16.msra.mxu1 %v5915_v62  ;;  %8548 = vst [vmem:[#allocation23_spill] sm:$0xff] %v5968_v8  ;;  %v5977_v59 = vpack.c.bf16 %v643_v12, %v640_v24  ;;  %v5995_v24 = vpack.c.bf16 %v641_v33, %v638_v31  ;;  %v5998_v12 = vpack.c.bf16 %v648_v58, %v645_v61  ;;  %v651_v31 = vld [vmem:[%s8386_s1 + $0xf8] sm:$0xff]  ;;  %v654_v33 = vld [vmem:[%s8386_s1 + $0x110] sm:$0xff]  ;;  %v652_v61 = vld [vmem:[%s8386_s1 + $0x100] sm:$0xff] }
  0x51   : > { %4393 = vmatprep.subr.bf16.mxu1 %v8538_v11  ;;  %933 = vmatmul.mubr.f32.gmra.mrb[2].mxu1 %v765_v21  ;;  %v655_v58 = vld [vmem:[%s8386_s1 + $0x118] sm:$0xff] }
  0x52   : > { %4350 = vmatpush1.bf16.msra.mxu0 %v5931_v36  ;;  %3926 = vmatprep.mubr.msk.f32.mxu1 %vm611_vm4, %v5740_v53  ;;  %8549 = vst [vmem:[#allocation24_spill] sm:$0xff] %v5977_v59  ;;  %8550 = vst [vmem:[#allocation25_spill] sm:$0xff] %v5995_v24  ;;  %v1177_v36 = vrot.slane %v5740_v53, 2  ;;  %v545_v6 = vld [vmem:[%s5471_s28 + $0x38] sm:$0x7f] }
  0x53   : > { %4352 = vmatprep.subr.bf16.mxu0 %v5936_v43  ;;  %857 = vmatmul.mubr.f32.gmra.mrb[2].mxu0 %v765_v21  ;;  %v646_v21 = vld [vmem:[%s8386_s1 + $0xd0] sm:$0xff]  ;;  %8551 = vst [vmem:[#allocation26_spill] sm:$0xff] %v5998_v12 }
  0x54   : > { %4395 = vmatpush1.bf16.msra.mxu1 %v5947_v27  ;;  %3923 = vmatprep.mubr.msk.f32.mxu0 %vm611_vm4, %v5740_v53  ;;  %v647_v27 = vld [vmem:[%s8386_s1 + $0xd8] sm:$0xff]  ;;  %v6007_v43 = vpack.c.bf16 %v649_v4, %v646_v21  ;;  %v6026_v4 = vpack.c.bf16 %v654_v33, %v651_v31  ;;  %v658_v31 = vld [vmem:[%s8386_s1 + $0x130] sm:$0xff]  ;;  %v661_v33 = vld [vmem:[%s8386_s1 + $0x148] sm:$0xff] }
  0x55   : > { %4396 = vmatprep.subr.bf16.mxu1 %v8538_v11  ;;  %v6023_v21 = vpack.c.bf16 %v647_v27, %v644_v25  ;;  %v657_v25 = vld [vmem:[%s8386_s1 + $0x128] sm:$0xff]  ;;  %v660_v27 = vld [vmem:[%s8386_s1 + $0x140] sm:$0xff] }
  0x56   : > { %4354 = vmatpush1.bf16.msra.mxu0 %v5963_v7  ;;  %8552 = vst [vmem:[#allocation27_spill] sm:$0xff] %v6007_v43  ;;  %8554 = vst [vmem:[#allocation29_spill] sm:$0xff] %v6026_v4  ;;  %v6035_v7 = vpack.c.bf16 %v655_v58, %v652_v61  ;;  %v6054_v58 = vpack.c.bf16 %v660_v27, %v657_v25  ;;  %v664_v25 = vld [vmem:[%s8386_s1 + $0x160] sm:$0xff]  ;;  %v667_v27 = vld [vmem:[%s8386_s1 + $0x178] sm:$0xff] }
  0x57   : > { %4356 = vmatprep.subr.bf16.mxu0 %v5968_v8  ;;  %8553 = vst [vmem:[#allocation28_spill] sm:$0xff] %v6023_v21  ;;  %v653_v8 = vld [vmem:[%s8386_s1 + $0x108] sm:$0xff] }
  0x58   : > { %4398 = vmatpush1.bf16.msra.mxu1 %v5977_v59  ;;  %v650_v59 = vld [vmem:[%s8386_s1 + $0xf0] sm:$0xff]  ;;  %8555 = vst [vmem:[#allocation30_spill] sm:$0xff] %v6035_v7  ;;  %8557 = vst [vmem:[#allocation32_spill] sm:$0xff] %v6054_v58 }
  0x59   : > { %4399 = vmatprep.subr.bf16.mxu1 %v8538_v11  ;;  %v6051_v61 = vpack.c.bf16 %v653_v8, %v650_v59  ;;  %v663_v8 = vld [vmem:[%s8386_s1 + $0x158] sm:$0xff]  ;;  %v666_v59 = vld [vmem:[%s8386_s1 + $0x170] sm:$0xff] }
  0x5a   : > { %4358 = vmatpush1.bf16.msra.mxu0 %v5995_v24  ;;  %v6063_v24 = vpack.c.bf16 %v661_v33, %v658_v31  ;;  %v6082_v33 = vpack.c.bf16 %v666_v59, %v663_v8  ;;  %v670_v8 = vld [vmem:[%s8386_s1 + $0x190] sm:$0xff]  ;;  %v673_v59 = vld [vmem:[%s8386_s1 + $0x1a8] sm:$0xff] }
  0x5b   : > { %4360 = vmatprep.subr.bf16.mxu0 %v5998_v12  ;;  %8556 = vst [vmem:[#allocation31_spill] sm:$0xff] %v6051_v61  ;;  %v659_v12 = vld [vmem:[%s8386_s1 + $0x138] sm:$0xff] }
  0x5c   : > { %4401 = vmatpush1.bf16.msra.mxu1 %v6007_v43  ;;  %v656_v43 = vld [vmem:[%s8386_s1 + $0x120] sm:$0xff]  ;;  %8558 = vst [vmem:[#allocation33_spill] sm:$0xff] %v6063_v24  ;;  %8560 = vst [vmem:[#allocation35_spill] sm:$0xff] %v6082_v33 }
  0x5d   : > { %4402 = vmatprep.subr.bf16.mxu1 %v8538_v11  ;;  %v6079_v31 = vpack.c.bf16 %v659_v12, %v656_v43  ;;  %v669_v43 = vld [vmem:[%s8386_s1 + $0x188] sm:$0xff]  ;;  %v672_v12 = vld [vmem:[%s8386_s1 + $0x1a0] sm:$0xff] }
  0x5e   : > { %4362 = vmatpush1.bf16.msra.mxu0 %v6023_v21  ;;  %v6091_v21 = vpack.c.bf16 %v667_v27, %v664_v25  ;;  %v6110_v27 = vpack.c.bf16 %v672_v12, %v669_v43  ;;  %v676_v43 = vld [vmem:[%s8386_s1 + $0x1c0] sm:$0xff]  ;;  %v679_v12 = vld [vmem:[%s8386_s1 + $0x1d8] sm:$0xff] }
  0x5f   : > { %4364 = vmatprep.subr.bf16.mxu0 %v6026_v4  ;;  %8559 = vst [vmem:[#allocation34_spill] sm:$0xff] %v6079_v31  ;;  %v665_v4 = vld [vmem:[%s8386_s1 + $0x168] sm:$0xff] }
  0x60   : > { %4404 = vmatpush1.bf16.msra.mxu1 %v6035_v7  ;;  %v662_v7 = vld [vmem:[%s8386_s1 + $0x150] sm:$0xff]  ;;  %8561 = vst [vmem:[#allocation36_spill] sm:$0xff] %v6091_v21  ;;  %8563 = vst [vmem:[#allocation38_spill] sm:$0xff] %v6110_v27 }
  0x61   : > { %4405 = vmatprep.subr.bf16.mxu1 %v8538_v11  ;;  %v6107_v25 = vpack.c.bf16 %v665_v4, %v662_v7  ;;  %v675_v7 = vld [vmem:[%s8386_s1 + $0x1b8] sm:$0xff]  ;;  %v678_v4 = vld [vmem:[%s8386_s1 + $0x1d0] sm:$0xff] }
  0x62   : > { %4366 = vmatpush1.bf16.msra.mxu0 %v6051_v61  ;;  %v6119_v61 = vpack.c.bf16 %v673_v59, %v670_v8  ;;  %v6138_v59 = vpack.c.bf16 %v678_v4, %v675_v7  ;;  %v682_v7 = vld [vmem:[%s8386_s1 + $0x1f0] sm:$0xff]  ;;  %v685_v4 = vld [vmem:[%s8386_s1 + $0x208] sm:$0xff] }
  0x63   : > { %4368 = vmatprep.subr.bf16.mxu0 %v6054_v58  ;;  %8562 = vst [vmem:[#allocation37_spill] sm:$0xff] %v6107_v25  ;;  %v671_v58 = vld [vmem:[%s8386_s1 + $0x198] sm:$0xff] }
  0x64   : > { %4407 = vmatpush1.bf16.msra.mxu1 %v6063_v24  ;;  %v668_v24 = vld [vmem:[%s8386_s1 + $0x180] sm:$0xff]  ;;  %8564 = vst [vmem:[#allocation39_spill] sm:$0xff] %v6119_v61  ;;  %8566 = vst [vmem:[#allocation41_spill] sm:$0xff] %v6138_v59 }
  0x65   : > { %4408 = vmatprep.subr.bf16.mxu1 %v8538_v11  ;;  %v6135_v8 = vpack.c.bf16 %v671_v58, %v668_v24  ;;  %v681_v24 = vld [vmem:[%s8386_s1 + $0x1e8] sm:$0xff]  ;;  %v684_v58 = vld [vmem:[%s8386_s1 + $0x200] sm:$0xff] }
  0x66   : > { %4370 = vmatpush1.bf16.msra.mxu0 %v6079_v31  ;;  %v6147_v31 = vpack.c.bf16 %v679_v12, %v676_v43  ;;  %v6166_v12 = vpack.c.bf16 %v684_v58, %v681_v24  ;;  %v3933_v24 = vld [vmem:[%s8386_s1 + $0x478] sm:$0xff] }
  0x67   : > { %4372 = vmatprep.subr.bf16.mxu0 %v6082_v33  ;;  %8565 = vst [vmem:[#allocation40_spill] sm:$0xff] %v6135_v8  ;;  %v677_v33 = vld [vmem:[%s8386_s1 + $0x1c8] sm:$0xff]  ;;  %v687_v58 = vld [vmem:[%s8386_s1 + $0x218] sm:$0xf] }
  0x68   : > { %4410 = vmatpush1.bf16.msra.mxu1 %v6091_v21  ;;  %v674_v21 = vld [vmem:[%s8386_s1 + $0x1b0] sm:$0xff]  ;;  %8567 = vst [vmem:[#allocation42_spill] sm:$0xff] %v6147_v31  ;;  %8569 = vst [vmem:[#allocation44_spill] sm:$0xff] %v6166_v12 }
  0x69   : > { %4411 = vmatprep.subr.bf16.mxu1 %v8538_v11  ;;  %v6163_v43 = vpack.c.bf16 %v677_v33, %v674_v21  ;;  %v3930_v33 = vld [vmem:[%s8386_s1 + $0x460] sm:$0xff] }
  0x6a   : > { %4374 = vmatpush1.bf16.msra.mxu0 %v6107_v25  ;;  %v6175_v25 = vpack.c.bf16 %v685_v4, %v682_v7  ;;  %v8572_v7 = vmov 0.0   ;;  %v688_v4 = vld [vmem:[%s8386_s1 + $0x220] sm:$0xf] }
  0x6b   : > { %4376 = vmatprep.subr.bf16.mxu0 %v6110_v27  ;;  %8568 = vst [vmem:[#allocation43_spill] sm:$0xff] %v6163_v43  ;;  %v683_v27 = vld [vmem:[%s8386_s1 + $0x1f8] sm:$0xff] }
  0x6c   : > { %4413 = vmatpush1.bf16.msra.mxu1 %v6119_v61  ;;  %v680_v61 = vld [vmem:[%s8386_s1 + $0x1e0] sm:$0xff]  ;;  %8570 = vst [vmem:[#allocation45_spill] sm:$0xff] %v6175_v25 }
  0x6d   : > { %4414 = vmatprep.subr.bf16.mxu1 %v8538_v11  ;;  %v6179_v21 = vpack.c.bf16 %v683_v27, %v680_v61  ;;  %v3929_v61 = vld [vmem:[%s8386_s1 + $0x458] sm:$0xff]  ;;  %v3932_v27 = vld [vmem:[%s8386_s1 + $0x470] sm:$0xff] }
  0x6e   : > { %4378 = vmatpush1.bf16.msra.mxu0 %v6135_v8  ;;  %v686_v8 = vld [vmem:[%s8386_s1 + $0x210] sm:$0xf]  ;;  %v6221_v62 = vpack.c.bf16 %v3932_v27, %v3929_v61  ;;  %v3934_v61 = vld [vmem:[%s8386_s1 + $0x480] sm:$0xff]  ;;  %v3937_v27 = vld [vmem:[%s8386_s1 + $0x498] sm:$0xff] }
  0x6f   : > { %4380 = vmatprep.subr.bf16.mxu0 %v6138_v59  ;;  %8571 = vst [vmem:[#allocation46_spill] sm:$0xff] %v6179_v21  ;;  %v3938_v59 = vld [vmem:[%s8386_s1 + $0x4a0] sm:$0xff] }
  0x70   : > { %4416 = vmatpush1.bf16.msra.mxu1 %v6147_v31  ;;  %v6209_v31 = vpack.c.bf16 %v3933_v24, %v3930_v33  ;;  %8574 = vst [vmem:[#allocation48_spill] sm:$0xff] %v6221_v62  ;;  %v3936_v33 = vld [vmem:[%s8386_s1 + $0x490] sm:$0xff]  ;;  %v3939_v24 = vld [vmem:[%s8386_s1 + $0x4a8] sm:$0xff] }
  0x71   : > { %4417 = vmatprep.subr.bf16.mxu1 %v8538_v11 }
  0x72   : > { %4382 = vmatpush1.bf16.msra.mxu0 %v6163_v43  ;;  %8573 = vst [vmem:[#allocation47_spill] sm:$0xff] %v6209_v31  ;;  %v3935_v43 = vld [vmem:[%s8386_s1 + $0x488] sm:$0xff] }
  0x73   : > { %4384 = vmatprep.subr.bf16.mxu0 %v6166_v12  ;;  %v3931_v12 = vld [vmem:[%s8386_s1 + $0x468] sm:$0xff] }
  0x74   : > { %4419 = vmatpush1.bf16.msra.mxu1 %v6175_v25  ;;  %v3928_v25 = vld [vmem:[%s8386_s1 + $0x450] sm:$0xff] }
  0x75   : > { %1072 = vmatprep.subr.mxu1 %v8572_v7 }
  0x76   : > { %4386 = vmatpush1.bf16.msra.mxu0 %v6179_v21  ;;  %v6230_v21 = vpack.c.bf16 %v3931_v12, %v3928_v25  ;;  %v6248_v25 = vpack.c.bf16 %v3939_v24, %v3936_v33  ;;  %v3945_v12 = vld [vmem:[%s8386_s1 + $0x4d8] sm:$0xff]  ;;  %v6266_v33 = vpack.c.bf16 %v3937_v27, %v3934_v61  ;;  %v3947_v27 = vld [vmem:[%s8386_s1 + $0x4e8] sm:$0xff] }
  0x77   : > { %3921 = vmatprep.subr.msk.mxu0 %vm776_vm13, %v687_v58  ;;  %v6234_v58 = vpack.c.bf16 %v3938_v59, %v3935_v43  ;;  %v3941_v59 = vld [vmem:[%s8386_s1 + $0x4b8] sm:$0xff]  ;;  %v3944_v43 = vld [vmem:[%s8386_s1 + $0x4d0] sm:$0xff] }
  0x78   : > { %3925 = vmatpush1.msk.msra.mxu1 %vm776_vm13, %v688_v4  ;;  %8575 = vst [vmem:[#allocation49_spill] sm:$0xff] %v6230_v21  ;;  %v6244_v4 = vrot.slane %v5742_v54, 2  ;;  %8577 = vst [vmem:[#allocation51_spill] sm:$0xff] %v6248_v25  ;;  %v6269_v24 = vpack.c.bf16 %v3944_v43, %v3941_v59  ;;  %v3950_v59 = vld [vmem:[%s8386_s1 + $0x500] sm:$0xff]  ;;  %v3951_v43 = vld [vmem:[%s8386_s1 + $0x508] sm:$0xff] }
  0x79   : > { %4464 = vmatprep.subr.bf16.mxu1 %v8538_v11  ;;  %1093 = vmatmul.mubr.f32.vlgmr.msra.gmra.mrb[4].mxu1 %v5803_v49  ;;  %8576 = vst [vmem:[#allocation50_spill] sm:$0xff] %v6234_v58  ;;  %8578 = vst [vmem:[#allocation52_spill] sm:$0xff] %v6266_v33 }
  0x7a   : > { %3922 = vmatpush1.msk.msra.mxu0 %vm776_vm13, %v686_v8  ;;  %4466 = vmatpush1.bf16.msra.mxu1 %v6209_v31  ;;  %v3942_v8 = vld [vmem:[%s8386_s1 + $0x4c0] sm:$0xff]  ;;  %8579 = vst [vmem:[#allocation53_spill] sm:$0xff] %v6269_v24  ;;  %v3940_v31 = vld [vmem:[%s8386_s1 + $0x4b0] sm:$0xff] }
  0x7b   : > { %4421 = vmatprep.subr.bf16.mxu0 %v6221_v62  ;;  %1016 = vmatmul.mubr.f32.vlgmr.msra.gmra.mrb[0].mxu0 %v5803_v49  ;;  %v3943_v62 = vld [vmem:[%s8386_s1 + $0x4c8] sm:$0xff]  ;;  %v6282_v61 = vpack.c.bf16 %v3945_v12, %v3942_v8  ;;  %v6305_v12 = vpack.c.bf16 %v3950_v59, %v3947_v27  ;;  %v3956_v27 = vld [vmem:[%s8386_s1 + $0x530] sm:$0xff]  ;;  %v3954_v59 = vld [vmem:[%s8386_s1 + $0x520] sm:$0xff] }
  0x7c   : > { %4423 = vmatpush1.bf16.msra.mxu0 %v6230_v21  ;;  %4467 = vmatprep.subr.bf16.mxu1 %v8538_v11  ;;  %v1179_v21 = vsel %vm1173_vm14, %v1177_v36, %v6244_v4  ;;  %v3948_v36 = vld [vmem:[%s8386_s1 + $0x4f0] sm:$0xff]  ;;  %v6301_v8 = vpack.c.bf16 %v3943_v62, %v3940_v31  ;;  %v3953_v31 = vld [vmem:[%s8386_s1 + $0x518] sm:$0xff] }
  0x7d   : > { %4425 = vmatprep.subr.bf16.mxu0 %v6234_v58  ;;  %3927 = vmatprep.mubr.msk.f32.mxu1 %vm611_vm4, %v5742_v54  ;;  %8580 = vst [vmem:[#allocation54_spill] sm:$0xff] %v6282_v61  ;;  %8582 = vst [vmem:[#allocation56_spill] sm:$0xff] %v6305_v12  ;;  %v3949_v58 = vld [vmem:[%s8386_s1 + $0x4f8] sm:$0xff]  ;;  %v6315_v62 = vpack.c.bf16 %v3951_v43, %v3948_v36 }
  0x7e   : > { %4469 = vmatpush1.bf16.msra.mxu1 %v6248_v25  ;;  %3924 = vmatprep.mubr.msk.f32.mxu0 %vm611_vm4, %v5742_v54  ;;  %8581 = vst [vmem:[#allocation55_spill] sm:$0xff] %v6301_v8  ;;  %v3946_v25 = vld [vmem:[%s8386_s1 + $0x4e0] sm:$0xff]  ;;  %v3957_v36 = vld [vmem:[%s8386_s1 + $0x538] sm:$0xff] }
  0x7f   : > { %4470 = vmatprep.subr.bf16.mxu1 %v8538_v11  ;;  %1098 = vmatmul.mubr.f32.gmra.mrb[6].mxu1 %v5805_v51  ;;  %8583 = vst [vmem:[#allocation57_spill] sm:$0xff] %v6315_v62  ;;  %v6332_v43 = vpack.c.bf16 %v3949_v58, %v3946_v25  ;;  %v3959_v58 = vld [vmem:[%s8386_s1 + $0x548] sm:$0xff]  ;;  %v3962_v25 = vld [vmem:[%s8386_s1 + $0x560] sm:$0xff] }
  0x80   : > { %4427 = vmatpush1.bf16.msra.mxu0 %v6266_v33  ;;  %4002 = vmatprep.mubr.msk.f32.mxu1 %vm611_vm4, %v1179_v21  ;;  %v6344_v33 = vpack.c.bf16 %v3957_v36, %v3954_v59  ;;  %v6363_v36 = vpack.c.bf16 %v3962_v25, %v3959_v58  ;;  %v3966_v58 = vld [vmem:[%s8386_s1 + $0x580] sm:$0xff]  ;;  %v3969_v25 = vld [vmem:[%s8386_s1 + $0x598] sm:$0xff] }
  0x81   : > { %4429 = vmatprep.subr.bf16.mxu0 %v6269_v24  ;;  %1022 = vmatmul.mubr.f32.gmra.mrb[2].mxu0 %v5805_v51  ;;  %8584 = vst [vmem:[#allocation58_spill] sm:$0xff] %v6332_v43  ;;  %v3955_v24 = vld [vmem:[%s8386_s1 + $0x528] sm:$0xff] }
  0x82   : > { %4472 = vmatpush1.bf16.msra.mxu1 %v6282_v61  ;;  %3999 = vmatprep.mubr.msk.f32.mxu0 %vm611_vm4, %v1179_v21  ;;  %v6335_v61 = vpack.c.bf16 %v3956_v27, %v3953_v31  ;;  %v3952_v21 = vld [vmem:[%s8386_s1 + $0x510] sm:$0xff]  ;;  %8586 = vst [vmem:[#allocation60_spill] sm:$0xff] %v6344_v33  ;;  %v3963_v27 = vld [vmem:[%s8386_s1 + $0x568] sm:$0xff]  ;;  %8588 = vst [vmem:[#allocation62_spill] sm:$0xff] %v6363_v36 }
  0x83   : > { %4473 = vmatprep.subr.bf16.mxu1 %v8538_v11  ;;  %v3960_v31 = vld [vmem:[%s8386_s1 + $0x550] sm:$0xff]  ;;  %v6360_v59 = vpack.c.bf16 %v3955_v24, %v3952_v21  ;;  %v3965_v24 = vld [vmem:[%s8386_s1 + $0x578] sm:$0xff] }
  0x84   : > { %4431 = vmatpush1.bf16.msra.mxu0 %v6301_v8  ;;  %8585 = vst [vmem:[#allocation59_spill] sm:$0xff] %v6335_v61  ;;  %v6372_v8 = vpack.c.bf16 %v3963_v27, %v3960_v31  ;;  %v3968_v21 = vld [vmem:[%s8386_s1 + $0x590] sm:$0xff] }
  0x85   : > { %4433 = vmatprep.subr.bf16.mxu0 %v6305_v12  ;;  %8587 = vst [vmem:[#allocation61_spill] sm:$0xff] %v6360_v59  ;;  %v3961_v12 = vld [vmem:[%s8386_s1 + $0x558] sm:$0xff]  ;;  %v6391_v27 = vpack.c.bf16 %v3968_v21, %v3965_v24  ;;  %v3972_v24 = vld [vmem:[%s8386_s1 + $0x5b0] sm:$0xff]  ;;  %v3975_v21 = vld [vmem:[%s8386_s1 + $0x5c8] sm:$0xff] }
  0x86   : > { %4475 = vmatpush1.bf16.msra.mxu1 %v6315_v62  ;;  %v3958_v62 = vld [vmem:[%s8386_s1 + $0x540] sm:$0xff]  ;;  %8589 = vst [vmem:[#allocation63_spill] sm:$0xff] %v6372_v8 }
  0x87   : > { %4476 = vmatprep.subr.bf16.mxu1 %v8538_v11  ;;  %v6388_v31 = vpack.c.bf16 %v3961_v12, %v3958_v62  ;;  %8591 = vst [vmem:[#allocation65_spill] sm:$0xff] %v6391_v27  ;;  %v3971_v12 = vld [vmem:[%s8386_s1 + $0x5a8] sm:$0xff]  ;;  %v3974_v62 = vld [vmem:[%s8386_s1 + $0x5c0] sm:$0xff] }
  0x88   : > { %4435 = vmatpush1.bf16.msra.mxu0 %v6332_v43  ;;  %v6400_v43 = vpack.c.bf16 %v3969_v25, %v3966_v58  ;;  %v6419_v25 = vpack.c.bf16 %v3974_v62, %v3971_v12  ;;  %v3978_v12 = vld [vmem:[%s8386_s1 + $0x5e0] sm:$0xff]  ;;  %v3981_v62 = vld [vmem:[%s8386_s1 + $0x5f8] sm:$0xff] }
  0x89   : > { %4437 = vmatprep.subr.bf16.mxu0 %v6335_v61  ;;  %8590 = vst [vmem:[#allocation64_spill] sm:$0xff] %v6388_v31  ;;  %v3967_v61 = vld [vmem:[%s8386_s1 + $0x588] sm:$0xff] }
  0x8a   : > { %4478 = vmatpush1.bf16.msra.mxu1 %v6344_v33  ;;  %v3964_v33 = vld [vmem:[%s8386_s1 + $0x570] sm:$0xff]  ;;  %8592 = vst [vmem:[#allocation66_spill] sm:$0xff] %v6400_v43  ;;  %8594 = vst [vmem:[#allocation68_spill] sm:$0xff] %v6419_v25 }
  0x8b   : > { %4479 = vmatprep.subr.bf16.mxu1 %v8538_v11  ;;  %v6416_v58 = vpack.c.bf16 %v3967_v61, %v3964_v33  ;;  %v3977_v33 = vld [vmem:[%s8386_s1 + $0x5d8] sm:$0xff]  ;;  %v3980_v61 = vld [vmem:[%s8386_s1 + $0x5f0] sm:$0xff] }
  0x8c   : > { %4439 = vmatpush1.bf16.msra.mxu0 %v6360_v59  ;;  %v6428_v59 = vpack.c.bf16 %v3975_v21, %v3972_v24  ;;  %v6447_v21 = vpack.c.bf16 %v3980_v61, %v3977_v33  ;;  %v3984_v33 = vld [vmem:[%s8386_s1 + $0x610] sm:$0xff]  ;;  %v3987_v61 = vld [vmem:[%s8386_s1 + $0x628] sm:$0xff] }
  0x8d   : > { %4441 = vmatprep.subr.bf16.mxu0 %v6363_v36  ;;  %8593 = vst [vmem:[#allocation67_spill] sm:$0xff] %v6416_v58  ;;  %v3973_v36 = vld [vmem:[%s8386_s1 + $0x5b8] sm:$0xff] }
  0x8e   : > { %4481 = vmatpush1.bf16.msra.mxu1 %v6372_v8  ;;  %v3970_v8 = vld [vmem:[%s8386_s1 + $0x5a0] sm:$0xff]  ;;  %8595 = vst [vmem:[#allocation69_spill] sm:$0xff] %v6428_v59  ;;  %8597 = vst [vmem:[#allocation71_spill] sm:$0xff] %v6447_v21 }
  0x8f   : > { %4482 = vmatprep.subr.bf16.mxu1 %v8538_v11  ;;  %v6444_v24 = vpack.c.bf16 %v3973_v36, %v3970_v8  ;;  %v3983_v8 = vld [vmem:[%s8386_s1 + $0x608] sm:$0xff]  ;;  %v3986_v36 = vld [vmem:[%s8386_s1 + $0x620] sm:$0xff] }
  0x90   : > { %4443 = vmatpush1.bf16.msra.mxu0 %v6388_v31  ;;  %v6456_v31 = vpack.c.bf16 %v3981_v62, %v3978_v12  ;;  %v6475_v62 = vpack.c.bf16 %v3986_v36, %v3983_v8  ;;  %v3990_v8 = vld [vmem:[%s8386_s1 + $0x640] sm:$0xff]  ;;  %v3993_v36 = vld [vmem:[%s8386_s1 + $0x658] sm:$0xff] }
  0x91   : > { %4445 = vmatprep.subr.bf16.mxu0 %v6391_v27  ;;  %8596 = vst [vmem:[#allocation70_spill] sm:$0xff] %v6444_v24  ;;  %v3979_v27 = vld [vmem:[%s8386_s1 + $0x5e8] sm:$0xff] }
  0x92   : > { %4484 = vmatpush1.bf16.msra.mxu1 %v6400_v43  ;;  %v3976_v43 = vld [vmem:[%s8386_s1 + $0x5d0] sm:$0xff]  ;;  %8598 = vst [vmem:[#allocation72_spill] sm:$0xff] %v6456_v31  ;;  %8600 = vst [vmem:[#allocation74_spill] sm:$0xff] %v6475_v62 }
  0x93   : > { %4485 = vmatprep.subr.bf16.mxu1 %v8538_v11  ;;  %v6472_v12 = vpack.c.bf16 %v3979_v27, %v3976_v43  ;;  %v3989_v43 = vld [vmem:[%s8386_s1 + $0x638] sm:$0xff]  ;;  %v3992_v27 = vld [vmem:[%s8386_s1 + $0x650] sm:$0xff] }
  0x94   : > { %4447 = vmatpush1.bf16.msra.mxu0 %v6416_v58  ;;  %v6484_v58 = vpack.c.bf16 %v3987_v61, %v3984_v33  ;;  %v6503_v61 = vpack.c.bf16 %v3992_v27, %v3989_v43  ;;  %v6520_v43 = vrot.slane %v5805_v51, 2  ;;  %v4006_v27 = vld [vmem:[%s8386_s1 + $0x688] sm:$0xff] }
  0x95   : > { %4449 = vmatprep.subr.bf16.mxu0 %v6419_v25  ;;  %8599 = vst [vmem:[#allocation73_spill] sm:$0xff] %v6472_v12  ;;  %v3985_v25 = vld [vmem:[%s8386_s1 + $0x618] sm:$0xff] }
  0x96   : > { %4487 = vmatpush1.bf16.msra.mxu1 %v6428_v59  ;;  %v3982_v59 = vld [vmem:[%s8386_s1 + $0x600] sm:$0xff]  ;;  %8601 = vst [vmem:[#allocation75_spill] sm:$0xff] %v6484_v58  ;;  %8603 = vst [vmem:[#allocation77_spill] sm:$0xff] %v6503_v61 }
  0x97   : > { %4488 = vmatprep.subr.bf16.mxu1 %v8538_v11  ;;  %v6500_v33 = vpack.c.bf16 %v3985_v25, %v3982_v59  ;;  %v1174_v25 = vrot.slane %v5803_v49, 2 }
  0x98   : > { %4451 = vmatpush1.bf16.msra.mxu0 %v6444_v24  ;;  %v6512_v24 = vpack.c.bf16 %v3993_v36, %v3990_v8  ;;  %v4009_v8 = vld [vmem:[%s8386_s1 + $0x6a0] sm:$0xff]  ;;  %v4008_v36 = vld [vmem:[%s8386_s1 + $0x698] sm:$0xff] }
  0x99   : > { %4453 = vmatprep.subr.bf16.mxu0 %v6447_v21  ;;  %8602 = vst [vmem:[#allocation76_spill] sm:$0xff] %v6500_v33  ;;  %v3991_v21 = vld [vmem:[%s8386_s1 + $0x648] sm:$0xff]  ;;  %v1176_v26 = vsel %vm1173_vm14, %v1174_v25, %v6520_v43  ;;  %v6554_v3 = vpack.c.bf16 %v4009_v8, %v4006_v27  ;;  %v4012_v25 = vld [vmem:[%s8386_s1 + $0x6b8] sm:$0xff]  ;;  %v4015_v27 = vld [vmem:[%s8386_s1 + $0x6d0] sm:$0xff] }
  0x9a   : > { %4490 = vmatpush1.bf16.msra.mxu1 %v6456_v31  ;;  %v3988_v31 = vld [vmem:[%s8386_s1 + $0x630] sm:$0xff]  ;;  %8604 = vst [vmem:[#allocation78_spill] sm:$0xff] %v6512_v24 }
  0x9b   : > { %4491 = vmatprep.subr.bf16.mxu1 %v8538_v11  ;;  %v6516_v59 = vpack.c.bf16 %v3991_v21, %v3988_v31  ;;  %v3995_v31 = vld [vmem:[%s8386_s1 + $0x668] sm:$0xf]  ;;  %v4005_v21 = vld [vmem:[%s8386_s1 + $0x680] sm:$0xff] }
  0x9c   : > { %4455 = vmatpush1.bf16.msra.mxu0 %v6472_v12  ;;  %v4007_v12 = vld [vmem:[%s8386_s1 + $0x690] sm:$0xff] }
  0x9d   : > { %4457 = vmatprep.subr.bf16.mxu0 %v6475_v62  ;;  %8605 = vst [vmem:[#allocation79_spill] sm:$0xff] %v6516_v59  ;;  %v4004_v62 = vld [vmem:[%s8386_s1 + $0x678] sm:$0xff] }
  0x9e   : > { %4493 = vmatpush1.bf16.msra.mxu1 %v6484_v58  ;;  %v537_v58 = vld [vmem:[#allocation2 + $0x38] sm:$0x7f]  ;;  %v6575_v8 = vpack.c.bf16 %v4007_v12, %v4004_v62 }
  0x9f   : > { %4494 = vmatprep.subr.bf16.mxu1 %v8538_v11  ;;  %v553_v12 = vadd.f32 %v545_v6, %v537_v58  ;;  %v4020_v62 = vld [vmem:[%s8386_s1 + $0x6f8] sm:$0xff]  ;;  %v4021_v6 = vld [vmem:[%s8386_s1 + $0x700] sm:$0xff] }
  0xa0   : > { %4459 = vmatpush1.bf16.msra.mxu0 %v6500_v33  ;;  %v543_v33 = vld [vmem:[%s5471_s28 + $0x28] sm:$0xff] }
  0xa1   : > { %4461 = vmatprep.subr.bf16.mxu0 %v6503_v61  ;;  %v535_v61 = vld [vmem:[#allocation2 + $0x28] sm:$0xff] }
  0xa2   : > { %4496 = vmatpush1.bf16.msra.mxu1 %v6512_v24  ;;  %v3996_v24 = vld [vmem:[%s8386_s1 + $0x670] sm:$0xf] }
  0xa3   : > { %1316 = vmatprep.subr.mxu1 %v8572_v7 }
  0xa4   : > { %4463 = vmatpush1.bf16.msra.mxu0 %v6516_v59  ;;  %v6566_v59 = vpack.c.bf16 %v4008_v36, %v4005_v21  ;;  %v4010_v21 = vld [vmem:[%s8386_s1 + $0x6a8] sm:$0xff]  ;;  %v4013_v36 = vld [vmem:[%s8386_s1 + $0x6c0] sm:$0xff] }
  0xa5   : > { %3997 = vmatprep.subr.msk.mxu0 %vm776_vm13, %v3995_v31  ;;  %v6578_v31 = vpack.c.bf16 %v4014_v42, %v4011_v40  ;;  %v6592_v42 = vpack.c.bf16 %v4015_v27, %v4012_v25  ;;  %v4017_v40 = vld [vmem:[%s8386_s1 + $0x6e0] sm:$0xff]  ;;  %v6609_v58 = vpack.c.bf16 %v4013_v36, %v4010_v21  ;;  %v1429_v25 = vsel %vm1423_vm15, %v1427_v17, %v6588_v13 }
  0xa6   : > { %4001 = vmatpush1.msk.msra.mxu1 %vm776_vm13, %v3996_v24  ;;  %v551_v24 = vadd.f32 %v543_v33, %v535_v61  ;;  %v6612_v33 = vpack.c.bf16 %v4020_v62, %v4017_v40  ;;  %v4019_v61 = vld [vmem:[%s8386_s1 + $0x6f0] sm:$0xff]  ;;  %v565_v21 = vsub.f32 %v553_v12, %v5722_v34  ;;  %v4026_v62 = vld [vmem:[%s8386_s1 + $0x728] sm:$0xff] }
  0xa7   : > { %4541 = vmatprep.subr.bf16.mxu1 %v8538_v11  ;;  %1337 = vmatmul.mubr.f32.vlgmr.msra.gmra.mrb[8].mxu1 %v1176_v26  ;;  %v4023_v40 = vld [vmem:[%s8386_s1 + $0x710] sm:$0xff] }
  0xa8   : > { %3998 = vmatpush1.msk.msra.mxu0 %vm776_vm13, %v3994_v37  ;;  %4543 = vmatpush1.bf16.msra.mxu1 %v6554_v3  ;;  %v4018_v37 = vld [vmem:[%s8386_s1 + $0x6e8] sm:$0xff]  ;;  %8606 = vst [vmem:[#allocation80_spill] sm:$0xff] %v6612_v33  ;;  %v563_v27 = vsub.f32 %v551_v24, %v5711_v28  ;;  %v4024_v28 = vld [vmem:[%s8386_s1 + $0x718] sm:$0xff]  ;;  %v4027_v34 = vld [vmem:[%s8386_s1 + $0x730] sm:$0xff] }
  0xa9   : > { %4498 = vmatprep.subr.bf16.mxu0 %v6566_v59  ;;  %1260 = vmatmul.mubr.f32.vlgmr.msra.gmra.mrb[0].mxu0 %v1176_v26  ;;  %v4016_v26 = vld [vmem:[%s8386_s1 + $0x6d8] sm:$0xff]  ;;  %v6627_v36 = vpack.c.bf16 %v4021_v6, %v4018_v37  ;;  %v4022_v37 = vld [vmem:[%s8386_s1 + $0x708] sm:$0xff]  ;;  %v4025_v6 = vld [vmem:[%s8386_s1 + $0x720] sm:$0xff] }
  0xaa   : > { %4500 = vmatpush1.bf16.msra.mxu0 %v6575_v8  ;;  %4544 = vmatprep.subr.bf16.mxu1 %v8538_v11  ;;  %v6646_v17 = vpack.c.bf16 %v4019_v61, %v4016_v26  ;;  %v6660_v26 = vpack.c.bf16 %v4027_v34, %v4024_v28  ;;  %v4029_v61 = vld [vmem:[%s8386_s1 + $0x740] sm:$0xff]  ;;  %v6681_v34 = vpack.c.bf16 %v4025_v6, %v4022_v37  ;;  %v4035_v6 = vld [vmem:[%s8386_s1 + $0x770] sm:$0xff] }
  0xab   : > { %4502 = vmatprep.subr.bf16.mxu0 %v6578_v31  ;;  %4003 = vmatprep.mubr.msk.f32.mxu1 %vm611_vm4, %v6244_v4  ;;  %8607 = vst [vmem:[#allocation81_spill] sm:$0xff] %v6627_v36  ;;  %v4033_v28 = vld [vmem:[%s8386_s1 + $0x760] sm:$0xff] }
  0xac   : > { %4546 = vmatpush1.bf16.msra.mxu1 %v6592_v42  ;;  %4000 = vmatprep.mubr.msk.f32.mxu0 %vm611_vm4, %v6244_v4  ;;  %8608 = vst [vmem:[#allocation82_spill] sm:$0xff] %v6646_v17  ;;  %v6650_v4 = vpack.c.bf16 %v4026_v62, %v4023_v40  ;;  %8610 = vst [vmem:[#allocation84_spill] sm:$0xff] %v6660_v26  ;;  %v4032_v40 = vld [vmem:[%s8386_s1 + $0x758] sm:$0xff]  ;;  %v6669_v62 = vmax.f32 %v563_v27, 0.0 }
  0xad   : > { %4547 = vmatprep.subr.bf16.mxu1 %v8538_v11  ;;  %1342 = vmatmul.mubr.f32.gmra.mrb[10].mxu1 %v6520_v43  ;;  %8611 = vst [vmem:[#allocation85_spill] sm:$0xff] %v6681_v34  ;;  %v4028_v27 = vld [vmem:[%s8386_s1 + $0x738] sm:$0xff] }
  0xae   : > { %4504 = vmatpush1.bf16.msra.mxu0 %v6609_v58  ;;  %4078 = vmatprep.mubr.msk.f32.mxu1 %vm611_vm4, %v1429_v25  ;;  %8609 = vst [vmem:[#allocation83_spill] sm:$0xff] %v6650_v4  ;;  %vm579_vm0 = vcmp.eq.f32.partialorder %v6669_v62, 0.0 }
  0xaf   : > { %4506 = vmatprep.subr.bf16.mxu0 %v6612_v33  ;;  %1266 = vmatmul.mubr.f32.gmra.mrb[2].mxu0 %v6520_v43  ;;  %v6671_v33 = vmax.f32 %v565_v21, 0.0  ;;  %v4030_v43 = vld [vmem:[%s8386_s1 + $0x748] sm:$0xff]  ;;  %v4031_v21 = vld [vmem:[%s8386_s1 + $0x750] sm:$0xff] }
  0xb0   : > { %4549 = vmatpush1.bf16.msra.mxu1 %v6627_v36  ;;  %4075 = vmatprep.mubr.msk.f32.mxu0 %vm611_vm4, %v1429_v25  ;;  %v6686_v25 = vpack.c.bf16 %v4032_v40, %v4029_v61  ;;  %v587_v36 = vsel %vm579_vm0, %v551_v24, 0.0  ;;  %v6695_v37 = vpack.c.bf16 %v4033_v28, %v4030_v43  ;;  %v4038_v61 = vld [vmem:[%s8386_s1 + $0x788] sm:$0xff]  ;;  %v4036_v24 = vld [vmem:[%s8386_s1 + $0x778] sm:$0xff]  ;;  %v6713_v43 = vpack.c.bf16 %v4031_v21, %v4028_v27 }
  0xb1   : > { %4550 = vmatprep.subr.bf16.mxu1 %v8538_v11  ;;  %vm581_vm1 = vcmp.eq.f32.partialorder %v6671_v33, 0.0  ;;  %v599_v40 = vmul.f32 %v5756_v1, %v587_v36  ;;  %v6716_v1 = vpack.c.bf16 %v4038_v61, %v4035_v6  ;;  %v4037_v36 = vld [vmem:[%s8386_s1 + $0x780] sm:$0xff]  ;;  %v4044_v27 = vld [vmem:[%s8386_s1 + $0x7b8] sm:$0xff]  ;;  %v4042_v21 = vld [vmem:[%s8386_s1 + $0x7a8] sm:$0xff]  ;;  %vm3135_vm0 = vcmask 178176  }
  0xb2   : > { %4508 = vmatpush1.bf16.msra.mxu0 %v6646_v17  ;;  %8612 = vst [vmem:[#allocation86_spill] sm:$0xff] %v6686_v25  ;;  %v589_v17 = vsel %vm581_vm1, %v553_v12, 0.0  ;;  %8613 = vst [vmem:[#allocation87_spill] sm:$0xff] %v6695_v37  ;;  %v4039_v12 = vld [vmem:[%s8386_s1 + $0x790] sm:$0xff]  ;;  %v4045_v6 = vld [vmem:[%s8386_s1 + $0x7c0] sm:$0xff]  ;;  %vm3239_vm1 = vcmask 405504  }
  0xb3   : > { %4510 = vmatprep.subr.bf16.mxu0 %v6650_v4  ;;  %v601_v4 = vmul.f32 %v5761_v2, %v589_v17  ;;  %8614 = vst [vmem:[#allocation88_spill] sm:$0xff] %v6713_v43  ;;  %v607_v28 = vmax.f32 %v599_v40, 0.0  ;;  %8615 = vst [vmem:[#allocation89_spill] sm:$0xff] %v6716_v1  ;;  %v4034_v2 = vld [vmem:[%s8386_s1 + $0x768] sm:$0xff]  ;;  %v6725_v17 = vpack.c.bf16 %v4039_v12, %v4036_v24  ;;  %v4043_v24 = vld [vmem:[%s8386_s1 + $0x7b0] sm:$0xff] }
  0xb4   : > { %4552 = vmatpush1.bf16.msra.mxu1 %v6660_v26  ;;  %v6743_v61 = vpack.c.bf16 %v4037_v36, %v4034_v2  ;;  %v6755_v12 = vpack.c.bf16 %v4045_v6, %v4042_v21  ;;  %v4050_v2 = vld [vmem:[%s8386_s1 + $0x7e8] sm:$0xff]  ;;  %v4048_v36 = vld [vmem:[%s8386_s1 + $0x7d8] sm:$0xff] }
  0xb5   : > { %4553 = vmatprep.subr.bf16.mxu1 %v8538_v11  ;;  %v609_v26 = vmax.f32 %v601_v4, 0.0  ;;  %8616 = vst [vmem:[#allocation90_spill] sm:$0xff] %v6725_v17  ;;  %v4041_v4 = vld [vmem:[%s8386_s1 + $0x7a0] sm:$0xff]  ;;  %617 = vst.msk [vmem:[#allocation2 + $0x28] sm:$0xff] %vm611_vm4, %v607_v28  ;;  %v4047_v28 = vld [vmem:[%s8386_s1 + $0x7d0] sm:$0xff] }
  0xb6   : > { %4512 = vmatpush1.bf16.msra.mxu0 %v6681_v34  ;;  %8617 = vst [vmem:[#allocation91_spill] sm:$0xff] %v6743_v61  ;;  %v6746_v40 = vpack.c.bf16 %v4044_v27, %v4041_v4  ;;  %8619 = vst [vmem:[#allocation93_spill] sm:$0xff] %v6755_v12  ;;  %v4051_v4 = vld [vmem:[%s8386_s1 + $0x7f0] sm:$0xff]  ;;  %v6774_v21 = vpack.c.bf16 %v4050_v2, %v4047_v28  ;;  %v4046_v6 = vld [vmem:[%s8386_s1 + $0x7c8] sm:$0xff]  ;;  %v6949_v34 = vrot.slane %v5742_v54, 4 }
  0xb7   : > { %4514 = vmatprep.subr.bf16.mxu0 %v6686_v25  ;;  %619 = vst.msk [vmem:[#allocation2 + $0x38] sm:$0x7f] %vm614_vm8, %v609_v26  ;;  %v4040_v26 = vld [vmem:[%s8386_s1 + $0x798] sm:$0xff]  ;;  %v4054_v28 = vld [vmem:[%s8386_s1 + $0x808] sm:$0xff]  ;;  %v4057_v2 = vld [vmem:[%s8386_s1 + $0x820] sm:$0xff]  ;;  %v1676_v25 = vrot.slane %v5740_v53, 4 }
  0xb8   : > { %4555 = vmatpush1.bf16.msra.mxu1 %v6695_v37  ;;  %8618 = vst [vmem:[#allocation92_spill] sm:$0xff] %v6746_v40  ;;  %v6771_v27 = vpack.c.bf16 %v4043_v24, %v4040_v26  ;;  %8621 = vst [vmem:[#allocation95_spill] sm:$0xff] %v6774_v21  ;;  %v4053_v26 = vld [vmem:[%s8386_s1 + $0x800] sm:$0xff]  ;;  %v4056_v24 = vld [vmem:[%s8386_s1 + $0x818] sm:$0xff]  ;;  %vm1972_vm8 = vcmask 523264  }
  0xb9   : > { %4556 = vmatprep.subr.bf16.mxu1 %v8538_v11  ;;  %v4090_v37 = vld [vmem:[%s8386_s1 + $0x8f0] sm:$0xff]  ;;  %v4095_v53 = vld [vmem:[%s8386_s1 + $0x918] sm:$0xff] }
  0xba   : > { %4516 = vmatpush1.bf16.msra.mxu0 %v6713_v43  ;;  %8620 = vst [vmem:[#allocation94_spill] sm:$0xff] %v6771_v27 }
  0xbb   : > { %4518 = vmatprep.subr.bf16.mxu0 %v6716_v1  ;;  %v6783_v1 = vpack.c.bf16 %v4051_v4, %v4048_v36  ;;  %v6802_v4 = vpack.c.bf16 %v4056_v24, %v4053_v26  ;;  %v4060_v26 = vld [vmem:[%s8386_s1 + $0x838] sm:$0xff]  ;;  %v4063_v24 = vld [vmem:[%s8386_s1 + $0x850] sm:$0xff] }
  0xbc   : > { %4558 = vmatpush1.bf16.msra.mxu1 %v6725_v17  ;;  %v4049_v17 = vld [vmem:[%s8386_s1 + $0x7e0] sm:$0xff] }
  0xbd   : > { %4559 = vmatprep.subr.bf16.mxu1 %v8538_v11  ;;  %8622 = vst [vmem:[#allocation96_spill] sm:$0xff] %v6783_v1  ;;  %v6799_v36 = vpack.c.bf16 %v4049_v17, %v4046_v6  ;;  %8624 = vst [vmem:[#allocation98_spill] sm:$0xff] %v6802_v4  ;;  %v4059_v17 = vld [vmem:[%s8386_s1 + $0x830] sm:$0xff]  ;;  %v4062_v6 = vld [vmem:[%s8386_s1 + $0x848] sm:$0xff] }
  0xbe   : > { %4520 = vmatpush1.bf16.msra.mxu0 %v6743_v61  ;;  %v6811_v61 = vpack.c.bf16 %v4057_v2, %v4054_v28  ;;  %v6830_v2 = vpack.c.bf16 %v4062_v6, %v4059_v17  ;;  %v4066_v17 = vld [vmem:[%s8386_s1 + $0x868] sm:$0xff]  ;;  %v4069_v6 = vld [vmem:[%s8386_s1 + $0x880] sm:$0xff] }
  0xbf   : > { %4522 = vmatprep.subr.bf16.mxu0 %v6746_v40  ;;  %8623 = vst [vmem:[#allocation97_spill] sm:$0xff] %v6799_v36  ;;  %v4055_v40 = vld [vmem:[%s8386_s1 + $0x810] sm:$0xff] }
  0xc0   : > { %4561 = vmatpush1.bf16.msra.mxu1 %v6755_v12  ;;  %v4052_v12 = vld [vmem:[%s8386_s1 + $0x7f8] sm:$0xff]  ;;  %8625 = vst [vmem:[#allocation99_spill] sm:$0xff] %v6811_v61  ;;  %8627 = vst [vmem:[#allocation101_spill] sm:$0xff] %v6830_v2 }
  0xc1   : > { %4562 = vmatprep.subr.bf16.mxu1 %v8538_v11  ;;  %v6827_v28 = vpack.c.bf16 %v4055_v40, %v4052_v12  ;;  %v4065_v40 = vld [vmem:[%s8386_s1 + $0x860] sm:$0xff]  ;;  %v4068_v12 = vld [vmem:[%s8386_s1 + $0x878] sm:$0xff] }
  0xc2   : > { %4524 = vmatpush1.bf16.msra.mxu0 %v6771_v27  ;;  %v6839_v27 = vpack.c.bf16 %v4063_v24, %v4060_v26  ;;  %v6858_v24 = vpack.c.bf16 %v4068_v12, %v4065_v40  ;;  %v6875_v40 = vrot.slane %v5805_v51, 3  ;;  %v4082_v12 = vld [vmem:[%s8386_s1 + $0x8b0] sm:$0xff] }
  0xc3   : > { %4526 = vmatprep.subr.bf16.mxu0 %v6774_v21  ;;  %8626 = vst [vmem:[#allocation100_spill] sm:$0xff] %v6827_v28  ;;  %v4061_v21 = vld [vmem:[%s8386_s1 + $0x840] sm:$0xff] }
  0xc4   : > { %4564 = vmatpush1.bf16.msra.mxu1 %v6783_v1  ;;  %v4058_v1 = vld [vmem:[%s8386_s1 + $0x828] sm:$0xff]  ;;  %8628 = vst [vmem:[#allocation102_spill] sm:$0xff] %v6839_v27  ;;  %8630 = vst [vmem:[#allocation104_spill] sm:$0xff] %v6858_v24 }
  0xc5   : > { %4565 = vmatprep.subr.bf16.mxu1 %v8538_v11  ;;  %v6855_v26 = vpack.c.bf16 %v4061_v21, %v4058_v1  ;;  %v1424_v21 = vrot.slane %v5803_v49, 3 }
  0xc6   : > { %4528 = vmatpush1.bf16.msra.mxu0 %v6799_v36  ;;  %v6867_v36 = vpack.c.bf16 %v4069_v6, %v4066_v17  ;;  %v4085_v17 = vld [vmem:[%s8386_s1 + $0x8c8] sm:$0xff]  ;;  %v4084_v6 = vld [vmem:[%s8386_s1 + $0x8c0] sm:$0xff] }
  0xc7   : > { %4530 = vmatprep.subr.bf16.mxu0 %v6802_v4  ;;  %8629 = vst [vmem:[#allocation103_spill] sm:$0xff] %v6855_v26  ;;  %v4067_v4 = vld [vmem:[%s8386_s1 + $0x870] sm:$0xff] }
  0xc8   : > { %4567 = vmatpush1.bf16.msra.mxu1 %v6811_v61  ;;  %v4064_v61 = vld [vmem:[%s8386_s1 + $0x858] sm:$0xff]  ;;  %8631 = vst [vmem:[#allocation105_spill] sm:$0xff] %v6867_v36 }
  0xc9   : > { %4568 = vmatprep.subr.bf16.mxu1 %v8538_v11  ;;  %v6871_v1 = vpack.c.bf16 %v4067_v4, %v4064_v61  ;;  %v6888_v61 = vld [vmem:[%s8386_s1 + $0x890] sm:$0xf]  ;;  %v4081_v4 = vld [vmem:[%s8386_s1 + $0x8a8] sm:$0xff] }
  0xca   : > { %4532 = vmatpush1.bf16.msra.mxu0 %v6827_v28  ;;  %8633 = vst [vmem:[#allocation107_spill] sm:$0xff] %v6888_v61  ;;  %v4087_v28 = vld [vmem:[%s8386_s1 + $0x8d8] sm:$0xff]  ;;  %v6926_v43 = vpack.c.bf16 %v4084_v6, %v4081_v4  ;;  %v4086_v4 = vld [vmem:[%s8386_s1 + $0x8d0] sm:$0xff]  ;;  %v4089_v6 = vld [vmem:[%s8386_s1 + $0x8e8] sm:$0xff] }
  0xcb   : > { %4534 = vmatprep.subr.bf16.mxu0 %v6830_v2  ;;  %8632 = vst [vmem:[#allocation106_spill] sm:$0xff] %v6871_v1  ;;  %v6911_v2 = vpack.c.bf16 %v4085_v17, %v4082_v12  ;;  %v4091_v12 = vld [vmem:[%s8386_s1 + $0x8f8] sm:$0xff] }
  0xcc   : > { %4570 = vmatpush1.bf16.msra.mxu1 %v6839_v27  ;;  %v4083_v27 = vld [vmem:[%s8386_s1 + $0x8b8] sm:$0xff] }
  0xcd   : > { %4571 = vmatprep.subr.bf16.mxu1 %v8538_v11  ;;  %8634 = vst [vmem:[#allocation108_spill] sm:$0xff] %v6911_v2 }
  0xce   : > { %4536 = vmatpush1.bf16.msra.mxu0 %v6855_v26  ;;  %v1426_v26 = vsel %vm1423_vm15, %v1424_v21, %v6875_v40  ;;  %v4088_v21 = vld [vmem:[%s8386_s1 + $0x8e0] sm:$0xff] }
  0xcf   : > { %4538 = vmatprep.subr.bf16.mxu0 %v6858_v24  ;;  %v6900_v24 = vld [vmem:[%s8386_s1 + $0x898] sm:$0xf] }
  0xd0   : > { %4573 = vmatpush1.bf16.msra.mxu1 %v6867_v36  ;;  %v4080_v36 = vld [vmem:[%s8386_s1 + $0x8a0] sm:$0xff] }
  0xd1   : > { %1566 = vmatprep.subr.mxu1 %v8572_v7  ;;  %v6936_v17 = vpack.c.bf16 %v4083_v27, %v4080_v36  ;;  %v4093_v27 = vld [vmem:[%s8386_s1 + $0x908] sm:$0xff]  ;;  %v4096_v36 = vld [vmem:[%s8386_s1 + $0x920] sm:$0xff] }
  0xd2   : > { %4540 = vmatpush1.bf16.msra.mxu0 %v6871_v1  ;;  %v6924_v1 = vld [vmem:[%s8386_s1 + $0x888] sm:$0xf]  ;;  %v6974_v54 = vpack.c.bf16 %v4096_v36, %v4093_v27  ;;  %v4102_v27 = vld [vmem:[%s8386_s1 + $0x950] sm:$0xff]  ;;  %v4103_v36 = vld [vmem:[%s8386_s1 + $0x958] sm:$0xff] }
  0xd3   : > { %4073 = vmatprep.subr.msk.mxu0 %vm776_vm13, %v6888_v61  ;;  %v6939_v61 = vpack.c.bf16 %v4090_v37, %v4087_v28  ;;  %v6954_v37 = vpack.c.bf16 %v4091_v12, %v4088_v21  ;;  %v4094_v28 = vld [vmem:[%s8386_s1 + $0x910] sm:$0xff]  ;;  %v4097_v21 = vld [vmem:[%s8386_s1 + $0x928] sm:$0xff]  ;;  %v6971_v12 = vpack.c.bf16 %v4089_v6, %v4086_v4  ;;  %v4099_v6 = vld [vmem:[%s8386_s1 + $0x938] sm:$0xff] }
  0xd4   : > { %4077 = vmatpush1.msk.msra.mxu1 %vm776_vm13, %v6900_v24  ;;  %8636 = vst [vmem:[#allocation110_spill] sm:$0xff] %v6974_v54  ;;  %v6987_v4 = vpack.c.bf16 %v4097_v21, %v4094_v28  ;;  %v4098_v21 = vld [vmem:[%s8386_s1 + $0x930] sm:$0xff] }
  0xd5   : > { %1587 = vmatmul.mubr.f32.vlgmr.msra.gmra.mrb[12].mxu1 %v1426_v26  ;;  %4618 = vmatprep.subr.bf16.mxu1 %v8538_v11  ;;  %8635 = vst [vmem:[#allocation109_spill] sm:$0xff] %v6954_v37 }
  0xd6   : > { %4074 = vmatpush1.msk.msra.mxu0 %vm776_vm13, %v6924_v1  ;;  %4620 = vmatpush1.bf16.msra.mxu1 %v6911_v2  ;;  %v1678_v2 = vsel %vm776_vm13, %v1676_v25, %v6949_v34  ;;  %8637 = vst [vmem:[#allocation111_spill] sm:$0xff] %v6987_v4  ;;  %v4100_v25 = vld [vmem:[%s8386_s1 + $0x940] sm:$0xff] }
  0xd7   : > { %4575 = vmatprep.subr.bf16.mxu0 %v6926_v43  ;;  %1510 = vmatmul.mubr.f32.vlgmr.msra.gmra.mrb[0].mxu0 %v1426_v26  ;;  %v4092_v26 = vld [vmem:[%s8386_s1 + $0x900] sm:$0xff] }
  0xd8   : > { %4577 = vmatpush1.bf16.msra.mxu0 %v6936_v17  ;;  %4621 = vmatprep.subr.bf16.mxu1 %v8538_v11  ;;  %v7006_v28 = vpack.c.bf16 %v4095_v53, %v4092_v26  ;;  %v7020_v53 = vpack.c.bf16 %v4103_v36, %v4100_v25  ;;  %v4105_v26 = vld [vmem:[%s8386_s1 + $0x968] sm:$0xff] }
  0xd9   : > { %4579 = vmatprep.subr.bf16.mxu0 %v6939_v61  ;;  %4079 = vmatprep.mubr.msk.f32.mxu1 %vm611_vm4, %v6588_v13 }
  0xda   : > { %4623 = vmatpush1.bf16.msra.mxu1 %v6954_v37  ;;  %4076 = vmatprep.mubr.msk.f32.mxu0 %vm611_vm4, %v6588_v13  ;;  %8638 = vst [vmem:[#allocation112_spill] sm:$0xff] %v7006_v28  ;;  %v7010_v13 = vpack.c.bf16 %v4102_v27, %v4099_v6  ;;  %v4101_v37 = vld [vmem:[%s8386_s1 + $0x948] sm:$0xff]  ;;  %8640 = vst [vmem:[#allocation114_spill] sm:$0xff] %v7020_v53  ;;  %v4108_v6 = vld [vmem:[%s8386_s1 + $0x980] sm:$0xff] }
  0xdb   : > { %4624 = vmatprep.subr.bf16.mxu1 %v8538_v11  ;;  %1592 = vmatmul.mubr.f32.gmra.mrb[14].mxu1 %v6875_v40  ;;  %v4109_v27 = vld [vmem:[%s8386_s1 + $0x988] sm:$0xff]  ;;  %v7037_v25 = vpack.c.bf16 %v4101_v37, %v4098_v21  ;;  %v7040_v36 = vpack.c.bf16 %v4108_v6, %v4105_v26  ;;  %v4111_v37 = vld [vmem:[%s8386_s1 + $0x998] sm:$0xff]  ;;  %v4114_v21 = vld [vmem:[%s8386_s1 + $0x9b0] sm:$0xff] }
  0xdc   : > { %4581 = vmatpush1.bf16.msra.mxu0 %v6971_v12  ;;  %4154 = vmatprep.mubr.msk.f32.mxu1 %vm611_vm4, %v1678_v2  ;;  %8639 = vst [vmem:[#allocation113_spill] sm:$0xff] %v7010_v13  ;;  %v4112_v26 = vld [vmem:[%s8386_s1 + $0x9a0] sm:$0xff]  ;;  %v4115_v6 = vld [vmem:[%s8386_s1 + $0x9b8] sm:$0xff] }
  0xdd   : > { %4583 = vmatprep.subr.bf16.mxu0 %v6974_v54  ;;  %1516 = vmatmul.mubr.f32.gmra.mrb[2].mxu0 %v6875_v40  ;;  %v4106_v40 = vld [vmem:[%s8386_s1 + $0x970] sm:$0xff]  ;;  %8641 = vst [vmem:[#allocation115_spill] sm:$0xff] %v7037_v25  ;;  %8642 = vst [vmem:[#allocation116_spill] sm:$0xff] %v7040_v36 }
  0xde   : > { %4626 = vmatpush1.bf16.msra.mxu1 %v6987_v4  ;;  %4151 = vmatprep.mubr.msk.f32.mxu0 %vm611_vm4, %v1678_v2  ;;  %v4104_v2 = vld [vmem:[%s8386_s1 + $0x960] sm:$0xff]  ;;  %v4107_v4 = vld [vmem:[%s8386_s1 + $0x978] sm:$0xff]  ;;  %v7049_v54 = vpack.c.bf16 %v4109_v27, %v4106_v40  ;;  %v7068_v27 = vpack.c.bf16 %v4114_v21, %v4111_v37  ;;  %v4118_v37 = vld [vmem:[%s8386_s1 + $0x9d0] sm:$0xff] }
  0xdf   : > { %4627 = vmatprep.subr.bf16.mxu1 %v8538_v11  ;;  %v7065_v40 = vpack.c.bf16 %v4107_v4, %v4104_v2  ;;  %v4117_v4 = vld [vmem:[%s8386_s1 + $0x9c8] sm:$0xff]  ;;  %v4120_v2 = vld [vmem:[%s8386_s1 + $0x9e0] sm:$0xff] }
  0xe0   : > { %4585 = vmatpush1.bf16.msra.mxu0 %v7006_v28  ;;  %8643 = vst [vmem:[#allocation117_spill] sm:$0xff] %v7049_v54  ;;  %8645 = vst [vmem:[#allocation119_spill] sm:$0xff] %v7068_v27  ;;  %v7077_v28 = vpack.c.bf16 %v4115_v6, %v4112_v26  ;;  %v4121_v21 = vld [vmem:[%s8386_s1 + $0x9e8] sm:$0xff]  ;;  %v7096_v6 = vpack.c.bf16 %v4120_v2, %v4117_v4  ;;  %v4124_v4 = vld [vmem:[%s8386_s1 + $0xa00] sm:$0xff] }
  0xe1   : > { %4587 = vmatprep.subr.bf16.mxu0 %v7010_v13  ;;  %8644 = vst [vmem:[#allocation118_spill] sm:$0xff] %v7065_v40  ;;  %v4113_v13 = vld [vmem:[%s8386_s1 + $0x9a8] sm:$0xff]  ;;  %v4127_v2 = vld [vmem:[%s8386_s1 + $0xa18] sm:$0xff] }
  0xe2   : > { %4629 = vmatpush1.bf16.msra.mxu1 %v7020_v53  ;;  %v4110_v53 = vld [vmem:[%s8386_s1 + $0x990] sm:$0xff]  ;;  %8646 = vst [vmem:[#allocation120_spill] sm:$0xff] %v7077_v28  ;;  %8648 = vst [vmem:[#allocation122_spill] sm:$0xff] %v7096_v6 }
  0xe3   : > { %4630 = vmatprep.subr.bf16.mxu1 %v8538_v11  ;;  %v7093_v26 = vpack.c.bf16 %v4113_v13, %v4110_v53  ;;  %v4123_v13 = vld [vmem:[%s8386_s1 + $0x9f8] sm:$0xff]  ;;  %v4126_v53 = vld [vmem:[%s8386_s1 + $0xa10] sm:$0xff] }
  0xe4   : > { %4589 = vmatpush1.bf16.msra.mxu0 %v7037_v25  ;;  %v7105_v25 = vpack.c.bf16 %v4121_v21, %v4118_v37  ;;  %v7124_v21 = vpack.c.bf16 %v4126_v53, %v4123_v13  ;;  %v4130_v13 = vld [vmem:[%s8386_s1 + $0xa30] sm:$0xff]  ;;  %v4133_v53 = vld [vmem:[%s8386_s1 + $0xa48] sm:$0xff] }
  0xe5   : > { %4591 = vmatprep.subr.bf16.mxu0 %v7040_v36  ;;  %8647 = vst [vmem:[#allocation121_spill] sm:$0xff] %v7093_v26  ;;  %v4119_v36 = vld [vmem:[%s8386_s1 + $0x9d8] sm:$0xff] }
  0xe6   : > { %4632 = vmatpush1.bf16.msra.mxu1 %v7049_v54  ;;  %v4116_v54 = vld [vmem:[%s8386_s1 + $0x9c0] sm:$0xff]  ;;  %8649 = vst [vmem:[#allocation123_spill] sm:$0xff] %v7105_v25  ;;  %8651 = vst [vmem:[#allocation125_spill] sm:$0xff] %v7124_v21 }
  0xe7   : > { %4633 = vmatprep.subr.bf16.mxu1 %v8538_v11  ;;  %v7121_v37 = vpack.c.bf16 %v4119_v36, %v4116_v54  ;;  %v4129_v54 = vld [vmem:[%s8386_s1 + $0xa28] sm:$0xff]  ;;  %v4132_v36 = vld [vmem:[%s8386_s1 + $0xa40] sm:$0xff] }
  0xe8   : > { %4593 = vmatpush1.bf16.msra.mxu0 %v7065_v40  ;;  %v7133_v40 = vpack.c.bf16 %v4127_v2, %v4124_v4  ;;  %v7152_v2 = vpack.c.bf16 %v4132_v36, %v4129_v54  ;;  %v4136_v54 = vld [vmem:[%s8386_s1 + $0xa60] sm:$0xff]  ;;  %v4139_v36 = vld [vmem:[%s8386_s1 + $0xa78] sm:$0xff] }
  0xe9   : > { %4595 = vmatprep.subr.bf16.mxu0 %v7068_v27  ;;  %8650 = vst [vmem:[#allocation124_spill] sm:$0xff] %v7121_v37  ;;  %v4125_v27 = vld [vmem:[%s8386_s1 + $0xa08] sm:$0xff] }
  0xea   : > { %4635 = vmatpush1.bf16.msra.mxu1 %v7077_v28  ;;  %v4122_v28 = vld [vmem:[%s8386_s1 + $0x9f0] sm:$0xff]  ;;  %8652 = vst [vmem:[#allocation126_spill] sm:$0xff] %v7133_v40  ;;  %8654 = vst [vmem:[#allocation128_spill] sm:$0xff] %v7152_v2 }
  0xeb   : > { %4636 = vmatprep.subr.bf16.mxu1 %v8538_v11  ;;  %v7149_v4 = vpack.c.bf16 %v4125_v27, %v4122_v28  ;;  %v4135_v28 = vld [vmem:[%s8386_s1 + $0xa58] sm:$0xff]  ;;  %v4138_v27 = vld [vmem:[%s8386_s1 + $0xa70] sm:$0xff] }
  0xec   : > { %4597 = vmatpush1.bf16.msra.mxu0 %v7093_v26  ;;  %v7161_v26 = vpack.c.bf16 %v4133_v53, %v4130_v13  ;;  %v7180_v53 = vpack.c.bf16 %v4138_v27, %v4135_v28  ;;  %v4142_v28 = vld [vmem:[%s8386_s1 + $0xa90] sm:$0xff]  ;;  %v4145_v27 = vld [vmem:[%s8386_s1 + $0xaa8] sm:$0xff] }
  0xed   : > { %4599 = vmatprep.subr.bf16.mxu0 %v7096_v6  ;;  %8653 = vst [vmem:[#allocation127_spill] sm:$0xff] %v7149_v4  ;;  %v4131_v6 = vld [vmem:[%s8386_s1 + $0xa38] sm:$0xff] }
  0xee   : > { %4638 = vmatpush1.bf16.msra.mxu1 %v7105_v25  ;;  %v4128_v25 = vld [vmem:[%s8386_s1 + $0xa20] sm:$0xff]  ;;  %8655 = vst [vmem:[#allocation129_spill] sm:$0xff] %v7161_v26 }
  0xef   : > { %4639 = vmatprep.subr.bf16.mxu1 %v8538_v11  ;;  %v7177_v13 = vpack.c.bf16 %v4131_v6, %v4128_v25  ;;  %v4141_v25 = vld [vmem:[%s8386_s1 + $0xa88] sm:$0xff]  ;;  %v4144_v6 = vld [vmem:[%s8386_s1 + $0xaa0] sm:$0xff] }
  0xf0   : > { %4601 = vmatpush1.bf16.msra.mxu0 %v7121_v37  ;;  %v7189_v37 = vpack.c.bf16 %v4139_v36, %v4136_v54  ;;  %v7208_v36 = vpack.c.bf16 %v4144_v6, %v4141_v25  ;;  %v1674_v25 = vrot.slane %v5805_v51, 4  ;;  %v7230_v6 = vld [vmem:[%s8386_s1 + $0xab8] sm:$0xf] }
  0xf1   : > { %4603 = vmatprep.subr.bf16.mxu0 %v7124_v21  ;;  %v4137_v21 = vld [vmem:[%s8386_s1 + $0xa68] sm:$0xff] }
  0xf2   : > { %4641 = vmatpush1.bf16.msra.mxu1 %v7133_v40  ;;  %v4134_v40 = vld [vmem:[%s8386_s1 + $0xa50] sm:$0xff] }
  0xf3   : > { %4642 = vmatprep.subr.bf16.mxu1 %v8538_v11  ;;  %v7205_v54 = vpack.c.bf16 %v4137_v21, %v4134_v40  ;;  %v1673_v21 = vrot.slane %v5803_v49, 4 }
  0xf4   : > { %4605 = vmatpush1.bf16.msra.mxu0 %v7149_v4  ;;  %v7217_v4 = vpack.c.bf16 %v4145_v27, %v4142_v28  ;;  %v7245_v28 = vld [vmem:[%s8386_s1 + $0xab0] sm:$0xf]  ;;  %v1983_v27 = vrot.slane %v6669_v62, 1 }
  0xf5   : > { %4607 = vmatprep.subr.bf16.mxu0 %v7152_v2  ;;  %v4143_v2 = vld [vmem:[%s8386_s1 + $0xa98] sm:$0xff] }
  0xf6   : > { %4644 = vmatpush1.bf16.msra.mxu1 %v7161_v26  ;;  %v4140_v26 = vld [vmem:[%s8386_s1 + $0xa80] sm:$0xff] }
  0xf7   : > { %4645 = vmatprep.subr.bf16.mxu1 %v8538_v11  ;;  %v7221_v40 = vpack.c.bf16 %v4143_v2, %v4140_v26  ;;  %v7236_v26 = vld [vmem:[%s8386_s1 + $0xac0] sm:$0xf]  ;;  %v1675_v2 = vsel %vm776_vm13, %v1673_v21, %v1674_v25  ;;  %v7255_v21 = vrot.slane %v6671_v33, 1 }
  0xf8   : > { %4609 = vmatpush1.bf16.msra.mxu0 %v7177_v13 }
  0xf9   : > { %4611 = vmatprep.subr.bf16.mxu0 %v7180_v53 }
  0xfa   : > { %4647 = vmatpush1.bf16.msra.mxu1 %v7189_v37 }
  0xfb   : > { %4648 = vmatprep.subr.bf16.mxu1 %v8538_v11 }
  0xfc   : > { %4613 = vmatpush1.bf16.msra.mxu0 %v7205_v54 }
  0xfd   : > { %4615 = vmatprep.subr.bf16.mxu0 %v7208_v36 }
  0xfe   : > { %4650 = vmatpush1.bf16.msra.mxu1 %v7217_v4 }
  0xff   : > { %1815 = vmatprep.subr.mxu1 %v8572_v7 }
 0x100   : > { %4617 = vmatpush1.bf16.msra.mxu0 %v7221_v40 }
 0x101   : > { %4149 = vmatprep.subr.msk.mxu0 %vm776_vm13, %v7230_v6 }
 0x102   : > { %4153 = vmatpush1.msk.msra.mxu1 %vm776_vm13, %v7236_v26 }
 0x103   : > { %1836 = vmatmul.mubr.f32.vlgmr.msra.gmra.mrb[16].mxu1 %v1675_v2  ;;  %4695 = vmatprep.subr.bf16.mxu1 %v8538_v11 }
 0x104   : > { %4150 = vmatpush1.msk.msra.mxu0 %vm776_vm13, %v7245_v28  ;;  %4697 = vmatpush1.bf16.msra.mxu1 %v5495_v9  ;;  %v1985_v9 = vsel %vm763_vm5, %v1983_v27, %v7255_v21  ;;  %v8679_v27 = vld [vmem:[#allocation34_spill] sm:$0xff] }
 0x105   : > { %1759 = vmatmul.mubr.f32.vlgmr.msra.gmra.mrb[0].mxu0 %v1675_v2  ;;  %4652 = vmatprep.subr.bf16.mxu0 %v5484_v5  ;;  %v8678_v2 = vld [vmem:[#allocation32_spill] sm:$0xff] }
 0x106   : > { %4654 = vmatpush1.bf16.msra.mxu0 %v5497_v10  ;;  %4155 = vmatprep.mubr.msk.f32.mxu1 %vm611_vm4, %v6949_v34 }
 0x107   : > { %4152 = vmatprep.mubr.msk.f32.mxu0 %vm611_vm4, %v6949_v34  ;;  %1841 = vmatmul.mubr.f32.gmra.mrb[18].mxu1 %v1674_v25  ;;  %v8676_v34 = vld [vmem:[#allocation31_spill] sm:$0xff] }
 0x108   : > { %4656 = vmatprep.subr.bf16.mxu0 %v5509_v14  ;;  %4698 = vmatprep.subr.bf16.mxu1 %v8538_v11 }
 0x109   : > { %1765 = vmatmul.mubr.f32.gmra.mrb[2].mxu0 %v1674_v25  ;;  %4700 = vmatpush1.bf16.msra.mxu1 %v5522_v18  ;;  %v8677_v25 = vld [vmem:[#allocation30_spill] sm:$0xff] }
 0x10a   : > { %4658 = vmatpush1.bf16.msra.mxu0 %v5524_v19  ;;  %4701 = vmatprep.subr.bf16.mxu1 %v8538_v11  ;;  %v8656_v19 = vld [vmem:[#allocation10_spill] sm:$0xff] }
 0x10b   : > { %4660 = vmatprep.subr.bf16.mxu0 %v5537_v23  ;;  %4158 = vmatprep.mubr.msk.f32.mxu0 %vm611_vm4, %v1985_v9  ;;  %v1980_v23 = vrot.slane %v8656_v19, 1 }
 0x10c   : > { %4161 = vmatprep.mubr.msk.f32.mxu1 %vm611_vm4, %v1985_v9  ;;  %v8680_v9 = vld [vmem:[#allocation33_spill] sm:$0xff] }
 0x10d   : > { %4703 = vmatpush1.bf16.msra.mxu1 %v5556_v29  ;;  %v8657_v29 = vld [vmem:[#allocation11_spill] sm:$0xff] }
 0x10e   : > { %4662 = vmatpush1.bf16.msra.mxu0 %v5558_v30  ;;  %4704 = vmatprep.subr.bf16.mxu1 %v8538_v11  ;;  %v1981_v30 = vrot.slane %v8657_v29, 1 }
 0x10f   : > { %4664 = vmatprep.subr.bf16.mxu0 %v5565_v32  ;;  %v8658_v32 = vld [vmem:[#allocation12_spill] sm:$0xff] }
 0x111   : > { %4706 = vmatpush1.bf16.msra.mxu1 %v5584_v38  ;;  %v8659_v38 = vld [vmem:[#allocation13_spill] sm:$0xff] }
 0x112   : > { %4666 = vmatpush1.bf16.msra.mxu0 %v5586_v39  ;;  %4707 = vmatprep.subr.bf16.mxu1 %v8538_v11  ;;  %v5316_v39 = vld [vmem:[%s8386_s1 + $0x440] sm:$0xf] }
 0x113   : > { %4668 = vmatprep.subr.bf16.mxu0 %v5593_v41  ;;  %v1982_v41 = vsel %vm763_vm5, %v1980_v23, %v1981_v30 }
 0x115   : > { %4709 = vmatpush1.bf16.msra.mxu1 %v5612_v47  ;;  %v5317_v47 = vld [vmem:[%s8386_s1 + $0x448] sm:$0xf] }
 0x116   : > { %4670 = vmatpush1.bf16.msra.mxu0 %v5614_v48  ;;  %4710 = vmatprep.subr.bf16.mxu1 %v8538_v11  ;;  %v5318_v48 = vld [vmem:[%s8386_s1 + $0x438] sm:$0xf] }
 0x117   : > { %4672 = vmatprep.subr.bf16.mxu0 %v5621_v50  ;;  %v8660_v50 = vld [vmem:[#allocation14_spill] sm:$0xff] }
 0x119   : > { %4712 = vmatpush1.bf16.msra.mxu1 %v5640_v56  ;;  %v8661_v56 = vld [vmem:[#allocation16_spill] sm:$0xff] }
 0x11a   : > { %4674 = vmatpush1.bf16.msra.mxu0 %v5642_v57  ;;  %4713 = vmatprep.subr.bf16.mxu1 %v8538_v11  ;;  %v8662_v57 = vld [vmem:[#allocation15_spill] sm:$0xff] }
 0x11b   : > { %4676 = vmatprep.subr.bf16.mxu0 %v5652_v60  ;;  %v8663_v60 = vld [vmem:[#allocation17_spill] sm:$0xff] }
 0x11d   : > { %4715 = vmatpush1.bf16.msra.mxu1 %v5689_v15  ;;  %v8664_v15 = vld [vmem:[#allocation19_spill] sm:$0xff] }
 0x11e   : > { %4678 = vmatpush1.bf16.msra.mxu0 %v5691_v16  ;;  %4716 = vmatprep.subr.bf16.mxu1 %v8538_v11  ;;  %v7292_v5 = vpop.f32.mrb[0].mxu1  ;;  %v8665_v16 = vld [vmem:[#allocation18_spill] sm:$0xff] }
 0x11f   : > { %4680 = vmatprep.subr.bf16.mxu0 %v5700_v22  ;;  %v931_v10 = vpop.f32.mrb[1].mxu1  ;;  %v8666_v22 = vld [vmem:[#allocation20_spill] sm:$0xff] }
 0x120   : > { %v8681_v10 = vld [vmem:[#allocation35_spill] sm:$0xff] }
 0x121   : > { %4718 = vmatpush1.bf16.msra.mxu1 %v5724_v35  ;;  %v8667_v35 = vld [vmem:[#allocation22_spill] sm:$0xff] }
 0x122   : > { %4682 = vmatpush1.bf16.msra.mxu0 %v5730_v44  ;;  %4719 = vmatprep.subr.bf16.mxu1 %v8538_v11  ;;  %v8668_v44 = vld [vmem:[#allocation21_spill] sm:$0xff] }
 0x123   : > { %4684 = vmatprep.subr.bf16.mxu0 %v5732_v45  ;;  %v8669_v45 = vld [vmem:[#allocation23_spill] sm:$0xff] }
 0x124   : > { %v7299_v14 = vpop.f32.mrb[2].mxu1 }
 0x125   : > { %4721 = vmatpush1.bf16.msra.mxu1 %v5734_v46  ;;  %v936_v18 = vpop.f32.mrb[3].mxu1  ;;  %v8670_v46 = vld [vmem:[#allocation25_spill] sm:$0xff] }
 0x126   : > { %4686 = vmatpush1.bf16.msra.mxu0 %v5749_v63  ;;  %4722 = vmatprep.subr.bf16.mxu1 %v8538_v11  ;;  %v8671_v63 = vld [vmem:[#allocation24_spill] sm:$0xff] }
 0x127   : > { %4688 = vmatprep.subr.bf16.mxu0 %v5751_v0  ;;  %v8672_v0 = vld [vmem:[#allocation26_spill] sm:$0xff] }
 0x129   : > { %4724 = vmatpush1.bf16.msra.mxu1 %v5807_v52  ;;  %v8673_v52 = vld [vmem:[#allocation28_spill] sm:$0xff] }
 0x12a   : > { %4690 = vmatpush1.bf16.msra.mxu0 %v5809_v55  ;;  %4725 = vmatprep.subr.bf16.mxu1 %v8538_v11  ;;  %v8674_v55 = vld [vmem:[#allocation27_spill] sm:$0xff] }
 0x12b   : > { %4692 = vmatprep.subr.bf16.mxu0 %v5836_v20  ;;  %v8675_v20 = vld [vmem:[#allocation29_spill] sm:$0xff] }
 0x12d   : > { %4727 = vmatpush1.bf16.msra.mxu1 %v8658_v32  ;;  %v8683_v32 = vld [vmem:[#allocation36_spill] sm:$0xff] }
 0x12e   : > { %4694 = vmatpush1.bf16.msra.mxu0 %v8659_v38  ;;  %2113 = vmatprep.subr.mxu1 %v8572_v7  ;;  %v8684_v38 = vld [vmem:[#allocation38_spill] sm:$0xff] }
 0x12f   : > { %4156 = vmatprep.subr.msk.mxu0 %vm776_vm13, %v5316_v39 }
 0x131   : > { %4160 = vmatpush1.msk.msra.mxu1 %vm776_vm13, %v5317_v47 }
 0x132   : > { %4157 = vmatpush1.msk.msra.mxu0 %vm776_vm13, %v5318_v48  ;;  %4772 = vmatprep.subr.bf16.mxu1 %v8538_v11  ;;  %v8685_v48 = vld [vmem:[#allocation40_spill] sm:$0xff] }
 0x133   : > { %4729 = vmatprep.subr.bf16.mxu0 %v8660_v50  ;;  %2057 = vmatmul.mubr.f32.vlgmr.msra.gmra.mrb[4].mxu0 %v1982_v41  ;;  %v8687_v50 = vld [vmem:[#allocation41_spill] sm:$0xff] }
 0x134   : > { %2134 = vmatmul.mubr.f32.vlgmr.msra.gmra.mrb[20].mxu1 %v1982_v41  ;;  %4731 = vmatpush1.bf16.msra.mxu0 %v8661_v56  ;;  %v8688_v56 = vld [vmem:[#allocation43_spill] sm:$0xff] }
 0x135   : > { %4774 = vmatpush1.bf16.msra.mxu1 %v8662_v57  ;;  %4733 = vmatprep.subr.bf16.mxu0 %v8663_v60  ;;  %v8689_v57 = vld [vmem:[#allocation42_spill] sm:$0xff]  ;;  %v8690_v60 = vld [vmem:[#allocation44_spill] sm:$0xff] }
 0x136   : > { %4775 = vmatprep.subr.bf16.mxu1 %v8538_v11  ;;  %4159 = vmatprep.mubr.msk.f32.mxu0 %vm611_vm4, %v7255_v21 }
 0x137   : > { %4162 = vmatprep.mubr.msk.f32.mxu1 %vm611_vm4, %v7255_v21  ;;  %2063 = vmatmul.mubr.f32.gmra.mrb[6].mxu0 %v1981_v30 }
 0x138   : > { %4735 = vmatpush1.bf16.msra.mxu0 %v8664_v15  ;;  %2139 = vmatmul.mubr.f32.gmra.mrb[22].mxu1 %v1981_v30  ;;  %v8682_v30 = vld [vmem:[#allocation37_spill] sm:$0xff]  ;;  %v8691_v15 = vld [vmem:[#allocation46_spill] sm:$0xff] }
 0x139   : > { %4777 = vmatpush1.bf16.msra.mxu1 %v8665_v16  ;;  %4737 = vmatprep.subr.bf16.mxu0 %v8666_v22  ;;  %v5319_v16 = vld [vmem:[%s8386_s1 + $0x218] sm:$0xf]  ;;  %v5320_v22 = vld [vmem:[%s8386_s1 + $0x210] sm:$0xf] }
 0x13a   : > { %4778 = vmatprep.subr.bf16.mxu1 %v8538_v11  ;;  %4165 = vmatprep.mubr.msk.f32.mxu0 %vm611_vm4, %v6669_v62 }
 0x13b   : > { %4168 = vmatprep.mubr.msk.f32.mxu1 %vm611_vm4, %v6669_v62 }
 0x13c   : > { %4739 = vmatpush1.bf16.msra.mxu0 %v8667_v35  ;;  %v5321_v35 = vld [vmem:[%s8386_s1 + $0x220] sm:$0xf] }
 0x13d   : > { %4780 = vmatpush1.bf16.msra.mxu1 %v8668_v44  ;;  %4741 = vmatprep.subr.bf16.mxu0 %v8669_v45  ;;  %v8693_v44 = vld [vmem:[#allocation48_spill] sm:$0xff]  ;;  %v2303_v45 = vrot.slane %v6669_v62, 2 }
 0x13e   : > { %4781 = vmatprep.subr.bf16.mxu1 %v8538_v11 }
 0x140   : > { %4743 = vmatpush1.bf16.msra.mxu0 %v8670_v46  ;;  %v7403_v46 = vrot.slane %v6671_v33, 2 }
 0x141   : > { %4783 = vmatpush1.bf16.msra.mxu1 %v8671_v63  ;;  %4745 = vmatprep.subr.bf16.mxu0 %v8672_v0  ;;  %v8694_v63 = vld [vmem:[#allocation49_spill] sm:$0xff]  ;;  %v8695_v0 = vld [vmem:[#allocation47_spill] sm:$0xff] }
 0x142   : > { %4784 = vmatprep.subr.bf16.mxu1 %v8538_v11 }
 0x144   : > { %4747 = vmatpush1.bf16.msra.mxu0 %v8673_v52  ;;  %v8696_v52 = vld [vmem:[#allocation50_spill] sm:$0xff] }
 0x145   : > { %4786 = vmatpush1.bf16.msra.mxu1 %v8674_v55  ;;  %4749 = vmatprep.subr.bf16.mxu0 %v8675_v20  ;;  %v2305_v55 = vsel %vm1173_vm14, %v2303_v45, %v7403_v46  ;;  %v8697_v20 = vld [vmem:[#allocation52_spill] sm:$0xff]  ;;  %v8718_v45 = vld [vmem:[#allocation73_spill] sm:$0xff] }
 0x146   : > { %4787 = vmatprep.subr.bf16.mxu1 %v8538_v11 }
 0x148   : > { %4751 = vmatpush1.bf16.msra.mxu0 %v8676_v34  ;;  %v8698_v34 = vld [vmem:[#allocation51_spill] sm:$0xff] }
 0x149   : > { %4789 = vmatpush1.bf16.msra.mxu1 %v8677_v25  ;;  %4753 = vmatprep.subr.bf16.mxu0 %v8678_v2  ;;  %v8699_v25 = vld [vmem:[#allocation53_spill] sm:$0xff]  ;;  %v8700_v2 = vld [vmem:[#allocation55_spill] sm:$0xff] }
 0x14a   : > { %4790 = vmatprep.subr.bf16.mxu1 %v8538_v11 }
 0x14c   : > { %4755 = vmatpush1.bf16.msra.mxu0 %v8679_v27  ;;  %v1094_v21 = vpop.f32.mrb[4].mxu1  ;;  %v8701_v27 = vld [vmem:[#allocation54_spill] sm:$0xff] }
 0x14d   : > { %4792 = vmatpush1.bf16.msra.mxu1 %v8680_v9  ;;  %4757 = vmatprep.subr.bf16.mxu0 %v8681_v10  ;;  %v7365_v18 = vadd.f32 %v1094_v21, %v7292_v5  ;;  %v1096_v23 = vpop.f32.mrb[5].mxu1  ;;  %v8686_v5 = vld [vmem:[#allocation39_spill] sm:$0xff]  ;;  %v8702_v21 = vld [vmem:[#allocation56_spill] sm:$0xff]  ;;  %v8703_v9 = vld [vmem:[#allocation58_spill] sm:$0xff] }
 0x14e   : > { %4793 = vmatprep.subr.bf16.mxu1 %v8538_v11  ;;  %v8704_v10 = vld [vmem:[#allocation57_spill] sm:$0xff]  ;;  %v8705_v23 = vld [vmem:[#allocation59_spill] sm:$0xff] }
 0x150   : > { %4759 = vmatpush1.bf16.msra.mxu0 %v8682_v30  ;;  %v8706_v30 = vld [vmem:[#allocation61_spill] sm:$0xff] }
 0x151   : > { %4795 = vmatpush1.bf16.msra.mxu1 %v8683_v32  ;;  %4761 = vmatprep.subr.bf16.mxu0 %v8684_v38  ;;  %v8707_v32 = vld [vmem:[#allocation60_spill] sm:$0xff]  ;;  %v8708_v38 = vld [vmem:[#allocation62_spill] sm:$0xff] }
 0x152   : > { %4796 = vmatprep.subr.bf16.mxu1 %v8538_v11  ;;  %v1099_v39 = vpop.f32.mrb[6].mxu1 }
 0x153   : > { %v7373_v41 = vadd.f32 %v1099_v39, %v7299_v14  ;;  %v1101_v47 = vpop.f32.mrb[7].mxu1  ;;  %v8692_v14 = vld [vmem:[#allocation45_spill] sm:$0xff]  ;;  %v8709_v39 = vld [vmem:[#allocation64_spill] sm:$0xff] }
 0x154   : > { %4763 = vmatpush1.bf16.msra.mxu0 %v8685_v48  ;;  %v8710_v47 = vld [vmem:[#allocation63_spill] sm:$0xff]  ;;  %v8711_v48 = vld [vmem:[#allocation65_spill] sm:$0xff] }
 0x155   : > { %4798 = vmatpush1.bf16.msra.mxu1 %v8686_v5  ;;  %4765 = vmatprep.subr.bf16.mxu0 %v8687_v50  ;;  %v8712_v50 = vld [vmem:[#allocation67_spill] sm:$0xff] }
 0x156   : > { %4799 = vmatprep.subr.bf16.mxu1 %v8538_v11 }
 0x158   : > { %4767 = vmatpush1.bf16.msra.mxu0 %v8688_v56 }
 0x159   : > { %4801 = vmatpush1.bf16.msra.mxu1 %v8689_v57  ;;  %4769 = vmatprep.subr.bf16.mxu0 %v8690_v60  ;;  %v8713_v60 = vld [vmem:[#allocation66_spill] sm:$0xff] }
 0x15a   : > { %4802 = vmatprep.subr.bf16.mxu1 %v8538_v11 }
 0x15c   : > { %4771 = vmatpush1.bf16.msra.mxu0 %v8691_v15  ;;  %v8714_v15 = vld [vmem:[#allocation68_spill] sm:$0xff] }
 0x15d   : > { %4804 = vmatpush1.bf16.msra.mxu1 %v8692_v14  ;;  %4163 = vmatprep.subr.msk.mxu0 %vm776_vm13, %v5319_v16  ;;  %v8715_v14 = vld [vmem:[#allocation70_spill] sm:$0xff]  ;;  %v8716_v16 = vld [vmem:[#allocation69_spill] sm:$0xff] }
 0x15e   : > { %2269 = vmatprep.subr.mxu1 %v8572_v7 }
 0x160   : > { %4164 = vmatpush1.msk.msra.mxu0 %vm776_vm13, %v5320_v22  ;;  %v8717_v22 = vld [vmem:[#allocation71_spill] sm:$0xff] }
 0x161   : > { %4167 = vmatpush1.msk.msra.mxu1 %vm776_vm13, %v5321_v35  ;;  %4806 = vmatprep.subr.bf16.mxu0 %v8693_v44 }
 0x162   : > { %4849 = vmatprep.subr.bf16.mxu1 %v8538_v11  ;;  %2213 = vmatmul.mubr.f32.vlgmr.msra.gmra.mrb[4].mxu0 %v8656_v19 }
 0x163   : > { %2290 = vmatmul.mubr.f32.vlgmr.msra.gmra.mrb[24].mxu1 %v8656_v19  ;;  %4808 = vmatpush1.bf16.msra.mxu0 %v8694_v63  ;;  %v8719_v63 = vld [vmem:[#allocation72_spill] sm:$0xff] }
 0x164   : > { %4851 = vmatpush1.bf16.msra.mxu1 %v8695_v0  ;;  %4810 = vmatprep.subr.bf16.mxu0 %v8696_v52  ;;  %v8720_v0 = vld [vmem:[#allocation74_spill] sm:$0xff]  ;;  %v8721_v52 = vld [vmem:[#allocation76_spill] sm:$0xff] }
 0x165   : > { %4852 = vmatprep.subr.bf16.mxu1 %v8538_v11  ;;  %4166 = vmatprep.mubr.msk.f32.mxu0 %vm611_vm4, %v6671_v33 }
 0x166   : > { %4169 = vmatprep.mubr.msk.f32.mxu1 %vm611_vm4, %v6671_v33  ;;  %2219 = vmatmul.mubr.f32.gmra.mrb[6].mxu0 %v8657_v29 }
 0x167   : > { %4812 = vmatpush1.bf16.msra.mxu0 %v8697_v20  ;;  %2295 = vmatmul.mubr.f32.gmra.mrb[26].mxu1 %v8657_v29  ;;  %v8723_v20 = vld [vmem:[#allocation77_spill] sm:$0xff] }
 0x168   : > { %4854 = vmatpush1.bf16.msra.mxu1 %v8698_v34  ;;  %4814 = vmatprep.subr.bf16.mxu0 %v8699_v25  ;;  %v2301_v34 = vrot.slane %v8657_v29, 2  ;;  %v8724_v25 = vld [vmem:[#allocation79_spill] sm:$0xff] }
 0x169   : > { %4855 = vmatprep.subr.bf16.mxu1 %v8538_v11  ;;  %4172 = vmatprep.mubr.msk.f32.mxu0 %vm611_vm4, %v2305_v55 }
 0x16a   : > { %4175 = vmatprep.mubr.msk.f32.mxu1 %vm611_vm4, %v2305_v55  ;;  %v8722_v55 = vld [vmem:[#allocation75_spill] sm:$0xff] }
 0x16b   : > { %4816 = vmatpush1.bf16.msra.mxu0 %v8700_v2  ;;  %v8725_v2 = vld [vmem:[#allocation78_spill] sm:$0xff] }
 0x16c   : > { %4857 = vmatpush1.bf16.msra.mxu1 %v8701_v27  ;;  %4818 = vmatprep.subr.bf16.mxu0 %v8702_v21  ;;  %v5322_v27 = vld [vmem:[%s8386_s1 + $0x668] sm:$0xf] }
 0x16d   : > { %4858 = vmatprep.subr.bf16.mxu1 %v8538_v11 }
 0x16f   : > { %4820 = vmatpush1.bf16.msra.mxu0 %v8703_v9  ;;  %v5323_v9 = vld [vmem:[%s8386_s1 + $0x660] sm:$0xf] }
 0x170   : > { %4860 = vmatpush1.bf16.msra.mxu1 %v8704_v10  ;;  %4822 = vmatprep.subr.bf16.mxu0 %v8705_v23  ;;  %v5324_v10 = vld [vmem:[%s8386_s1 + $0x670] sm:$0xf]  ;;  %v2473_v23 = vrot.slane %v6669_v62, 3 }
 0x171   : > { %4861 = vmatprep.subr.bf16.mxu1 %v8538_v11 }
 0x173   : > { %4824 = vmatpush1.bf16.msra.mxu0 %v8706_v30  ;;  %v7484_v30 = vrot.slane %v6671_v33, 3 }
 0x174   : > { %4863 = vmatpush1.bf16.msra.mxu1 %v8707_v32  ;;  %4826 = vmatprep.subr.bf16.mxu0 %v8708_v38  ;;  %v8731_v32 = vld [vmem:[#allocation84_spill] sm:$0xff] }
 0x175   : > { %4864 = vmatprep.subr.bf16.mxu1 %v8538_v11  ;;  %v8733_v38 = vld [vmem:[#allocation88_spill] sm:$0xff] }
 0x177   : > { %4828 = vmatpush1.bf16.msra.mxu0 %v8709_v39  ;;  %v8734_v39 = vld [vmem:[#allocation87_spill] sm:$0xff] }
 0x178   : > { %4866 = vmatpush1.bf16.msra.mxu1 %v8710_v47  ;;  %4830 = vmatprep.subr.bf16.mxu0 %v8711_v48  ;;  %v8735_v47 = vld [vmem:[#allocation89_spill] sm:$0xff]  ;;  %v8736_v48 = vld [vmem:[#allocation91_spill] sm:$0xff] }
 0x179   : > { %4867 = vmatprep.subr.bf16.mxu1 %v8538_v11 }
 0x17a   : > { %v1338_v5 = vpop.f32.mrb[8].mxu1 }
 0x17b   : > { %4832 = vmatpush1.bf16.msra.mxu0 %v8712_v50  ;;  %v7442_v56 = vadd.f32 %v1338_v5, %v7365_v18  ;;  %v1340_v57 = vpop.f32.mrb[9].mxu1  ;;  %v8737_v5 = vld [vmem:[#allocation90_spill] sm:$0xff]  ;;  %v8738_v50 = vld [vmem:[#allocation92_spill] sm:$0xff] }
 0x17c   : > { %4869 = vmatpush1.bf16.msra.mxu1 %v8713_v60  ;;  %4834 = vmatprep.subr.bf16.mxu0 %v8714_v15 }
 0x17d   : > { %4870 = vmatprep.subr.bf16.mxu1 %v8538_v11 }
 0x17f   : > { %4836 = vmatpush1.bf16.msra.mxu0 %v8715_v14  ;;  %v8739_v14 = vld [vmem:[#allocation94_spill] sm:$0xff] }
 0x180   : > { %4872 = vmatpush1.bf16.msra.mxu1 %v8716_v16  ;;  %4838 = vmatprep.subr.bf16.mxu0 %v8717_v22  ;;  %v1343_v35 = vpop.f32.mrb[10].mxu1  ;;  %v8740_v16 = vld [vmem:[#allocation93_spill] sm:$0xff]  ;;  %v8741_v22 = vld [vmem:[#allocation95_spill] sm:$0xff] }
 0x181   : > { %4873 = vmatprep.subr.bf16.mxu1 %v8538_v11  ;;  %v7452_v44 = vadd.f32 %v1343_v35, %v7373_v41  ;;  %v1345_v18 = vpop.f32.mrb[11].mxu1  ;;  %v2300_v41 = vrot.slane %v8656_v19, 2  ;;  %v8742_v35 = vld [vmem:[#allocation97_spill] sm:$0xff] }
 0x183   : > { %4840 = vmatpush1.bf16.msra.mxu0 %v8718_v45  ;;  %v2302_v21 = vsel %vm1173_vm14, %v2300_v41, %v2301_v34  ;;  %v8743_v45 = vld [vmem:[#allocation96_spill] sm:$0xff]  ;;  %v8748_v41 = vld [vmem:[#allocation103_spill] sm:$0xff] }
 0x184   : > { %4875 = vmatpush1.bf16.msra.mxu1 %v8719_v63  ;;  %4842 = vmatprep.subr.bf16.mxu0 %v8720_v0  ;;  %v8744_v63 = vld [vmem:[#allocation98_spill] sm:$0xff] }
 0x185   : > { %4876 = vmatprep.subr.bf16.mxu1 %v8538_v11 }
 0x187   : > { %4844 = vmatpush1.bf16.msra.mxu0 %v8721_v52  ;;  %v8745_v52 = vld [vmem:[#allocation100_spill] sm:$0xff] }
 0x188   : > { %4878 = vmatpush1.bf16.msra.mxu1 %v8722_v55  ;;  %4846 = vmatprep.subr.bf16.mxu0 %v8723_v20  ;;  %v8746_v55 = vld [vmem:[#allocation99_spill] sm:$0xff]  ;;  %v8747_v20 = vld [vmem:[#allocation101_spill] sm:$0xff] }
 0x189   : > { %4879 = vmatprep.subr.bf16.mxu1 %v8538_v11 }
 0x18b   : > { %4848 = vmatpush1.bf16.msra.mxu0 %v8724_v25  ;;  %v8750_v25 = vld [vmem:[#allocation104_spill] sm:$0xff] }
 0x18c   : > { %4881 = vmatpush1.bf16.msra.mxu1 %v8725_v2  ;;  %4170 = vmatprep.subr.msk.mxu0 %vm776_vm13, %v5322_v27  ;;  %v2471_v2 = vrot.slane %v8657_v29, 3  ;;  %v8751_v27 = vld [vmem:[#allocation106_spill] sm:$0xff] }
 0x18d   : > { %2433 = vmatprep.subr.mxu1 %v8572_v7 }
 0x18f   : > { %4171 = vmatpush1.msk.msra.mxu0 %vm776_vm13, %v5323_v9  ;;  %v8753_v9 = vld [vmem:[#allocation107_spill] sm:$0xff] }
 0x190   : > { %4174 = vmatpush1.msk.msra.mxu1 %vm776_vm13, %v5324_v10  ;;  %4883 = vmatprep.subr.bf16.mxu0 %v6566_v59  ;;  %v2475_v59 = vsel %vm1423_vm15, %v2473_v23, %v7484_v30  ;;  %v2643_v23 = vrot.slane %v6669_v62, 4 }
 0x191   : > { %4926 = vmatprep.subr.bf16.mxu1 %v8538_v11  ;;  %2377 = vmatmul.mubr.f32.vlgmr.msra.gmra.mrb[4].mxu0 %v2302_v21 }
 0x192   : > { %2454 = vmatmul.mubr.f32.vlgmr.msra.gmra.mrb[28].mxu1 %v2302_v21  ;;  %4885 = vmatpush1.bf16.msra.mxu0 %v6575_v8  ;;  %v8727_v8 = vld [vmem:[#allocation82_spill] sm:$0xff]  ;;  %v8752_v21 = vld [vmem:[#allocation105_spill] sm:$0xff] }
 0x193   : > { %4928 = vmatpush1.bf16.msra.mxu1 %v6554_v3  ;;  %4887 = vmatprep.subr.bf16.mxu0 %v6578_v31  ;;  %v8726_v3 = vld [vmem:[#allocation80_spill] sm:$0xff]  ;;  %v8728_v31 = vld [vmem:[#allocation81_spill] sm:$0xff] }
 0x194   : > { %4929 = vmatprep.subr.bf16.mxu1 %v8538_v11  ;;  %4173 = vmatprep.mubr.msk.f32.mxu0 %vm611_vm4, %v7403_v46 }
 0x195   : > { %4176 = vmatprep.mubr.msk.f32.mxu1 %vm611_vm4, %v7403_v46  ;;  %2383 = vmatmul.mubr.f32.gmra.mrb[6].mxu0 %v2301_v34  ;;  %v8729_v46 = vld [vmem:[#allocation83_spill] sm:$0xff] }
 0x196   : > { %4889 = vmatpush1.bf16.msra.mxu0 %v6609_v58  ;;  %2459 = vmatmul.mubr.f32.gmra.mrb[30].mxu1 %v2301_v34  ;;  %v8730_v58 = vld [vmem:[#allocation85_spill] sm:$0xff]  ;;  %v8749_v34 = vld [vmem:[#allocation102_spill] sm:$0xff] }
 0x197   : > { %4931 = vmatpush1.bf16.msra.mxu1 %v6592_v42  ;;  %4891 = vmatprep.subr.bf16.mxu0 %v8726_v3  ;;  %v8732_v42 = vld [vmem:[#allocation86_spill] sm:$0xff]  ;;  %v8754_v3 = vld [vmem:[#allocation108_spill] sm:$0xff] }
 0x198   : > { %4932 = vmatprep.subr.bf16.mxu1 %v8538_v11  ;;  %4179 = vmatprep.mubr.msk.f32.mxu0 %vm611_vm4, %v2475_v59 }
 0x199   : > { %4182 = vmatprep.mubr.msk.f32.mxu1 %vm611_vm4, %v2475_v59  ;;  %v7556_v59 = vrot.slane %v6671_v33, 4 }
 0x19a   : > { %4893 = vmatpush1.bf16.msra.mxu0 %v8727_v8  ;;  %v8759_v8 = vld [vmem:[#allocation113_spill] sm:$0xff] }
 0x19b   : > { %4934 = vmatpush1.bf16.msra.mxu1 %v8728_v31  ;;  %4895 = vmatprep.subr.bf16.mxu0 %v8729_v46  ;;  %v8761_v46 = vld [vmem:[#allocation114_spill] sm:$0xff] }
 0x19c   : > { %4935 = vmatprep.subr.bf16.mxu1 %v8538_v11 }
 0x19e   : > { %4897 = vmatpush1.bf16.msra.mxu0 %v8730_v58  ;;  %v8762_v58 = vld [vmem:[#allocation116_spill] sm:$0xff] }
 0x19f   : > { %4937 = vmatpush1.bf16.msra.mxu1 %v8731_v32  ;;  %4899 = vmatprep.subr.bf16.mxu0 %v8732_v42  ;;  %v8763_v32 = vld [vmem:[#allocation118_spill] sm:$0xff] }
 0x1a0   : > { %4938 = vmatprep.subr.bf16.mxu1 %v8538_v11 }
 0x1a2   : > { %4901 = vmatpush1.bf16.msra.mxu0 %v8733_v38 }
 0x1a3   : > { %4940 = vmatpush1.bf16.msra.mxu1 %v8734_v39  ;;  %4903 = vmatprep.subr.bf16.mxu0 %v8735_v47  ;;  %v8764_v39 = vld [vmem:[#allocation117_spill] sm:$0xff]  ;;  %v8765_v47 = vld [vmem:[#allocation119_spill] sm:$0xff] }
 0x1a4   : > { %4941 = vmatprep.subr.bf16.mxu1 %v8538_v11 }
 0x1a6   : > { %4905 = vmatpush1.bf16.msra.mxu0 %v8736_v48  ;;  %v1852_v48 = vld [vmem:[%s8387_s2] sm:$0x7] }
 0x1a7   : > { %4943 = vmatpush1.bf16.msra.mxu1 %v8737_v5  ;;  %4907 = vmatprep.subr.bf16.mxu0 %v8738_v50  ;;  %v8766_v50 = vld [vmem:[#allocation121_spill] sm:$0xff] }
 0x1a8   : > { %4944 = vmatprep.subr.bf16.mxu1 %v8538_v11  ;;  %v1588_v57 = vpop.f32.mrb[12].mxu1 }
 0x1a9   : > { %v7519_v60 = vadd.f32 %v1588_v57, %v7442_v56  ;;  %v1590_v15 = vpop.f32.mrb[13].mxu1 }
 0x1aa   : > { %4909 = vmatpush1.bf16.msra.mxu0 %v8739_v14  ;;  %v8767_v14 = vld [vmem:[#allocation120_spill] sm:$0xff] }
 0x1ab   : > { %4946 = vmatpush1.bf16.msra.mxu1 %v8740_v16  ;;  %4911 = vmatprep.subr.bf16.mxu0 %v8741_v22  ;;  %v8768_v16 = vld [vmem:[#allocation122_spill] sm:$0xff] }
 0x1ac   : > { %4947 = vmatprep.subr.bf16.mxu1 %v8538_v11 }
 0x1ae   : > { %4913 = vmatpush1.bf16.msra.mxu0 %v8742_v35  ;;  %v1593_v18 = vpop.f32.mrb[14].mxu1 }
 0x1af   : > { %4949 = vmatpush1.bf16.msra.mxu1 %v8743_v45  ;;  %4915 = vmatprep.subr.bf16.mxu0 %v8744_v63  ;;  %v7529_v0 = vadd.f32 %v1593_v18, %v7452_v44  ;;  %v1595_v56 = vpop.f32.mrb[15].mxu1  ;;  %v2470_v44 = vrot.slane %v8656_v19, 3 }
 0x1b0   : > { %4950 = vmatprep.subr.bf16.mxu1 %v8538_v11  ;;  %v8769_v56 = vld [vmem:[#allocation124_spill] sm:$0xff] }
 0x1b1   : > { %v2472_v10 = vsel %vm1423_vm15, %v2470_v44, %v2471_v2 }
 0x1b2   : > { %4917 = vmatpush1.bf16.msra.mxu0 %v8745_v52 }
 0x1b3   : > { %4952 = vmatpush1.bf16.msra.mxu1 %v8746_v55  ;;  %4919 = vmatprep.subr.bf16.mxu0 %v8747_v20 }
 0x1b4   : > { %4953 = vmatprep.subr.bf16.mxu1 %v8538_v11 }
 0x1b6   : > { %4921 = vmatpush1.bf16.msra.mxu0 %v8748_v41  ;;  %v8770_v41 = vld [vmem:[#allocation123_spill] sm:$0xff] }
 0x1b7   : > { %4955 = vmatpush1.bf16.msra.mxu1 %v8749_v34  ;;  %4923 = vmatprep.subr.bf16.mxu0 %v8750_v25  ;;  %v8771_v25 = vld [vmem:[#allocation125_spill] sm:$0xff] }
 0x1b8   : > { %4956 = vmatprep.subr.bf16.mxu1 %v8538_v11 }
 0x1ba   : > { %4925 = vmatpush1.bf16.msra.mxu0 %v8751_v27 }
 0x1bb   : > { %4958 = vmatpush1.bf16.msra.mxu1 %v8752_v21  ;;  %4177 = vmatprep.subr.msk.mxu0 %vm776_vm13, %v8753_v9 }
 0x1bc   : > { %2603 = vmatprep.subr.mxu1 %v8572_v7 }
 0x1be   : > { %4178 = vmatpush1.msk.msra.mxu0 %vm776_vm13, %v6924_v1  ;;  %v8756_v1 = vld [vmem:[#allocation110_spill] sm:$0xff] }
 0x1bf   : > { %4181 = vmatpush1.msk.msra.mxu1 %vm776_vm13, %v6900_v24  ;;  %4960 = vmatprep.subr.bf16.mxu0 %v6926_v43  ;;  %v2645_v43 = vsel %vm776_vm13, %v2643_v23, %v7556_v59  ;;  %v8755_v24 = vld [vmem:[#allocation109_spill] sm:$0xff] }
 0x1c0   : > { %5003 = vmatprep.subr.bf16.mxu1 %v8538_v11  ;;  %2547 = vmatmul.mubr.f32.vlgmr.msra.gmra.mrb[4].mxu0 %v2472_v10 }
 0x1c1   : > { %2624 = vmatmul.mubr.f32.vlgmr.msra.gmra.mrb[32].mxu1 %v2472_v10  ;;  %4962 = vmatpush1.bf16.msra.mxu0 %v6936_v17  ;;  %v1854_v17 = vlaneseq }
 0x1c2   : > { %5005 = vmatpush1.bf16.msra.mxu1 %v8754_v3  ;;  %4964 = vmatprep.subr.bf16.mxu0 %v6939_v61  ;;  %v8757_v61 = vld [vmem:[#allocation112_spill] sm:$0xff] }
 0x1c3   : > { %5006 = vmatprep.subr.bf16.mxu1 %v8538_v11  ;;  %4180 = vmatprep.mubr.msk.f32.mxu0 %vm611_vm4, %v7484_v30  ;;  %v1855_v31 = vshrl.u32 %v1854_v17, 7 }
 0x1c4   : > { %4183 = vmatprep.mubr.msk.f32.mxu1 %vm611_vm4, %v7484_v30  ;;  %2553 = vmatmul.mubr.f32.gmra.mrb[6].mxu0 %v2471_v2  ;;  %v8758_v30 = vld [vmem:[#allocation111_spill] sm:$0xff] }
 0x1c5   : > { %4966 = vmatpush1.bf16.msra.mxu0 %v6971_v12  ;;  %2629 = vmatmul.mubr.f32.gmra.mrb[34].mxu1 %v2471_v2  ;;  %v8760_v12 = vld [vmem:[#allocation115_spill] sm:$0xff]  ;;  %v1864_v42 = vsub.s32 2, %v1855_v31  ;;  %v1856_v38 = vsub.s32 0, %v1855_v31  ;;  %v1860_v5 = vsub.s32 1, %v1855_v31 }
 0x1c6   : > { %5008 = vmatpush1.bf16.msra.mxu1 %v8755_v24  ;;  %4968 = vmatprep.subr.bf16.mxu0 %v8756_v1 }
 0x1c7   : > { %5009 = vmatprep.subr.bf16.mxu1 %v8538_v11  ;;  %4186 = vmatprep.mubr.msk.f32.mxu0 %vm611_vm4, %v2645_v43  ;;  %v7590_v57 = vrot.slane %v1852_v48, %v1864_v42  ;;  %v7592_v15 = vrot.slane %v1852_v48, %v1856_v38  ;;  %v7596_v35 = vrot.slane %v1852_v48, %v1860_v5 }
 0x1c8   : > { %4189 = vmatprep.mubr.msk.f32.mxu1 %vm611_vm4, %v2645_v43  ;;  %v8772_v43 = vld [vmem:[#allocation127_spill] sm:$0xff] }
 0x1c9   : > { %4970 = vmatpush1.bf16.msra.mxu0 %v8757_v61 }
 0x1ca   : > { %5011 = vmatpush1.bf16.msra.mxu1 %v8758_v30  ;;  %4972 = vmatprep.subr.bf16.mxu0 %v8759_v8  ;;  %v8773_v30 = vld [vmem:[#allocation126_spill] sm:$0xff] }
 0x1cb   : > { %5012 = vmatprep.subr.bf16.mxu1 %v8538_v11 }
 0x1cd   : > { %4974 = vmatpush1.bf16.msra.mxu0 %v8760_v12  ;;  %v8774_v12 = vld [vmem:[#allocation128_spill] sm:$0xff] }
 0x1ce   : > { %5014 = vmatpush1.bf16.msra.mxu1 %v8761_v46  ;;  %4976 = vmatprep.subr.bf16.mxu0 %v8762_v58 }
 0x1cf   : > { %5015 = vmatprep.subr.bf16.mxu1 %v8538_v11 }
 0x1d1   : > { %4978 = vmatpush1.bf16.msra.mxu0 %v8763_v32 }
 0x1d2   : > { %5017 = vmatpush1.bf16.msra.mxu1 %v8764_v39  ;;  %4980 = vmatprep.subr.bf16.mxu0 %v8765_v47 }
 0x1d3   : > { %5018 = vmatprep.subr.bf16.mxu1 %v8538_v11 }
 0x1d5   : > { %4982 = vmatpush1.bf16.msra.mxu0 %v8766_v50 }
 0x1d6   : > { %5020 = vmatpush1.bf16.msra.mxu1 %v8767_v14  ;;  %4984 = vmatprep.subr.bf16.mxu0 %v8768_v16  ;;  %v1837_v22 = vpop.f32.mrb[16].mxu1  ;;  %v8775_v16 = vld [vmem:[#allocation129_spill] sm:$0xff] }
 0x1d7   : > { %5021 = vmatprep.subr.bf16.mxu1 %v8538_v11  ;;  %v1848_v18 = vadd.f32 %v1837_v22, %v7519_v60  ;;  %v1839_v45 = vpop.f32.mrb[17].mxu1 }
 0x1d8   : > { %v1760_v63 = vpop.f32.mrb[0].mxu0 }
 0x1d9   : > { %4986 = vmatpush1.bf16.msra.mxu0 %v8769_v56  ;;  %v1871_v52 = vadd.f32 %v7590_v57, %v1848_v18  ;;  %v1869_v55 = vadd.f32 %v7592_v15, %v1760_v63  ;;  %v1762_v20 = vpop.f32.mrb[1].mxu0 }
 0x1da   : > { %5023 = vmatpush1.bf16.msra.mxu1 %v8770_v41  ;;  %v1870_v34 = vadd.f32 %v7596_v35, %v1762_v20  ;;  %4988 = vmatprep.subr.bf16.mxu0 %v8771_v25  ;;  %v1842_v44 = vpop.f32.mrb[18].mxu1 }
 0x1db   : > { %v1880_v2 = vrot.slane %v1871_v52, 1  ;;  %v1878_v27 = vrot.slane %v1869_v55, 1  ;;  %5024 = vmatprep.subr.bf16.mxu1 %v8538_v11  ;;  %v1851_v60 = vadd.f32 %v1842_v44, %v7529_v0  ;;  %v1844_v21 = vpop.f32.mrb[19].mxu1 }
 0x1dc   : > { %v1879_v9 = vrot.slane %v1870_v34, 1  ;;  %v1766_v10 = vpop.f32.mrb[2].mxu0  ;;  %v2641_v21 = vrot.slane %v8657_v29, 4 }
 0x1dd   : > { %v1886_v23 = vmax.f32 %v1871_v52, %v1880_v2  ;;  %v1884_v3 = vmax.f32 %v1869_v55, %v1878_v27  ;;  %4990 = vmatpush1.bf16.msra.mxu0 %v8772_v43  ;;  %v1874_v24 = vadd.f32 %v7590_v57, %v1851_v60  ;;  %v1872_v1 = vadd.f32 %v7592_v15, %v1766_v10  ;;  %v1768_v61 = vpop.f32.mrb[3].mxu0 }
 0x1de   : > { %v1885_v17 = vmax.f32 %v1870_v34, %v1879_v9  ;;  %5026 = vmatpush1.bf16.msra.mxu1 %v8773_v30  ;;  %v1873_v8 = vadd.f32 %v7596_v35, %v1768_v61  ;;  %4992 = vmatprep.subr.bf16.mxu0 %v8774_v12  ;;  %v2640_v60 = vrot.slane %v8656_v19, 4 }
 0x1df   : > { %v1902_v0 = vrot.slane %v1884_v3, 1  ;;  %v1892_v31 = vrot.slane %v1874_v24, 1  ;;  %v1890_v46 = vrot.slane %v1872_v1, 1  ;;  %5027 = vmatprep.subr.bf16.mxu1 %v8538_v11  ;;  %v1908_v58 = vrot.slane %v1884_v3, 2 }
 0x1e0   : > { %v1903_v32 = vrot.slane %v1885_v17, 1  ;;  %v1909_v42 = vrot.slane %v1885_v17, 2  ;;  %v1891_v38 = vrot.slane %v1873_v8, 1  ;;  %v1914_v39 = vrot.slane %v1884_v3, 3 }
 0x1e1   : > { %v1898_v47 = vmax.f32 %v1874_v24, %v1892_v31  ;;  %v1896_v48 = vmax.f32 %v1872_v1, %v1890_v46  ;;  %4994 = vmatpush1.bf16.msra.mxu0 %v7177_v13  ;;  %v1930_v5 = vsel %vm1929_vm2, %v1884_v3, %v1902_v0  ;;  %v1904_v50 = vrot.slane %v1886_v23, 1 }
 0x1e2   : > { %v1897_v14 = vmax.f32 %v1873_v8, %v1891_v38  ;;  %5029 = vmatpush1.bf16.msra.mxu1 %v8775_v16  ;;  %4996 = vmatprep.subr.bf16.mxu0 %v7180_v53  ;;  %v1934_v22 = vsel %vm1933_vm3, %v1930_v5, %v1908_v58  ;;  %v1910_v18 = vrot.slane %v1886_v23, 2  ;;  %v1916_v45 = vrot.slane %v1886_v23, 3 }
 0x1e3   : > { %v1923_v63 = vrot.slane %v1896_v48, 4  ;;  %5030 = vmatprep.subr.bf16.mxu1 %v8538_v11  ;;  %v1938_v56 = vsel %vm1937_vm6, %v1934_v22, %v1914_v39  ;;  %v1925_v52 = vrot.slane %v1898_v47, 4  ;;  %v1932_v13 = vsel %vm1929_vm2, %v1886_v23, %v1904_v50 }
 0x1e4   : > { %v1924_v55 = vrot.slane %v1897_v14, 4  ;;  %v1936_v20 = vsel %vm1933_vm3, %v1932_v13, %v1910_v18  ;;  %v1915_v41 = vrot.slane %v1885_v17, 3  ;;  %v1931_v34 = vsel %vm1929_vm2, %v1885_v17, %v1903_v32 }
 0x1e5   : > { %4998 = vmatpush1.bf16.msra.mxu0 %v7205_v54  ;;  %v1941_v53 = vsel %vm776_vm13, %v1938_v56, %v1923_v63  ;;  %v1940_v25 = vsel %vm1937_vm6, %v1936_v20, %v1916_v45  ;;  %v1935_v44 = vsel %vm1933_vm3, %v1931_v34, %v1909_v42 }
 0x1e6   : > { %5032 = vmatpush1.bf16.msra.mxu1 %v7189_v37  ;;  %5000 = vmatprep.subr.bf16.mxu0 %v7208_v36  ;;  %v7632_v2 = vsel %vm776_vm13, %v1940_v25, %v1925_v52  ;;  %v1939_v27 = vsel %vm1937_vm6, %v1935_v44, %v1915_v41  ;;  %v2642_v37 = vsel %vm776_vm13, %v2640_v60, %v2641_v21 }
 0x1e7   : > { %5033 = vmatprep.subr.bf16.mxu1 %v8538_v11  ;;  %1945 = vrot.lane.b32.xlu0 %v1941_v53, %s5366_s24  ;;  %v1942_v54 = vsel %vm776_vm13, %v1939_v27, %v1924_v55 }
 0x1e8   : > { %1955 = vrot.lane.b32.xlu1 %v7632_v2, %s5366_s24 }
 0x1e9   : > { %5002 = vmatpush1.bf16.msra.mxu0 %v7221_v40 }
 0x1ea   : > { %5035 = vmatpush1.bf16.msra.mxu1 %v7217_v4  ;;  %4184 = vmatprep.subr.msk.mxu0 %vm776_vm13, %v7230_v6  ;;  %v8776_v4 = vld [vmem:[#allocation8_spill] sm:$0xff] }
 0x1eb   : > { %2773 = vmatprep.subr.mxu1 %v8572_v7  ;;  %1950 = vrot.lane.b32.xlu0 %v1942_v54, %s5366_s24 }
 0x1ed   : > { %4185 = vmatpush1.msk.msra.mxu0 %vm776_vm13, %v7245_v28 }
 0x1ee   : > { %4188 = vmatpush1.msk.msra.mxu1 %vm776_vm13, %v7236_v26  ;;  %2717 = vmatmul.mubr.f32.vlgmr.msra.gmra.mrb[4].mxu0 %v2642_v37 }
 0x1ef   : > { %2794 = vmatmul.mubr.f32.vlgmr.msra.gmra.mrb[36].mxu1 %v2642_v37  ;;  %4187 = vmatprep.mubr.msk.f32.mxu0 %vm611_vm4, %v7556_v59 }
 0x1f0   : > { %4190 = vmatprep.mubr.msk.f32.mxu1 %vm611_vm4, %v7556_v59  ;;  %5080 = vmatprep.subr.bf16.mxu1 %v8538_v11 }
 0x1f2   : > { %2723 = vmatmul.mubr.f32.gmra.mrb[6].mxu0 %v2641_v21 }
 0x1f3   : > { %2799 = vmatmul.mubr.f32.gmra.mrb[38].mxu1 %v2641_v21  ;;  %4193 = vmatprep.mubr.msk.f32.mxu0 %vm611_vm4, %v8776_v4 }
 0x207   : > { %v2135_v36 = vpop.f32.mrb[20].mxu1 }
 0x208   : > { %v2137_v40 = vpop.f32.mrb[21].mxu1 }
 0x20b   : > { %v2140_v6 = vpop.f32.mrb[22].mxu1 }
 0x20c   : > { %v2142_v28 = vpop.f32.mrb[23].mxu1 }
 0x236   : > { %v2291_v26 = vpop.f32.mrb[24].mxu1 }
 0x237   : > { %v2292_v9 = vadd.f32 %v2291_v26, %v2135_v36  ;;  %v2293_v10 = vpop.f32.mrb[25].mxu1 }
 0x23a   : > { %v2296_v23 = vpop.f32.mrb[26].mxu1 }
 0x23b   : > { %v2297_v3 = vadd.f32 %v2296_v23, %v2140_v6  ;;  %v2298_v43 = vpop.f32.mrb[27].mxu1 }
 0x259   : > { %v1946_v24 = vpop.permute.xlu0 %1945 }
 0x25a   : > { %v7660_v1 = vmax.f32 %v1941_v53, %v1946_v24  ;;  %v1956_v6 = vpop.permute.xlu1 %1955 }
 0x25c   : > { %1960 = vrot.lane.b32.xlu1 %v7660_v1, %s5366_s24 }
 0x25d   : > { %v1951_v59 = vpop.permute.xlu0 %1950 }
 0x25e   : > { %v1953_v61 = vmax.f32 %v1942_v54, %v1951_v59 }
 0x260   : > { %1967 = vrot.lane.b32.xlu1 %v1953_v61, %s5367_s25  ;;  %1964 = vrot.lane.b32.xlu0 %v1953_v61, %s5368_s26 }
 0x265   : > { %v2455_v17 = vpop.f32.mrb[28].mxu1 }
 0x266   : > { %v2466_v30 = vadd.f32 %v2455_v17, %v2292_v9  ;;  %v2457_v8 = vpop.f32.mrb[29].mxu1  ;;  %v3145_v17 = vld [vmem:[%s8397_s12 + $0x8] sm:$0xff] }
 0x269   : > { %v2460_v12 = vpop.f32.mrb[30].mxu1 }
 0x26a   : > { %v2469_v0 = vadd.f32 %v2460_v12, %v2297_v3  ;;  %v2462_v31 = vpop.f32.mrb[31].mxu1 }
 0x294   : > { %v2625_v46 = vpop.f32.mrb[32].mxu1 }
 0x295   : > { %v2636_v58 = vadd.f32 %v2625_v46, %v2466_v30  ;;  %v2627_v32 = vpop.f32.mrb[33].mxu1 }
 0x298   : > { %v2630_v42 = vpop.f32.mrb[34].mxu1 }
 0x299   : > { %v2639_v38 = vadd.f32 %v2630_v42, %v2469_v0  ;;  %v2632_v39 = vpop.f32.mrb[35].mxu1 }
 0x2c1   : > { %v2718_v47 = vpop.f32.mrb[4].mxu0 }
 0x2c2   : > { %v2810_v48 = vadd.f32 %v2718_v47, %v7592_v15  ;;  %v2720_v5 = vpop.f32.mrb[5].mxu0  ;;  %v2795_v50 = vpop.f32.mrb[36].mxu1 }
 0x2c3   : > { %v2811_v14 = vadd.f32 %v2720_v5, %v7596_v35  ;;  %v2806_v16 = vadd.f32 %v2795_v50, %v2636_v58  ;;  %v2797_v22 = vpop.f32.mrb[37].mxu1 }
 0x2c4   : > { %v2819_v18 = vrot.slane %v2810_v48, 1 }
 0x2c5   : > { %v2820_v45 = vrot.slane %v2811_v14, 1  ;;  %v2812_v63 = vadd.f32 %v2806_v16, %v7590_v57  ;;  %v2724_v56 = vpop.f32.mrb[6].mxu0 }
 0x2c6   : > { %v2825_v52 = vmax.f32 %v2810_v48, %v2819_v18  ;;  %v2813_v13 = vadd.f32 %v2724_v56, %v7592_v15  ;;  %v2800_v55 = vpop.f32.mrb[38].mxu1  ;;  %v2726_v20 = vpop.f32.mrb[7].mxu0 }
 0x2c7   : > { %v2826_v41 = vmax.f32 %v2811_v14, %v2820_v45  ;;  %v2821_v34 = vrot.slane %v2812_v63, 1  ;;  %v2809_v53 = vadd.f32 %v2800_v55, %v2639_v38  ;;  %v2814_v25 = vadd.f32 %v2726_v20, %v7596_v35  ;;  %v2802_v44 = vpop.f32.mrb[39].mxu1  ;;  %v3147_v55 = vld [vmem:[%s8397_s12 + $0x18] sm:$0xff] }
 0x2c8   : > { %v2843_v27 = vrot.slane %v2825_v52, 1  ;;  %v2849_v54 = vrot.slane %v2825_v52, 2  ;;  %v2831_v60 = vrot.slane %v2813_v13, 1  ;;  %v2855_v21 = vrot.slane %v2825_v52, 3  ;;  %v2991_v44 = vld [vmem:[%s8394_s9 + $0x18] sm:$0xff] }
 0x2c9   : > { %v2844_v37 = vrot.slane %v2826_v41, 1  ;;  %v2850_v4 = vrot.slane %v2826_v41, 2  ;;  %v2827_v36 = vmax.f32 %v2812_v63, %v2821_v34  ;;  %v2815_v40 = vadd.f32 %v2809_v53, %v7590_v57  ;;  %v3144_v57 = vld [vmem:[%s8397_s12] sm:$0xff]  ;;  %v3149_v34 = vld [vmem:[%s8397_s12 + $0x28] sm:$0xff] }
 0x2ca   : > { %v2837_v28 = vmax.f32 %v2813_v13, %v2831_v60  ;;  %v2832_v15 = vrot.slane %v2814_v25, 1  ;;  %v2870_v26 = vsel %vm1929_vm2, %v2825_v52, %v2843_v27  ;;  %v2856_v9 = vrot.slane %v2826_v41, 3  ;;  %v3146_v13 = vld [vmem:[%s8397_s12 + $0x10] sm:$0xff]  ;;  %v3151_v60 = vld [vmem:[%s8397_s12 + $0x38] sm:$0xff] }
 0x2cb   : > { %v2845_v10 = vrot.slane %v2827_v36, 1  ;;  %v2833_v23 = vrot.slane %v2815_v40, 1  ;;  %v2873_v35 = vsel %vm1933_vm3, %v2870_v26, %v2849_v54  ;;  %v2871_v3 = vsel %vm1929_vm2, %v2826_v41, %v2844_v37  ;;  %v3148_v41 = vld [vmem:[%s8397_s12 + $0x20] sm:$0xff]  ;;  %v3150_v27 = vld [vmem:[%s8397_s12 + $0x30] sm:$0xff]  ;;  %v3153_v26 = vld [vmem:[%s8397_s12 + $0x48] sm:$0xff] }
 0x2cc   : > { %v2864_v43 = vrot.slane %v2837_v28, 4  ;;  %v2838_v24 = vmax.f32 %v2814_v25, %v2832_v15  ;;  %v2876_v59 = vsel %vm1937_vm6, %v2873_v35, %v2855_v21  ;;  %v2874_v61 = vsel %vm1933_vm3, %v2871_v3, %v2850_v4  ;;  %v2989_v25 = vld [vmem:[%s8394_s9 + $0x8] sm:$0xff]  ;;  %v2988_v21 = vld [vmem:[%s8394_s9] sm:$0xff]  ;;  %v2990_v37 = vld [vmem:[%s8394_s9 + $0x10] sm:$0xff] }
 0x2cd   : > { %v2839_v30 = vmax.f32 %v2815_v40, %v2833_v23  ;;  %v2877_v8 = vsel %vm1937_vm6, %v2874_v61, %v2856_v9  ;;  %v2851_v12 = vrot.slane %v2827_v36, 2  ;;  %v2857_v0 = vrot.slane %v2827_v36, 3  ;;  %v2993_v40 = vld [vmem:[%s8394_s9 + $0x28] sm:$0xff]  ;;  %v3152_v28 = vld [vmem:[%s8397_s12 + $0x40] sm:$0xff]  ;;  %v3155_v61 = vld [vmem:[%s8397_s12 + $0x58] sm:$0xff] }
 0x2ce   : > { %v2865_v31 = vrot.slane %v2838_v24, 4  ;;  %v7685_v46 = vsel %vm776_vm13, %v2876_v59, %v2864_v43  ;;  %v1961_v58 = vpop.permute.xlu1 %1960  ;;  %v2872_v32 = vsel %vm1929_vm2, %v2827_v36, %v2845_v10  ;;  %v7688_v42 = vpack.c.bf16 %v3145_v17, %v3144_v57  ;;  %v2992_v9 = vld [vmem:[%s8394_s9 + $0x20] sm:$0xff]  ;;  %v2994_v10 = vld [vmem:[%s8394_s9 + $0x30] sm:$0xff]  ;;  %v2997_v3 = vld [vmem:[%s8394_s9 + $0x48] sm:$0xff] }
 0x2cf   : > { %v7691_v38 = vmax.f32 %v7632_v2, %v1956_v6  ;;  %v2866_v39 = vrot.slane %v2839_v30, 4  ;;  %2883 = vrot.lane.b32.xlu1 %v7685_v46, %s5366_s24  ;;  %v2875_v47 = vsel %vm1933_vm3, %v2872_v32, %v2851_v12  ;;  %v1971_v2 = vsel %vm1970_vm7, %v7660_v1, %v1961_v58  ;;  %v2995_v6 = vld [vmem:[%s8394_s9 + $0x38] sm:$0xff]  ;;  %v3154_v24 = vld [vmem:[%s8397_s12 + $0x50] sm:$0xff]  ;;  %v2996_v57 = vld [vmem:[%s8394_s9 + $0x40] sm:$0xff] }
 0x2d0   : > { %v7697_v48 = vsel %vm776_vm13, %v2877_v8, %v2865_v31  ;;  %v2878_v5 = vsel %vm1937_vm6, %v2875_v47, %v2857_v0  ;;  %5082 = vmatpush1.bf16.msra.mxu1 %v7688_v42  ;;  %v7727_v20 = vpack.c.bf16 %v3147_v55, %v3146_v13  ;;  %v7737_v53 = vpack.c.bf16 %v3149_v34, %v3148_v41  ;;  %v2999_v43 = vld [vmem:[%s8394_s9 + $0x58] sm:$0xff]  ;;  %v2998_v17 = vld [vmem:[%s8394_s9 + $0x50] sm:$0xff]  ;;  %v3001_v12 = vld [vmem:[%s8394_s9 + $0x68] sm:$0xff] }
 0x2d1   : > { %v7702_v50 = vsel %vm776_vm13, %v2878_v5, %v2866_v39  ;;  %5083 = vmatprep.subr.bf16.mxu1 %v8538_v11  ;;  %v2912_v22 = vmul.f32 %v7691_v38, %v7691_v38  ;;  %v7750_v54 = vpack.c.bf16 %v2991_v44, %v2989_v25  ;;  %v7761_v4 = vpack.c.bf16 %v3151_v60, %v3150_v27  ;;  %v3003_v0 = vld [vmem:[%s8394_s9 + $0x78] sm:$0xff]  ;;  %v3156_v31 = vld [vmem:[%s8397_s12 + $0x60] sm:$0xff]  ;;  %v3157_v32 = vld [vmem:[%s8397_s12 + $0x68] sm:$0xff] }
 0x2d2   : > { %v1968_v14 = vpop.permute.xlu1 %1967  ;;  %v1965_v16 = vpop.permute.xlu0 %1964  ;;  %v7763_v36 = vpack.c.bf16 %v2990_v37, %v2988_v21  ;;  %v7778_v15 = vpack.c.bf16 %v2995_v6, %v2993_v40  ;;  %v7789_v23 = vpack.c.bf16 %v3153_v26, %v3152_v28  ;;  %v7791_v35 = vpack.c.bf16 %v2994_v10, %v2992_v9  ;;  %v3000_v39 = vld [vmem:[%s8394_s9 + $0x60] sm:$0xff]  ;;  %v3002_v47 = vld [vmem:[%s8394_s9 + $0x70] sm:$0xff]  ;;  %v3005_v5 = vld [vmem:[%s8394_s9 + $0x88] sm:$0xff] }
 0x2d3   : > { %2888 = vrot.lane.b32.xlu1 %v7697_v48, %s5366_s24  ;;  %v1973_v18 = vsel %vm1972_vm8, %v1971_v2, %v1965_v16  ;;  %v2917_v56 = vsel %vm2916_vm10, %v2912_v22, 0.0  ;;  %5037 = vmatprep.subr.bf16.mxu0 %v7750_v54  ;;  %v7805_v59 = vpack.c.bf16 %v2999_v43, %v2997_v3  ;;  %v7817_v30 = vpack.c.bf16 %v3155_v61, %v3154_v24  ;;  %v3007_v2 = vld [vmem:[%s8394_s9 + $0x98] sm:$0xff]  ;;  %v3158_v22 = vld [vmem:[%s8397_s12 + $0x70] sm:$0xff]  ;;  %v3160_v34 = vld [vmem:[%s8397_s12 + $0x80] sm:$0xff] }
 0x2d4   : > { %v7713_v45 = vsel %vm1974_vm9, %v1973_v18, %v1968_v14  ;;  %5085 = vmatpush1.bf16.msra.mxu1 %v7727_v20  ;;  %5039 = vmatpush1.bf16.msra.mxu0 %v7763_v36  ;;  %v7819_v8 = vpack.c.bf16 %v2998_v17, %v2996_v57  ;;  %v7831_v58 = vpack.c.bf16 %v3003_v0, %v3001_v12  ;;  %v3011_v13 = vld [vmem:[%s8394_s9 + $0xb8] sm:$0xff]  ;;  %v3161_v44 = vld [vmem:[%s8397_s12 + $0x88] sm:$0xff]  ;;  %v3008_v27 = vld [vmem:[%s8394_s9 + $0xa0] sm:$0xff] }
 0x2d5   : > { %v2911_v63 = vmul.f32 %v7713_v45, %v7713_v45  ;;  %5086 = vmatprep.subr.bf16.mxu1 %v8538_v11  ;;  %5041 = vmatprep.subr.bf16.mxu0 %v7778_v15  ;;  %v7850_v14 = vpack.c.bf16 %v3157_v32, %v3156_v31  ;;  %v7852_v16 = vpack.c.bf16 %v3002_v47, %v3000_v39  ;;  %v3010_v60 = vld [vmem:[%s8394_s9 + $0xb0] sm:$0xff]  ;;  %v3013_v21 = vld [vmem:[%s8394_s9 + $0xc8] sm:$0xff]  ;;  %v3015_v37 = vld [vmem:[%s8394_s9 + $0xd8] sm:$0xff] }
 0x2d6   : > { %v7859_v18 = vpack.c.bf16 %v3007_v2, %v3005_v5  ;;  %v7906_v40 = vpack.c.bf16 %v3161_v44, %v3160_v34  ;;  %v7908_v6 = vpack.c.bf16 %v3010_v60, %v3008_v27  ;;  %v3162_v28 = vld [vmem:[%s8397_s12 + $0x90] sm:$0xff]  ;;  %v7915_v26 = vpack.c.bf16 %v3015_v37, %v3013_v21  ;;  %v3163_v9 = vld [vmem:[%s8397_s12 + $0x98] sm:$0xff]  ;;  %v3012_v10 = vld [vmem:[%s8394_s9 + $0xc0] sm:$0xff] }
 0x2d7   : > { %2893 = vrot.lane.b32.xlu1 %v7702_v50, %s5366_s24  ;;  %v2915_v1 = vsel %vm1423_vm15, %v2911_v63, 0.0  ;;  %v3159_v63 = vld [vmem:[%s8397_s12 + $0x78] sm:$0xff]  ;;  %v3014_v3 = vld [vmem:[%s8394_s9 + $0xd0] sm:$0xff]  ;;  %v7928_v43 = vpack.c.bf16 %v3163_v9, %v3162_v28  ;;  %v3017_v61 = vld [vmem:[%s8394_s9 + $0xe8] sm:$0xff] }
 0x2d8   : > { %v2918_v52 = vadd.f32 %v2917_v56, %v2915_v1  ;;  %5088 = vmatpush1.bf16.msra.mxu1 %v7737_v53  ;;  %5043 = vmatpush1.bf16.msra.mxu0 %v7791_v35  ;;  %v3004_v1 = vld [vmem:[%s8394_s9 + $0x80] sm:$0xff]  ;;  %v3006_v56 = vld [vmem:[%s8394_s9 + $0x90] sm:$0xff]  ;;  %v7878_v55 = vpack.c.bf16 %v3159_v63, %v3158_v22  ;;  %v7930_v24 = vpack.c.bf16 %v3014_v3, %v3012_v10  ;;  %v3019_v57 = vld [vmem:[%s8394_s9 + $0xf8] sm:$0xff] }
 0x2d9   : > { %5089 = vmatprep.subr.bf16.mxu1 %v8538_v11  ;;  %5045 = vmatprep.subr.bf16.mxu0 %v7805_v59  ;;  %v7880_v41 = vpack.c.bf16 %v3006_v56, %v3004_v1  ;;  %v7942_v17 = vpack.c.bf16 %v3019_v57, %v3017_v61  ;;  %v3016_v12 = vld [vmem:[%s8394_s9 + $0xe0] sm:$0xff]  ;;  %v3018_v0 = vld [vmem:[%s8394_s9 + $0xf0] sm:$0xff]  ;;  %v3021_v32 = vld [vmem:[%s8394_s9 + $0x108] sm:$0xff] }
 0x2da   : > { %2919 = vadd.xlane.f32.xlu0 %v2918_v52  ;;  %v3009_v52 = vld [vmem:[%s8394_s9 + $0xa8] sm:$0xff]  ;;  %v7951_v31 = vpack.c.bf16 %v3018_v0, %v3016_v12  ;;  %v3023_v39 = vld [vmem:[%s8394_s9 + $0x118] sm:$0xff]  ;;  %v3020_v47 = vld [vmem:[%s8394_s9 + $0x100] sm:$0xff] }
 0x2db   : > { %v7887_v25 = vpack.c.bf16 %v3011_v13, %v3009_v52  ;;  %v7964_v5 = vpack.c.bf16 %v3023_v39, %v3021_v32  ;;  %v3025_v2 = vld [vmem:[%s8394_s9 + $0x128] sm:$0xff]  ;;  %v3027_v22 = vld [vmem:[%s8394_s9 + $0x138] sm:$0xff]  ;;  %v3024_v56 = vld [vmem:[%s8394_s9 + $0x120] sm:$0xff] }
 0x2dc   : > { %5091 = vmatpush1.bf16.msra.mxu1 %v7761_v4  ;;  %5047 = vmatpush1.bf16.msra.mxu0 %v7819_v8  ;;  %v7977_v1 = vpack.c.bf16 %v3027_v22, %v3025_v2  ;;  %v3026_v52 = vld [vmem:[%s8394_s9 + $0x130] sm:$0xff]  ;;  %v3029_v13 = vld [vmem:[%s8394_s9 + $0x148] sm:$0xff]  ;;  %v3031_v34 = vld [vmem:[%s8394_s9 + $0x158] sm:$0xff] }
 0x2dd   : > { %5092 = vmatprep.subr.bf16.mxu1 %v8538_v11  ;;  %5049 = vmatprep.subr.bf16.mxu0 %v7831_v58  ;;  %v7993_v44 = vpack.c.bf16 %v3026_v52, %v3024_v56  ;;  %v7996_v27 = vpack.c.bf16 %v3031_v34, %v3029_v13  ;;  %v3028_v60 = vld [vmem:[%s8394_s9 + $0x140] sm:$0xff]  ;;  %v3030_v21 = vld [vmem:[%s8394_s9 + $0x150] sm:$0xff]  ;;  %v8011_v28 = vld [vmem:[%s8394_s9 + $0x168] sm:$0xf] }
 0x2de   : > { %v8005_v37 = vpack.c.bf16 %v3030_v21, %v3028_v60  ;;  %v8019_v9 = vld [vmem:[%s8394_s9 + $0x160] sm:$0xf]  ;;  %v8777_v10 = vld [vmem:[#allocation9_spill] sm:$0xff] }
 0x2df   : > { %v2949_v56 = vld [vmem:[#allocation3 + $0x8] sm:$0x1f]  ;;  %v2948_v52 = vld [vmem:[#allocation3] sm:$0x1f] }
 0x2e0   : > { %5094 = vmatpush1.bf16.msra.mxu1 %v7789_v23  ;;  %5051 = vmatpush1.bf16.msra.mxu0 %v7852_v16  ;;  %v8042_v34 = vld [vmem:[%s8390_s5 + $0x8] sm:$0x1f]  ;;  %v8047_v60 = vld [vmem:[%s8390_s5] sm:$0x1f] }
 0x2e1   : > { %5095 = vmatprep.subr.bf16.mxu1 %v8538_v11  ;;  %5053 = vmatprep.subr.bf16.mxu0 %v7859_v18 }
 0x2e4   : > { %5097 = vmatpush1.bf16.msra.mxu1 %v7817_v30  ;;  %5055 = vmatpush1.bf16.msra.mxu0 %v7880_v41 }
 0x2e5   : > { %5098 = vmatprep.subr.bf16.mxu1 %v8538_v11  ;;  %5057 = vmatprep.subr.bf16.mxu0 %v7887_v25 }
 0x2e8   : > { %5100 = vmatpush1.bf16.msra.mxu1 %v7850_v14  ;;  %5059 = vmatpush1.bf16.msra.mxu0 %v7908_v6 }
 0x2e9   : > { %5101 = vmatprep.subr.bf16.mxu1 %v8538_v11  ;;  %5061 = vmatprep.subr.bf16.mxu0 %v7915_v26 }
 0x2ec   : > { %5103 = vmatpush1.bf16.msra.mxu1 %v7878_v55  ;;  %5063 = vmatpush1.bf16.msra.mxu0 %v7930_v24 }
 0x2ed   : > { %5104 = vmatprep.subr.bf16.mxu1 %v8538_v11  ;;  %5065 = vmatprep.subr.bf16.mxu0 %v7942_v17 }
 0x2f0   : > { %5106 = vmatpush1.bf16.msra.mxu1 %v7906_v40  ;;  %5067 = vmatpush1.bf16.msra.mxu0 %v7951_v31 }
 0x2f1   : > { %5107 = vmatprep.subr.bf16.mxu1 %v8538_v11  ;;  %5069 = vmatprep.subr.bf16.mxu0 %v7964_v5 }
 0x2f4   : > { %5109 = vmatpush1.bf16.msra.mxu1 %v7928_v43 }
 0x2f5   : > { %5147 = vmatprep.subr.bf16.mxu1 %v7750_v54  ;;  %v3022_v54 = vld [vmem:[%s8394_s9 + $0x110] sm:$0xff] }
 0x2f6   : > { %v7975_v63 = vpack.c.bf16 %v3022_v54, %v3020_v47 }
 0x2f8   : > { %5071 = vmatpush1.bf16.msra.mxu0 %v7975_v63 }
 0x2f9   : > { %5073 = vmatprep.subr.bf16.mxu0 %v7977_v1 }
 0x2fc   : > { %5075 = vmatpush1.bf16.msra.mxu0 %v7993_v44 }
 0x2fd   : > { %5077 = vmatprep.subr.bf16.mxu0 %v7996_v27 }
 0x300   : > { %5079 = vmatpush1.bf16.msra.mxu0 %v8005_v37 }
 0x301   : > { %4191 = vmatprep.subr.msk.mxu0 %vm776_vm13, %v8011_v28 }
 0x304   : > { %4192 = vmatpush1.msk.msra.mxu0 %vm776_vm13, %v8019_v9 }
 0x305   : > { %3105 = vmatmul.mubr.f32.vlgmr.msra.gmra.mrb[8].mxu0 %v5803_v49  ;;  %5110 = vmatprep.subr.bf16.mxu0 %v8538_v11 }
 0x306   : > { %4194 = vmatprep.mubr.msk.f32.mxu0 %vm611_vm4, %v8777_v10 }
 0x309   : > { %3111 = vmatmul.mubr.f32.gmra.mrb[10].mxu0 %v5805_v51 }
 0x341   : > { %v2884_v3 = vpop.permute.xlu1 %2883 }
 0x342   : > { %v8029_v61 = vmax.f32 %v7685_v46, %v2884_v3 }
 0x344   : > { %2898 = vrot.lane.b32.xlu1 %v8029_v61, %s5366_s24  ;;  %s5325_s24 = scalar_lea.vmem %s3800_s23, 32 }
 0x345   : > { %v2889_v57 = vpop.permute.xlu1 %2888  ;;  %p5326_p6 = scmp.ne.s32.totalorder %s3800_s23, %s5325_s24  ;;  %p5333_p10 = scmp.lt.s32.totalorder %s5325_s24, %s5325_s24 }
 0x346   : > { %v2891_v12 = vmax.f32 %v7697_v48, %v2889_v57 }
 0x347   : > { %p5327_p7 = pnand %p5326_p6, %p5292_p5  ;;  %p5334_p11 = por %p5333_p10, %p5332_p9 }
 0x348   : > { %2902 = vrot.lane.b32.xlu1 %v2891_v12, %s5368_s26 }
 0x349   : > { %p5328_p8 = pneg %p5327_p7 }
 0x34b   : > { %p5335_p12 = pnand %p5334_p11, %p5328_p8 }
 0x34c   : > { %2905 = vrot.lane.b32.xlu1 %v2891_v12, %s5367_s25 }
 0x367   : > { %v2920_v49 = vpop.xlane.xlu0 %2919 }
 0x368   : > { %v2926_v0 = vsel %vm1423_vm15, %v2920_v49, 0.0  ;;  %v8059_v49 = vld [vmem:[%s8391_s6] sm:$0x1f] }
 0x369   : > { %v2927_v32 = vrot.slane %v2926_v0, 4 }
 0x36b   : > { %v2928_v39 = vadd.f32 %v2927_v32, %v2926_v0 }
 0x36d   : > { %v2929_v51 = vrot.slane %v2928_v39, 2 }
 0x36f   : > { %v2930_v47 = vadd.f32 %v2929_v51, %v2928_v39 }
 0x371   : > { %v2931_v54 = vrot.slane %v2930_v47, 1 }
 0x373   : > { %v2932_v46 = vadd.f32 %v2931_v54, %v2930_v47 }
 0x375   : > { %v2940_v2 = vmax.f32 %v2932_v46, 1e-24  ;;  %v8164_v46 = vld [vmem:[%s8395_s10 + $0x18] sm:$0x7f] }
 0x377   : > { %5310 = vrsqrt.f32 %v2940_v2 }
 0x381   : > { %v5311_v22 = vpop.eup %5310 }
 0x382   : > { %v2945_v48 = vmul.f32 %v5311_v22, %v7691_v38  ;;  %v2944_v13 = vmul.f32 %v5311_v22, %v7713_v45  ;;  %v8054_v45 = vld [vmem:[%s8391_s6 + $0x8] sm:$0x1f] }
 0x384   : > { %v2953_v21 = vadd.f32 %v2949_v56, %v2945_v48  ;;  %v2952_v10 = vadd.f32 %v2948_v52, %v2944_v13 }
 0x386   : > { %v2959_v3 = vsub.f32 %v2953_v21, %v8042_v34  ;;  %v2958_v57 = vsub.f32 %v2952_v10, %v8047_v60 }
 0x388   : > { %v2963_v12 = vmax.f32 %v2959_v3, 0.0  ;;  %v2962_v38 = vmax.f32 %v2958_v57, 0.0 }
 0x38a   : > { %vm2967_vm11 = vcmp.eq.f32.partialorder %v2963_v12, 0.0  ;;  %4195 = vmatprep.mubr.msk.f32.mxu1 %vm1970_vm7, %v2963_v12  ;;  %vm2966_vm12 = vcmp.eq.f32.partialorder %v2962_v38, 0.0 }
 0x38b   : > { %v2971_v0 = vsel %vm2967_vm11, %v2953_v21, 0.0  ;;  %3232 = vmatmul.mubr.f32.vlgmr.msra.gmra.mrb[40].mxu1 %v2962_v38  ;;  %v2970_v32 = vsel %vm2966_vm12, %v2952_v10, 0.0 }
 0x38c   : > { %v2977_v39 = vmul.f32 %v8054_v45, %v2971_v0  ;;  %5149 = vmatpush1.bf16.msra.mxu1 %v7763_v36  ;;  %v2976_v51 = vmul.f32 %v8059_v49, %v2970_v32  ;;  %4202 = vmatprep.mubr.msk.f32.mxu1 %vm611_vm4, %v6669_v62  ;;  %v2894_v62 = vpop.permute.xlu1 %2893 }
 0x38d   : > { %5151 = vmatprep.subr.bf16.mxu1 %v7778_v15  ;;  %v8095_v15 = vmax.f32 %v7702_v50, %v2894_v62 }
 0x38e   : > { %v2981_v47 = vmax.f32 %v2977_v39, 0.0  ;;  %v2980_v54 = vmax.f32 %v2976_v51, 0.0 }
 0x390   : > { %2985 = vst.msk [vmem:[#allocation3 + $0x8] sm:$0x1f] %vm2916_vm10, %v2981_v47  ;;  %5153 = vmatpush1.bf16.msra.mxu1 %v7791_v35  ;;  %2984 = vst [vmem:[#allocation3] sm:$0x1f] %v2980_v54 }
 0x391   : > { %5155 = vmatprep.subr.bf16.mxu1 %v7805_v59 }
 0x394   : > { %5157 = vmatpush1.bf16.msra.mxu1 %v7819_v8  ;;  %v2914_v8 = vmul.f32 %v8095_v15, %v8095_v15 }
 0x395   : > { %5159 = vmatprep.subr.bf16.mxu1 %v7831_v58 }
 0x398   : > { %5161 = vmatpush1.bf16.msra.mxu1 %v7852_v16 }
 0x399   : > { %5163 = vmatprep.subr.bf16.mxu1 %v7859_v18 }
 0x39c   : > { %5165 = vmatpush1.bf16.msra.mxu1 %v7880_v41 }
 0x39d   : > { %5167 = vmatprep.subr.bf16.mxu1 %v7887_v25  ;;  %v3267_v25 = vld [vmem:[%s8399_s14 + $0x8] sm:$0xff] }
 0x3a0   : > { %5169 = vmatpush1.bf16.msra.mxu1 %v7908_v6 }
 0x3a1   : > { %5171 = vmatprep.subr.bf16.mxu1 %v7915_v26  ;;  %v3268_v26 = vld [vmem:[%s8399_s14 + $0x10] sm:$0xff] }
 0x3a4   : > { %5173 = vmatpush1.bf16.msra.mxu1 %v7930_v24  ;;  %v3269_v24 = vld [vmem:[%s8399_s14 + $0x18] sm:$0xff] }
 0x3a5   : > { %5175 = vmatprep.subr.bf16.mxu1 %v7942_v17  ;;  %v5114_v17 = vpack.c.bf16 %v3269_v24, %v3268_v26  ;;  %v3247_v24 = vld [vmem:[%s8396_s11] sm:$0xff] }
 0x3a8   : > { %5177 = vmatpush1.bf16.msra.mxu1 %v7951_v31  ;;  %v3270_v31 = vld [vmem:[%s8399_s14 + $0x20] sm:$0xff] }
 0x3a9   : > { %5179 = vmatprep.subr.bf16.mxu1 %v7964_v5  ;;  %v3271_v5 = vld [vmem:[%s8399_s14 + $0x28] sm:$0xff] }
 0x3ac   : > { %5181 = vmatpush1.bf16.msra.mxu1 %v7975_v63  ;;  %v5117_v63 = vpack.c.bf16 %v3271_v5, %v3270_v31 }
 0x3ad   : > { %5183 = vmatprep.subr.bf16.mxu1 %v7977_v1  ;;  %v3272_v1 = vld [vmem:[%s8399_s14 + $0x30] sm:$0x3] }
 0x3b0   : > { %5185 = vmatpush1.bf16.msra.mxu1 %v7993_v44  ;;  %v8148_v44 = vld [vmem:[%s8395_s10 + $0x8] sm:$0xff] }
 0x3b1   : > { %5187 = vmatprep.subr.bf16.mxu1 %v7996_v27 }
 0x3b4   : > { %5189 = vmatpush1.bf16.msra.mxu1 %v8005_v37  ;;  %v8153_v37 = vld [vmem:[%s8395_s10] sm:$0xff] }
 0x3b5   : > { %4200 = vmatprep.subr.msk.mxu1 %vm776_vm13, %v8011_v28 }
 0x3b6   : > { %v2899_v36 = vpop.permute.xlu1 %2898 }
 0x3b7   : > { %v2908_v59 = vsel %vm1970_vm7, %v8029_v61, %v2899_v36  ;;  %v8159_v61 = vld [vmem:[%s8395_s10 + $0x10] sm:$0x7f]  ;;  %v8178_v36 = vld [vmem:[%s8398_s13] sm:$0x1f] }
 0x3b8   : > { %4201 = vmatpush1.msk.msra.mxu1 %vm776_vm13, %v8019_v9  ;;  %vm3133_vm13 = vcmask 179200  }
 0x3b9   : > { %3493 = vmatmul.mubr.f32.vlgmr.msra.gmra.mrb[42].mxu1 %v8656_v19  ;;  %5220 = vmatprep.subr.bf16.mxu1 %v8538_v11 }
 0x3ba   : > { %v2903_v35 = vpop.permute.xlu1 %2902  ;;  %4203 = vmatprep.mubr.msk.f32.mxu1 %vm611_vm4, %v6671_v33  ;;  %v2922_v33 = vsel %vm2916_vm10, %v2914_v8, 0.0  ;;  %vm5369_vm4 = vmmov 0  }
 0x3bb   : > { %v2909_v58 = vsel %vm1972_vm8, %v2908_v59, %v2903_v35  ;;  %4246 = vmatprep.mubr.msk.f32.mxu0 %vm5369_vm4, %v8572_v7 }
 0x3bd   : > { %3499 = vmatmul.mubr.f32.gmra.mrb[44].mxu1 %v8657_v29  ;;  %v3266_v29 = vld [vmem:[%s8399_s14] sm:$0xff] }
 0x3be   : > { %v2906_v19 = vpop.permute.xlu1 %2905  ;;  %v5111_v6 = vpack.c.bf16 %v3267_v25, %v3266_v29  ;;  %4263 = vmatprep.mubr.msk.f32.mxu1 %vm5369_vm4, %v8572_v7 }
 0x3bf   : > { %v8106_v16 = vsel %vm1974_vm9, %v2909_v58, %v2906_v19 }
 0x3c0   : > { %v2913_v50 = vmul.f32 %v8106_v16, %v8106_v16  ;;  %5112 = vmatpush3.bf16.msra.mxu0 %v5111_v6  ;;  %5222 = vmatpush3.bf16.msra.mxu1 %v5111_v6 }
 0x3c1   : > { %5113 = vmatprep.subr.bf16.mxu0 %v8538_v11  ;;  %5223 = vmatprep.subr.bf16.mxu1 %v8538_v11 }
 0x3c2   : > { %v2921_v18 = vsel %vm1423_vm15, %v2913_v50, 0.0 }
 0x3c3   : > { %v2923_v41 = vadd.f32 %v2922_v33, %v2921_v18 }
 0x3c4   : > { %5115 = vmatpush3.bf16.msra.mxu0 %v5114_v17  ;;  %5225 = vmatpush3.bf16.msra.mxu1 %v5114_v17  ;;  %v3248_v17 = vld [vmem:[%s8396_s11 + $0x8] sm:$0xff] }
 0x3c5   : > { %2924 = vadd.xlane.f32.xlu1 %v2923_v41  ;;  %5116 = vmatprep.subr.bf16.mxu0 %v8538_v11  ;;  %v8188_v5 = vpack.c.bf16 %v3248_v17, %v3247_v24  ;;  %v3264_v17 = vld [vmem:[%s8396_s11 + $0x88] sm:$0xff] }
 0x3c6   : > { %5226 = vmatprep.subr.bf16.mxu1 %v8538_v11 }
 0x3c8   : > { %5118 = vmatpush3.bf16.msra.mxu0 %v5117_v63  ;;  %5228 = vmatpush3.bf16.msra.mxu1 %v5117_v63 }
 0x3c9   : > { %4244 = vmatprep.subr.mxu0 %v8572_v7  ;;  %4261 = vmatprep.subr.mxu1 %v8572_v7 }
 0x3cc   : > { %4245 = vmatpush3.msk.msra.mxu0 %vm1933_vm3, %v3272_v1  ;;  %4262 = vmatpush3.msk.msra.mxu1 %vm1933_vm3, %v3272_v1  ;;  %v2951_v1 = vld [vmem:[#allocation3 + $0x18] sm:$0x1f] }
 0x3cd   : > { %5119 = vmatprep.subr.bf16.mxu0 %v8538_v11  ;;  %5229 = vmatprep.subr.bf16.mxu1 %v8538_v11 }
 0x3d8   : > { %v3106_v27 = vpop.f32.mrb[8].mxu0 }
 0x3d9   : > { %v3108_v28 = vpop.f32.mrb[9].mxu0  ;;  %v3121_v2 = vmul.f32 %v8153_v37, %v3106_v27 }
 0x3da   : > { %v3122_v9 = vmul.f32 %v8148_v44, %v3108_v28 }
 0x3dc   : > { %v3112_v22 = vpop.f32.mrb[10].mxu0  ;;  %v3134_v48 = vsel %vm3133_vm13, %v3122_v9, 0.0  ;;  %v3249_v9 = vld [vmem:[%s8396_s11 + $0x10] sm:$0xff] }
 0x3dd   : > { %v3123_v56 = vmul.f32 %v8159_v61, %v3112_v22  ;;  %v3114_v52 = vpop.f32.mrb[11].mxu0  ;;  %v2950_v22 = vld [vmem:[#allocation3 + $0x10] sm:$0x1f] }
 0x3de   : > { %v3124_v13 = vmul.f32 %v8164_v46, %v3114_v52 }
 0x3df   : > { %v3125_v21 = vsel %vm763_vm5, %v3123_v56, 0.0 }
 0x3e0   : > { %v8171_v10 = vadd.f32 %v3125_v21, %v3121_v2  ;;  %v3136_v3 = vsel %vm3135_vm0, %v3124_v13, 0.0  ;;  %v3250_v2 = vld [vmem:[%s8396_s11 + $0x18] sm:$0xff] }
 0x3e1   : > { %v3137_v57 = vadd.f32 %v3136_v3, %v3134_v48  ;;  %v8200_v48 = vpack.c.bf16 %v3250_v2, %v3249_v9  ;;  %v3251_v3 = vld [vmem:[%s8396_s11 + $0x20] sm:$0xff] }
 0x3e3   : > { %v3138_v39 = vrot.slane %v3137_v57, 4 }
 0x3e5   : > { %v3139_v54 = vadd.f32 %v3138_v39, %v3137_v57  ;;  %v3254_v39 = vld [vmem:[%s8396_s11 + $0x38] sm:$0xff] }
 0x3e7   : > { %v3140_v19 = vrot.slane %v3139_v54, 2 }
 0x3e9   : > { %v3141_v41 = vadd.f32 %v3140_v19, %v3139_v54  ;;  %v3127_v19 = vrot.slane %v8171_v10, 4 }
 0x3eb   : > { %v3142_v6 = vrot.slane %v3141_v41, 1 }
 0x3ed   : > { %v3143_v63 = vadd.f32 %v3142_v6, %v3141_v41  ;;  %v3128_v41 = vadd.f32 %v3127_v19, %v8171_v10  ;;  %v3262_v6 = vld [vmem:[%s8396_s11 + $0x78] sm:$0xff]  ;;  %v3263_v10 = vld [vmem:[%s8396_s11 + $0x80] sm:$0xff] }
 0x3ee   : > { %v3426_v19 = vld [vmem:[%s8400_s15] sm:$0x1] }
 0x452   : > { %v2925_v12 = vpop.xlane.xlu1 %2924 }
 0x453   : > { %v2933_v38 = vsel %vm1423_vm15, %v2925_v12, 0.0  ;;  %vm3273_vm15 = vcmask 408576  }
 0x454   : > { %v2934_v0 = vrot.slane %v2933_v38, 4 }
 0x456   : > { %v2935_v32 = vadd.f32 %v2934_v0, %v2933_v38 }
 0x458   : > { %v2936_v51 = vrot.slane %v2935_v32, 2 }
 0x45a   : > { %v2937_v47 = vadd.f32 %v2936_v51, %v2935_v32  ;;  %v3253_v32 = vld [vmem:[%s8396_s11 + $0x30] sm:$0xff] }
 0x45b   : > { %v8226_v51 = vpack.c.bf16 %v3254_v39, %v3253_v32 }
 0x45c   : > { %v2938_v62 = vrot.slane %v2937_v47, 1 }
 0x45e   : > { %v2939_v35 = vadd.f32 %v2938_v62, %v2937_v47  ;;  %v3233_v59 = vpop.f32.mrb[40].mxu1  ;;  %v3255_v62 = vld [vmem:[%s8396_s11 + $0x40] sm:$0xff] }
 0x45f   : > { %v3238_v8 = vmul.f32 %v8178_v36, %v3233_v59  ;;  %v3235_v58 = vpop.f32.mrb[41].mxu1 }
 0x460   : > { %v2941_v50 = vmax.f32 %v2939_v35, 1e-24  ;;  %v3256_v35 = vld [vmem:[%s8396_s11 + $0x48] sm:$0xff] }
 0x461   : > { %v3240_v18 = vsel %vm3239_vm1, %v3238_v8, 0.0  ;;  %v8238_v58 = vpack.c.bf16 %v3256_v35, %v3255_v62 }
 0x462   : > { %5312 = vrsqrt.f32 %v2941_v50  ;;  %v3241_v33 = vrot.slane %v3240_v18, 4 }
 0x464   : > { %v3242_v29 = vadd.f32 %v3241_v33, %v3240_v18  ;;  %v3259_v18 = vld [vmem:[%s8396_s11 + $0x60] sm:$0xff]  ;;  %v3260_v33 = vld [vmem:[%s8396_s11 + $0x68] sm:$0xff] }
 0x466   : > { %v3243_v25 = vrot.slane %v3242_v29, 2 }
 0x468   : > { %v3244_v26 = vadd.f32 %v3243_v25, %v3242_v29  ;;  %v8261_v29 = vpack.c.bf16 %v3260_v33, %v3259_v18  ;;  %v3261_v25 = vld [vmem:[%s8396_s11 + $0x70] sm:$0xff] }
 0x469   : > { %v8271_v24 = vpack.c.bf16 %v3262_v6, %v3261_v25 }
 0x46a   : > { %v3245_v31 = vrot.slane %v3244_v26, 1 }
 0x46c   : > { %v5313_v27 = vpop.eup %5312  ;;  %v3246_v28 = vadd.f32 %v3245_v31, %v3244_v26  ;;  %v3129_v26 = vrot.slane %v3128_v41, 2 }
 0x46d   : > { %v2947_v56 = vmul.f32 %v5313_v27, %v8095_v15  ;;  %v2946_v52 = vmul.f32 %v5313_v27, %v8106_v16  ;;  %v3252_v15 = vld [vmem:[%s8396_s11 + $0x28] sm:$0xff]  ;;  %v8289_v27 = vld [vmem:[%s8396_s11 + $0x90] sm:$0x3f] }
 0x46e   : > { %4247 = vmatmul.mubr.msk.f32.vlgmr.msra.gmra.mrb[12].mxu0 %vm3273_vm15, %v3246_v28  ;;  %v8213_v12 = vpack.c.bf16 %v3252_v15, %v3251_v3  ;;  %v3130_v31 = vadd.f32 %v3129_v26, %v3128_v41  ;;  %v3766_v26 = vld [vmem:[#allocation4] sm:$0x3] }
 0x46f   : > { %5121 = vmatpush1.bf16.msra.mxu0 %v8188_v5  ;;  %4199 = vmatprep.mubr.msk.f32.mxu0 %vm3133_vm13, %v3143_v63  ;;  %v2955_v13 = vadd.f32 %v2951_v1, %v2947_v56  ;;  %v2954_v21 = vadd.f32 %v2950_v22, %v2946_v52  ;;  %v8281_v63 = vpack.c.bf16 %v3264_v17, %v3263_v10  ;;  %v4209_v10 = vld [vmem:[%s8392_s7] ss:$0 sm:$0xff] }
 0x470   : > { %5122 = vmatprep.subr.bf16.mxu0 %v8538_v11  ;;  %v3131_v1 = vrot.slane %v3130_v31, 1 }
 0x471   : > { %v2961_v16 = vsub.f32 %v2955_v13, %v8042_v34  ;;  %v2960_v57 = vsub.f32 %v2954_v21, %v8047_v60 }
 0x472   : > { %v3132_v28 = vadd.f32 %v3131_v1, %v3130_v31 }
 0x473   : > { %5124 = vmatpush1.bf16.msra.mxu0 %v8200_v48  ;;  %v2965_v38 = vmax.f32 %v2961_v16, 0.0  ;;  %v8215_v0 = vmax.f32 %v2960_v57, 0.0 }
 0x474   : > { %5125 = vmatprep.subr.bf16.mxu0 %v8538_v11 }
 0x475   : > { %vm2969_vm3 = vcmp.eq.f32.partialorder %v2965_v38, 0.0  ;;  %vm2968_vm6 = vcmp.eq.f32.partialorder %v8215_v0, 0.0 }
 0x476   : > { %v2973_v34 = vsel %vm2969_vm3, %v2955_v13, 0.0  ;;  %v2972_v60 = vsel %vm2968_vm6, %v2954_v21, 0.0 }
 0x477   : > { %5127 = vmatpush1.bf16.msra.mxu0 %v8213_v12  ;;  %v2979_v47 = vmul.f32 %v8054_v45, %v2973_v34  ;;  %v2978_v54 = vmul.f32 %v8059_v49, %v2972_v60  ;;  %v3257_v45 = vld [vmem:[%s8396_s11 + $0x50] sm:$0xff]  ;;  %v3258_v49 = vld [vmem:[%s8396_s11 + $0x58] sm:$0xff] }
 0x478   : > { %5128 = vmatprep.subr.bf16.mxu0 %v8538_v11  ;;  %v8250_v50 = vpack.c.bf16 %v3258_v49, %v3257_v45 }
 0x479   : > { %v2983_v59 = vmax.f32 %v2979_v47, 0.0  ;;  %v2982_v8 = vmax.f32 %v2978_v54, 0.0 }
 0x47b   : > { %5130 = vmatpush1.bf16.msra.mxu0 %v8226_v51  ;;  %2987 = vst.msk [vmem:[#allocation3 + $0x18] sm:$0x1f] %vm2916_vm10, %v2983_v59  ;;  %2986 = vst [vmem:[#allocation3 + $0x10] sm:$0x1f] %v2982_v8 }
 0x47c   : > { %5131 = vmatprep.subr.bf16.mxu0 %v8538_v11 }
 0x47f   : > { %5133 = vmatpush1.bf16.msra.mxu0 %v8238_v58 }
 0x480   : > { %5134 = vmatprep.subr.bf16.mxu0 %v8538_v11 }
 0x483   : > { %5136 = vmatpush1.bf16.msra.mxu0 %v8250_v50 }
 0x484   : > { %5137 = vmatprep.subr.bf16.mxu0 %v8538_v11 }
 0x487   : > { %5139 = vmatpush1.bf16.msra.mxu0 %v8261_v29 }
 0x488   : > { %5140 = vmatprep.subr.bf16.mxu0 %v8538_v11 }
 0x48b   : > { %5142 = vmatpush1.bf16.msra.mxu0 %v8271_v24 }
 0x48c   : > { %5143 = vmatprep.subr.bf16.mxu0 %v8538_v11 }
 0x48f   : > { %5145 = vmatpush1.bf16.msra.mxu0 %v8281_v63 }
 0x490   : > { %3392 = vmatprep.subr.mxu0 %v8572_v7 }
 0x493   : > { %4198 = vmatpush1.msk.msra.mxu0 %vm1173_vm14, %v8289_v27 }
 0x494   : > { %3421 = vmatmul.mubr.f32.vlgmr.msra.gmra.mrb[14].mxu0 %v3132_v28  ;;  %5190 = vmatprep.subr.bf16.mxu0 %v8538_v11 }
 0x495   : > { %5192 = vmatpush1.bf16.msra.mxu0 %v7688_v42  ;;  %4204 = vmatprep.mubr.msk.f32.mxu0 %vm1970_vm7, %v2965_v38  ;;  %v3494_v42 = vpop.f32.mrb[42].mxu1 }
 0x496   : > { %5193 = vmatprep.subr.bf16.mxu0 %v8538_v11 }
 0x499   : > { %5195 = vmatpush1.bf16.msra.mxu0 %v7727_v20  ;;  %v3496_v20 = vpop.f32.mrb[43].mxu1 }
 0x49a   : > { %5196 = vmatprep.subr.bf16.mxu0 %v8538_v11 }
 0x49d   : > { %5198 = vmatpush1.bf16.msra.mxu0 %v7737_v53  ;;  %v3505_v53 = vmul.f32 %v3494_v42, %v8153_v37 }
 0x49e   : > { %5199 = vmatprep.subr.bf16.mxu0 %v8538_v11 }
 0x4a1   : > { %5201 = vmatpush1.bf16.msra.mxu0 %v7761_v4  ;;  %v3506_v4 = vmul.f32 %v3496_v20, %v8148_v44 }
 0x4a2   : > { %5202 = vmatprep.subr.bf16.mxu0 %v8538_v11 }
 0x4a5   : > { %5204 = vmatpush1.bf16.msra.mxu0 %v7789_v23  ;;  %v3500_v23 = vpop.f32.mrb[44].mxu1 }
 0x4a6   : > { %5205 = vmatprep.subr.bf16.mxu0 %v8538_v11 }
 0x4a9   : > { %5207 = vmatpush1.bf16.msra.mxu0 %v7817_v30  ;;  %v3507_v30 = vmul.f32 %v3500_v23, %v8159_v61 }
 0x4aa   : > { %5208 = vmatprep.subr.bf16.mxu0 %v8538_v11 }
 0x4ab   : > { %v3509_v9 = vsel %vm763_vm5, %v3507_v30, 0.0  ;;  %vm3759_vm5 = vcmask 74752  }
 0x4ac   : > { %v3510_v2 = vadd.f32 %v3509_v9, %v3505_v53 }
 0x4ad   : > { %5210 = vmatpush1.bf16.msra.mxu0 %v7850_v14  ;;  %v3502_v14 = vpop.f32.mrb[45].mxu1 }
 0x4ae   : > { %5211 = vmatprep.subr.bf16.mxu0 %v8538_v11 }
 0x4b1   : > { %5213 = vmatpush1.bf16.msra.mxu0 %v7878_v55  ;;  %v3517_v55 = vsel %vm3133_vm13, %v3506_v4, 0.0 }
 0x4b2   : > { %5214 = vmatprep.subr.bf16.mxu0 %v8538_v11 }
 0x4b5   : > { %5216 = vmatpush1.bf16.msra.mxu0 %v7906_v40  ;;  %v3508_v40 = vmul.f32 %v3502_v14, %v8164_v46 }
 0x4b6   : > { %5217 = vmatprep.subr.bf16.mxu0 %v8538_v11 }
 0x4b9   : > { %5219 = vmatpush1.bf16.msra.mxu0 %v7928_v43  ;;  %v3518_v43 = vsel %vm3135_vm0, %v3508_v40, 0.0 }
 0x4ba   : > { %v3519_v22 = vadd.f32 %v3518_v43, %v3517_v55 }
 0x4bc   : > { %3594 = vmatmul.mubr.f32.vlgmr.msra.gmra.mrb[16].mxu0 %v8215_v0  ;;  %v3520_v44 = vrot.slane %v3519_v22, 4 }
 0x4be   : > { %v3521_v3 = vadd.f32 %v3520_v44, %v3519_v22 }
 0x4c0   : > { %v3522_v57 = vrot.slane %v3521_v3, 2 }
 0x4c2   : > { %v3523_v0 = vadd.f32 %v3522_v57, %v3521_v3 }
 0x4c4   : > { %v3524_v34 = vrot.slane %v3523_v0, 1 }
 0x4c6   : > { %v3525_v54 = vadd.f32 %v3524_v34, %v3523_v0 }
 0x541   : > { %v3346_v56 = vpop.f32.mrb[12].mxu0 }
 0x542   : > { %v4248_v52 = vpop.f32.mrb[13].mxu0 }
 0x567   : > { %v3422_v13 = vpop.f32.mrb[14].mxu0 }
 0x568   : > { %v3423_v37 = vadd.f32 %v3422_v13, %v3346_v56  ;;  %v3424_v21 = vpop.f32.mrb[15].mxu0 }
 0x58f   : > { %v3595_v15 = vpop.f32.mrb[16].mxu0 }
 0x590   : > { %v3599_v61 = vmul.f32 %v3595_v15, %v8178_v36  ;;  %v3597_v16 = vpop.f32.mrb[17].mxu0  ;;  %v3511_v36 = vrot.slane %v3510_v2, 4 }
 0x592   : > { %v3600_v46 = vsel %vm3239_vm1, %v3599_v61, 0.0 }
 0x593   : > { %v3601_v38 = vrot.slane %v3600_v46, 4 }
 0x595   : > { %v3602_v32 = vadd.f32 %v3601_v38, %v3600_v46 }
 0x597   : > { %v3603_v39 = vrot.slane %v3602_v32, 2 }
 0x599   : > { %v3604_v60 = vadd.f32 %v3603_v39, %v3602_v32 }
 0x59b   : > { %v3605_v47 = vrot.slane %v3604_v60, 1 }
 0x59d   : > { %v3606_v62 = vadd.f32 %v3605_v47, %v3604_v60 }
 0x59f   : > { %4264 = vmatmul.mubr.msk.f32.vlgmr.msra.gmra.mrb[46].mxu1 %vm3273_vm15, %v3606_v62 }
 0x5a0   : > { %5231 = vmatpush1.bf16.msra.mxu1 %v8188_v5  ;;  %4208 = vmatprep.mubr.msk.f32.mxu1 %vm3133_vm13, %v3525_v54  ;;  %v3512_v5 = vadd.f32 %v3511_v36, %v3510_v2 }
 0x5a1   : > { %5232 = vmatprep.subr.bf16.mxu1 %v8538_v11 }
 0x5a4   : > { %5234 = vmatpush1.bf16.msra.mxu1 %v8200_v48  ;;  %v3513_v48 = vrot.slane %v3512_v5, 2 }
 0x5a5   : > { %5235 = vmatprep.subr.bf16.mxu1 %v8538_v11 }
 0x5a8   : > { %5237 = vmatpush1.bf16.msra.mxu1 %v8213_v12  ;;  %v3514_v12 = vadd.f32 %v3513_v48, %v3512_v5 }
 0x5a9   : > { %5238 = vmatprep.subr.bf16.mxu1 %v8538_v11 }
 0x5ac   : > { %5240 = vmatpush1.bf16.msra.mxu1 %v8226_v51  ;;  %v3515_v51 = vrot.slane %v3514_v12, 1 }
 0x5ad   : > { %5241 = vmatprep.subr.bf16.mxu1 %v8538_v11 }
 0x5ae   : > { %v3516_v35 = vadd.f32 %v3515_v51, %v3514_v12 }
 0x5b0   : > { %5243 = vmatpush1.bf16.msra.mxu1 %v8238_v58 }
 0x5b1   : > { %5244 = vmatprep.subr.bf16.mxu1 %v8538_v11 }
 0x5b4   : > { %5246 = vmatpush1.bf16.msra.mxu1 %v8250_v50  ;;  %v3427_v50 = vadd.f32 %v3426_v19, %v3423_v37 }
 0x5b5   : > { %5247 = vmatprep.subr.bf16.mxu1 %v8538_v11 }
 0x5b8   : > { %5249 = vmatpush1.bf16.msra.mxu1 %v8261_v29 }
 0x5b9   : > { %5250 = vmatprep.subr.bf16.mxu1 %v8538_v11 }
 0x5bc   : > { %5252 = vmatpush1.bf16.msra.mxu1 %v8271_v24 }
 0x5bd   : > { %5253 = vmatprep.subr.bf16.mxu1 %v8538_v11 }
 0x5c0   : > { %5255 = vmatpush1.bf16.msra.mxu1 %v8281_v63  ;;  %v3789_v63 = vld [vmem:[#allocation5] sm:$0x3] }
 0x5c1   : > { %3719 = vmatprep.subr.mxu1 %v8572_v7 }
 0x5c4   : > { %4207 = vmatpush1.msk.msra.mxu1 %vm1173_vm14, %v8289_v27  ;;  %v4210_v27 = vld [vmem:[%s8393_s8] ss:$0 sm:$0xff] }
 0x5c5   : > { %3748 = vmatmul.mubr.f32.vlgmr.msra.gmra.mrb[48].mxu1 %v3516_v35 }
 0x672   : > { %v3676_v59 = vpop.f32.mrb[46].mxu1 }
 0x673   : > { %v4265_v8 = vpop.f32.mrb[47].mxu1 }
 0x698   : > { %v3749_v58 = vpop.f32.mrb[48].mxu1 }
 0x699   : > { %v3750_v45 = vadd.f32 %v3749_v58, %v3676_v59  ;;  %v3751_v49 = vpop.f32.mrb[49].mxu1 }
 0x69b   : > { %v3753_v11 = vadd.f32 %v3750_v45, %v3426_v19 }
 0x69d   : > { %v3755_v18 = vrot.slane %v3753_v11, 7 }
 0x69f   : > { %v3757_v33 = vsel %vm1929_vm2, %v3427_v50, %v3755_v18 }
 0x6a0   : > { %v3758_v7 = vmul.f32 %v3757_v33, %v3757_v33 }
 0x6a2   : > { %v3760_v41 = vsel %vm3759_vm5, %v3758_v7, 0.0 }
 0x6a3   : > { %3761 = vadd.xlane.f32.xlu0 %v3760_v41 }
 0x730   : > { %v3762_v29 = vpop.xlane.xlu0 %3761 }
 0x731   : > { %v3763_v25 = vmax.f32 %v3762_v29, 1e-24 }
 0x733   : > { %5314 = vrsqrt.f32 %v3763_v25 }
 0x73d   : > { %v5315_v6 = vpop.eup %5314 }
 0x73e   : > { %v3765_v24 = vmul.f32 %v5315_v6, %v3757_v33 }
 0x740   : > { %v3767_v17 = vadd.f32 %v3766_v26, %v3765_v24 }
 0x742   : > { %v3775_v31 = vsub.f32 %v3767_v17, %v4209_v10 }
 0x744   : > { %v3776_v1 = vmax.f32 %v3775_v31, 0.0 }
 0x746   : > { %vm3777_vm14 = vcmp.eq.f32.partialorder %v3776_v1, 0.0  ;;  %v3790_v28 = vadd.f32 %v3789_v63, %v3776_v1 }
 0x747   : > { %v3778_v42 = vsel %vm3777_vm14, %v3767_v17, 0.0 }
 0x748   : > { %v3786_v20 = vmul.f32 %v4210_v27, %v3778_v42  ;;  %3791 = vst.msk [vmem:[#allocation5] sm:$0x3] %vm3759_vm5, %v3790_v28 }
 0x749   : > { %5338 = shalt.err (!%p5335_p12)
}
 0x74a   : > { %s5339_s30 = scalar_lea.hbm %s8401_s16, 32 }
 0x74b   : > { %p5340_p13 = scmp.ne.s32.totalorder %s8401_s16, %s5339_s30  ;;  %p5345_p2 = scmp.lt.u32.totalorder %s5339_s30, %s8401_s16 }
 0x74d   : > { %p5341_p0 = pnand %p5340_p13, %p5292_p5 }
 0x74f   : > { %p5342_p1 = pneg %p5341_p0 }
 0x751   : > { %p5347_p3 = pnand %p5345_p2, %p5342_p1 }
 0x753   : > { %5350 = shalt.err (!%p5347_p3)
}
 0x754   : > { %5289 = dma.vmem_to_hbm [thread:$0]  (%p5292_p5), %s3800_s23, 32, %s8401_s16, [#allocation6]   ;;  %v3787_v53 = vmax.f32 %v3786_v20, 0.0 }
 0x756   : > { %3788 = vst.msk [vmem:[#allocation4] sm:$0x3] %vm3759_vm5, %v3787_v53 }
 0x757   : > { %5356 = dma.done.wait (%p5292_p5), [#allocation6], 32  }
 0x758   : > { %5358 = vsyncadd (%p5292_p5), [#allocation6], 4294967264 }
 0x759 PF: > { %s27_s21 = sadd.s32 1, %s5361_s21  }
 0x75a   : > { %p24_p4 = scmp.ge.s32.totalorder %s27_s21, 5  }
 0x75c   :  { %26 = sbr.rel (!%p24_p4) target bundleno = 3 (0x3), region = 119 }
 0x763   :  { %3812 = vsyncpa [#allocation6], 1 }
 0x764   :  { %3814 = vsyncpa [#allocation6 + $0x1], 1 }

</bundles_post_ra>
